<compile_context>
chip_gen: v6e
topology: v6e:2x2x1
jax: 0.10.0
libtpu: 0.0.40
codegen_flags: <defaults>
</compile_context>

<pallas_src>
import functools

import jax
import jax.numpy as jnp
from jax.experimental import pallas as pl
from jax.experimental.pallas import tpu as pltpu


# --------------------------------------------------------------------------- kernel

def _expand_g(g, n, k_c, k_g, s_g):
    """g_flat[s, r*k_c*k_g + c*k_g + gg] = g[s, r*s_g + gg]  (width n*k_c*k_g).

    Built once per grid step (amortized over all n rows of the output)."""
    ts = g.shape[0]
    kcg = k_c * k_g
    blocks = []
    for r in range(n):
        g_win = g[:, r * s_g:r * s_g + k_g]                               # (ts, k_g)
        blocks.append(
            jnp.broadcast_to(g_win[:, None, :], (ts, k_c, k_g)).reshape(ts, kcg))
    return jnp.concatenate(blocks, axis=-1)                               # (ts, n*kcg)


def _c_block(c, i, k_c, s_c, k_g):
    """c_blk[s, cc*k_g + gg] = c[s, i*s_c + cc]  (width k_c*k_g)."""
    ts = c.shape[0]
    c_win = c[:, i * s_c:i * s_c + k_c]                                   # (ts, k_c)
    return jnp.broadcast_to(c_win[:, :, None], (ts, k_c, k_g)).reshape(ts, k_c * k_g)


def _oos_kernel(c_ref, g_ref, o_ref, *, n, k_c, s_c, k_g, s_g, mode):
    # c_ref: (tM, d_c), g_ref: (tM, d_g), o_ref: (tM, n*n*k_c*k_g)
    c = c_ref[...]
    g = g_ref[...]
    ts = c.shape[0]
    kcg = k_c * k_g
    row_w = n * kcg

    # Hoisted g expansion, reused by every output row.
    g_flat = _expand_g(g, n, k_c, k_g, s_g)                               # (ts, row_w)

    # NOTE: the i / (i, r) loops below are unrolled at trace time (n, n**2 blocks);
    # typical module configs have small n so this keeps the LLO scheduler fully
    # informed without dynamic-slice relayouts.
    if mode == "fine":
        # k_c*k_g is a multiple of 128: every (i, r) block store is 128-aligned and
        # lane-dense, and only the kcg-wide product is materialized before the store.
        for i in range(n):
            c_blk = _c_block(c, i, k_c, s_c, k_g)                         # (ts, kcg)
            for r in range(n):
                lo = (i * n + r) * kcg
                prod = c_blk * g_flat[:, r * kcg:(r + 1) * kcg]
                o_ref[:, lo:lo + kcg] = prod.astype(o_ref.dtype)
    elif mode == "row":
        # row_w is a multiple of 128: one aligned row-wide store per i.  The n-fold
        # replication of the c window is a single broadcast+reshape (no concat chain).
        for i in range(n):
            c_blk = _c_block(c, i, k_c, s_c, k_g)                         # (ts, kcg)
            c_row = jnp.broadcast_to(c_blk[:, None, :],
                                     (ts, n, kcg)).reshape(ts, row_w)     # (ts, row_w)
            o_ref[:, i * row_w:(i + 1) * row_w] = (c_row * g_flat).astype(o_ref.dtype)
    else:  # mode == "full"
        # General shapes (row_w % 128 != 0): avoid masked/unaligned per-row stores by
        # building the full flat product and issuing ONE full-width store per step.
        c_rows = []
        for i in range(n):
            c_blk = _c_block(c, i, k_c, s_c, k_g)
            c_rows.append(jnp.broadcast_to(c_blk[:, None, :],
                                           (ts, n, kcg)).reshape(ts, row_w))
        c_exp = jnp.concatenate(c_rows, axis=-1)                          # (ts, n*row_w)
        g_exp = jnp.broadcast_to(g_flat[:, None, :],
                                 (ts, n, row_w)).reshape(ts, n * row_w)   # (ts, n*row_w)
        o_ref[...] = (c_exp * g_exp).astype(o_ref.dtype)


# ------------------------------------------------------------------ tiling / wrapper

def _vmem_policy():
    """Per-generation (VMEM-capacity-derived) tile budget + scoped-VMEM limit."""
    cap = None
    try:
        cap = getattr(pltpu.get_tpu_info(), "vmem_capacity_bytes", None)
    except Exception:
        cap = None
    if not cap:
        cap = 64 << 20                       # assume the smallest (v7x per-TC) VMEM
    budget = min(48 << 20, cap // 2)         # v7x: 32 MiB; v5e/v6e: 48 MiB
    vmem_limit = int(min(cap * 3 // 4, budget + (16 << 20)))
    return budget, vmem_limit


def _choose_m_tile(M, d_c, d_g, kcg, row_w, out_flat, in_isz, out_isz, mode, budget):
    """Largest M tile whose double-buffered blocks PLUS in-kernel temporaries fit."""
    if mode == "fine":
        temp_elems = 2 * row_w + 2 * kcg          # g_flat (+build) + c_blk + product
    elif mode == "row":
        temp_elems = 6 * row_w                    # g_flat (+build) + c_row (+bcast) + product
    else:
        temp_elems = 2 * row_w + 5 * out_flat     # g_flat + c_exp/g_exp/product (+build)
    per_row = 2 * ((d_c + d_g) * in_isz + out_flat * out_isz) + temp_elems * in_isz
    tm = budget // max(per_row, 1)
    tm = min(tm, 4096)                            # keep unrolled blocks / compile sane
    tm = max(16, (tm // 16) * 16)                 # 16: safe for bf16 (16,128) min tile
    return M if tm >= M else tm


def oos_sliding_window(c_s, g_s, *, k_c, s_c, k_g, s_g, block_m=None, out_dtype=None):
    B, S, d_c = c_s.shape
    d_g = g_s.shape[-1]
    assert (d_c - k_c) % s_c == 0, "d_c, k_c, s_c must give an integral window count"
    assert (d_g - k_g) % s_g == 0, "d_g, k_g, s_g must give an integral window count"
    assert (d_c - k_c) // s_c == (d_g - k_g) // s_g, "window counts must match"
    n = (d_c - k_c) // s_c + 1
    kcg = k_c * k_g
    row_w = n * kcg
    out_flat = n * row_w
    # Default keeps module semantics; pass out_dtype=jnp.bfloat16 for ~2x on this
    # write-bound kernel if downstream tolerates it.
    out_dtype = out_dtype if out_dtype is not None else c_s.dtype
    in_isz = jnp.dtype(c_s.dtype).itemsize
    out_isz = jnp.dtype(out_dtype).itemsize

    if kcg % 128 == 0:
        mode = "fine"
    elif row_w % 128 == 0:
        mode = "row"
    else:
        mode = "full"

    budget, vmem_limit = _vmem_policy()
    M = B * S
    tM = block_m if block_m is not None else _choose_m_tile(
        M, d_c, d_g, kcg, row_w, out_flat, in_isz, out_isz, mode, budget)
    num_m = pl.cdiv(M, tM)

    kernel = functools.partial(_oos_kernel, n=n, k_c=k_c, s_c=s_c,
                               k_g=k_g, s_g=s_g, mode=mode)

    # Advisory hint: output bytes dominate; one multiply per output element.
    cost = pl.CostEstimate(
        flops=M * out_flat,
        transcendentals=0,
        bytes_accessed=M * ((d_c + d_g) * in_isz + out_flat * out_isz),
    )

    # Collapse (B, S) -> M for an even "parallel" split across TensorCores.
    c2 = c_s.reshape(M, d_c)
    g2 = g_s.reshape(M, d_g)

    out_2d = pl.pallas_call(
        kernel,
        out_shape=jax.ShapeDtypeStruct((M, out_flat), out_dtype),
        grid=(num_m,),
        in_specs=[
            pl.BlockSpec((tM, d_c), lambda m: (m, 0)),
            pl.BlockSpec((tM, d_g), lambda m: (m, 0)),
        ],
        out_specs=pl.BlockSpec((tM, out_flat), lambda m: (m, 0)),
        compiler_params=pltpu.CompilerParams(
            dimension_semantics=("parallel",),
            vmem_limit_bytes=vmem_limit),
        cost_estimate=cost,
    )(c2, g2)

    # Contiguous reshape to the module's (B, S, n, n*k_c*k_g) layout — free.
    return out_2d.reshape(B, S, n, row_w)


# ---------------------------------------------------------------------------- check

def oos_sliding_window_ref(c_s, g_s, *, k_c, s_c, k_g, s_g):
    """Pure-JAX reference replicating the torch forward exactly."""
    B, S, d_c = c_s.shape
    n = (d_c - k_c) // s_c + 1
    c_win = jnp.stack([c_s[:, :, i * s_c:i * s_c + k_c] for i in range(n)], axis=2)
    g_win = jnp.stack([g_s[:, :, r * s_g:r * s_g + k_g] for r in range(n)], axis=2)
    outer = c_win[:, :, :, None, :, None] * g_win[:, :, None, :, None, :]
    return outer.reshape(B, S, n, n * k_c * k_g)


def _run_case(key, B, S, d_c, k_c, s_c, d_g, k_g, s_g):
    kc_key, kg_key = jax.random.split(key)
    c_s = jax.random.normal(kc_key, (B, S, d_c), dtype=jnp.float32)
    g_s = jax.random.normal(kg_key, (B, S, d_g), dtype=jnp.float32)
    out = oos_sliding_window(c_s, g_s, k_c=k_c, s_c=s_c, k_g=k_g, s_g=s_g)
    out = jax.block_until_ready(out)
    ref = oos_sliding_window_ref(c_s, g_s, k_c=k_c, s_c=s_c, k_g=k_g, s_g=s_g)
    n = (d_c - k_c) // s_c + 1
    assert out.shape == (B, S, n, n * k_c * k_g), out.shape
    assert jnp.allclose(out, ref, atol=1e-6, rtol=1e-6), "mismatch vs reference"


if __name__ == "__main__":
    key = jax.random.PRNGKey(0)
    k1, k2, k3 = jax.random.split(key, 3)

    # "row" path (k_c*k_g = 32, row width 128): n = 4.
    _run_case(k1, B=2, S=8, d_c=32, k_c=8, s_c=8, d_g=16, k_g=4, s_g=4)
    # "fine" path (k_c*k_g = 128), overlapping g windows: n = 4.
    _run_case(k2, B=2, S=8, d_c=64, k_c=16, s_c=16, d_g=20, k_g=8, s_g=4)
    # "full" path (row width 72, not a multiple of 128), overlapping c windows: n = 3.
    _run_case(k3, B=2, S=8, d_c=12, k_c=6, s_c=3, d_g=12, k_g=4, s_g=4)

    print("KERNEL_OK")
</pallas_src>

<mosaic_0001>
module attributes {stable_mosaic.version = 11 : i64} {
  func.func @_oos_kernel(%arg0: i32, %arg1: memref<16x32xf32, #tpu.memory_space<vmem>>, %arg2: memref<16x16xf32, #tpu.memory_space<vmem>>, %arg3: memref<16x512xf32, #tpu.memory_space<vmem>>) attributes {dimension_semantics = [#tpu.dimension_semantics<parallel>], iteration_bounds = array<i64: 1>, scalar_prefetch = 0 : i64, scratch_operands = 0 : i64, tpu.core_type = #tpu.core_type<tc>, window_params = [{transform_indices = @transform_0, window_bounds = array<i64: 16, 32>}, {transform_indices = @transform_1, window_bounds = array<i64: 16, 16>}, {transform_indices = @transform_2, window_bounds = array<i64: 16, 512>}]} {
    %c0 = arith.constant 0 : index
    %c0_0 = arith.constant 0 : index
    %0 = vector.load %arg1[%c0, %c0_0] : memref<16x32xf32, #tpu.memory_space<vmem>>, vector<16x32xf32>
    %c0_1 = arith.constant 0 : index
    %c0_2 = arith.constant 0 : index
    %1 = vector.load %arg2[%c0_1, %c0_2] : memref<16x16xf32, #tpu.memory_space<vmem>>, vector<16x16xf32>
    %2 = vector.extract_strided_slice %1 {offsets = [0, 0], sizes = [16, 4], strides = [1, 1]} : vector<16x16xf32> to vector<16x4xf32>
    %3 = vector.shape_cast %2 : vector<16x4xf32> to vector<16x1x4xf32>
    %4 = vector.shape_cast %3 : vector<16x1x4xf32> to vector<16x1x4xf32>
    %5 = vector.broadcast %4 : vector<16x1x4xf32> to vector<16x8x4xf32>
    %6 = vector.shape_cast %5 : vector<16x8x4xf32> to vector<16x32xf32>
    %7 = vector.extract_strided_slice %1 {offsets = [0, 4], sizes = [16, 4], strides = [1, 1]} : vector<16x16xf32> to vector<16x4xf32>
    %8 = vector.shape_cast %7 : vector<16x4xf32> to vector<16x1x4xf32>
    %9 = vector.shape_cast %8 : vector<16x1x4xf32> to vector<16x1x4xf32>
    %10 = vector.broadcast %9 : vector<16x1x4xf32> to vector<16x8x4xf32>
    %11 = vector.shape_cast %10 : vector<16x8x4xf32> to vector<16x32xf32>
    %12 = vector.extract_strided_slice %1 {offsets = [0, 8], sizes = [16, 4], strides = [1, 1]} : vector<16x16xf32> to vector<16x4xf32>
    %13 = vector.shape_cast %12 : vector<16x4xf32> to vector<16x1x4xf32>
    %14 = vector.shape_cast %13 : vector<16x1x4xf32> to vector<16x1x4xf32>
    %15 = vector.broadcast %14 : vector<16x1x4xf32> to vector<16x8x4xf32>
    %16 = vector.shape_cast %15 : vector<16x8x4xf32> to vector<16x32xf32>
    %17 = vector.extract_strided_slice %1 {offsets = [0, 12], sizes = [16, 4], strides = [1, 1]} : vector<16x16xf32> to vector<16x4xf32>
    %18 = vector.shape_cast %17 : vector<16x4xf32> to vector<16x1x4xf32>
    %19 = vector.shape_cast %18 : vector<16x1x4xf32> to vector<16x1x4xf32>
    %20 = vector.broadcast %19 : vector<16x1x4xf32> to vector<16x8x4xf32>
    %21 = vector.shape_cast %20 : vector<16x8x4xf32> to vector<16x32xf32>
    %22 = tpu.concatenate %6, %11, %16, %21 in 1 : vector<16x32xf32>, vector<16x32xf32>, vector<16x32xf32>, vector<16x32xf32> -> vector<16x128xf32>
    %23 = vector.extract_strided_slice %0 {offsets = [0, 0], sizes = [16, 8], strides = [1, 1]} : vector<16x32xf32> to vector<16x8xf32>
    %24 = vector.shape_cast %23 : vector<16x8xf32> to vector<16x8x1xf32>
    %25 = vector.shape_cast %24 : vector<16x8x1xf32> to vector<16x8x1xf32>
    %26 = vector.broadcast %25 : vector<16x8x1xf32> to vector<16x8x4xf32>
    %27 = vector.shape_cast %26 : vector<16x8x4xf32> to vector<16x32xf32>
    %28 = vector.shape_cast %27 : vector<16x32xf32> to vector<16x1x32xf32>
    %29 = vector.shape_cast %28 : vector<16x1x32xf32> to vector<16x1x32xf32>
    %30 = vector.broadcast %29 : vector<16x1x32xf32> to vector<16x4x32xf32>
    %31 = vector.shape_cast %30 : vector<16x4x32xf32> to vector<16x128xf32>
    %32 = arith.mulf %31, %22 : vector<16x128xf32>
    %c0_3 = arith.constant 0 : index
    %c0_4 = arith.constant 0 : index
    %33 = vector.load %arg3[%c0_3, %c0_4] : memref<16x512xf32, #tpu.memory_space<vmem>>, vector<16x128xf32>
    tpu.vector_store %arg3[%c0_3, %c0_4], %32 {strides = array<i32>} : memref<16x512xf32, #tpu.memory_space<vmem>>, vector<16x128xf32>,
    %34 = vector.extract_strided_slice %0 {offsets = [0, 8], sizes = [16, 8], strides = [1, 1]} : vector<16x32xf32> to vector<16x8xf32>
    %35 = vector.shape_cast %34 : vector<16x8xf32> to vector<16x8x1xf32>
    %36 = vector.shape_cast %35 : vector<16x8x1xf32> to vector<16x8x1xf32>
    %37 = vector.broadcast %36 : vector<16x8x1xf32> to vector<16x8x4xf32>
    %38 = vector.shape_cast %37 : vector<16x8x4xf32> to vector<16x32xf32>
    %39 = vector.shape_cast %38 : vector<16x32xf32> to vector<16x1x32xf32>
    %40 = vector.shape_cast %39 : vector<16x1x32xf32> to vector<16x1x32xf32>
    %41 = vector.broadcast %40 : vector<16x1x32xf32> to vector<16x4x32xf32>
    %42 = vector.shape_cast %41 : vector<16x4x32xf32> to vector<16x128xf32>
    %43 = arith.mulf %42, %22 : vector<16x128xf32>
    %c0_5 = arith.constant 0 : index
    %c128 = arith.constant 128 : index
    %44 = vector.load %arg3[%c0_5, %c128] : memref<16x512xf32, #tpu.memory_space<vmem>>, vector<16x128xf32>
    tpu.vector_store %arg3[%c0_5, %c128], %43 {strides = array<i32>} : memref<16x512xf32, #tpu.memory_space<vmem>>, vector<16x128xf32>,
    %45 = vector.extract_strided_slice %0 {offsets = [0, 16], sizes = [16, 8], strides = [1, 1]} : vector<16x32xf32> to vector<16x8xf32>
    %46 = vector.shape_cast %45 : vector<16x8xf32> to vector<16x8x1xf32>
    %47 = vector.shape_cast %46 : vector<16x8x1xf32> to vector<16x8x1xf32>
    %48 = vector.broadcast %47 : vector<16x8x1xf32> to vector<16x8x4xf32>
    %49 = vector.shape_cast %48 : vector<16x8x4xf32> to vector<16x32xf32>
    %50 = vector.shape_cast %49 : vector<16x32xf32> to vector<16x1x32xf32>
    %51 = vector.shape_cast %50 : vector<16x1x32xf32> to vector<16x1x32xf32>
    %52 = vector.broadcast %51 : vector<16x1x32xf32> to vector<16x4x32xf32>
    %53 = vector.shape_cast %52 : vector<16x4x32xf32> to vector<16x128xf32>
    %54 = arith.mulf %53, %22 : vector<16x128xf32>
    %c0_6 = arith.constant 0 : index
    %c256 = arith.constant 256 : index
    %55 = vector.load %arg3[%c0_6, %c256] : memref<16x512xf32, #tpu.memory_space<vmem>>, vector<16x128xf32>
    tpu.vector_store %arg3[%c0_6, %c256], %54 {strides = array<i32>} : memref<16x512xf32, #tpu.memory_space<vmem>>, vector<16x128xf32>,
    %56 = vector.extract_strided_slice %0 {offsets = [0, 24], sizes = [16, 8], strides = [1, 1]} : vector<16x32xf32> to vector<16x8xf32>
    %57 = vector.shape_cast %56 : vector<16x8xf32> to vector<16x8x1xf32>
    %58 = vector.shape_cast %57 : vector<16x8x1xf32> to vector<16x8x1xf32>
    %59 = vector.broadcast %58 : vector<16x8x1xf32> to vector<16x8x4xf32>
    %60 = vector.shape_cast %59 : vector<16x8x4xf32> to vector<16x32xf32>
    %61 = vector.shape_cast %60 : vector<16x32xf32> to vector<16x1x32xf32>
    %62 = vector.shape_cast %61 : vector<16x1x32xf32> to vector<16x1x32xf32>
    %63 = vector.broadcast %62 : vector<16x1x32xf32> to vector<16x4x32xf32>
    %64 = vector.shape_cast %63 : vector<16x4x32xf32> to vector<16x128xf32>
    %65 = arith.mulf %64, %22 : vector<16x128xf32>
    %c0_7 = arith.constant 0 : index
    %c384 = arith.constant 384 : index
    %66 = vector.load %arg3[%c0_7, %c384] : memref<16x512xf32, #tpu.memory_space<vmem>>, vector<16x128xf32>
    tpu.vector_store %arg3[%c0_7, %c384], %65 {strides = array<i32>} : memref<16x512xf32, #tpu.memory_space<vmem>>, vector<16x128xf32>,
    return
  }
  func.func @transform_0(%arg0: i32) -> (i32, i32) {
    %c0_i32 = arith.constant 0 : i32
    %c0_i32_0 = arith.constant 0 : i32
    return %arg0, %c0_i32 : i32, i32
  }
  func.func @transform_1(%arg0: i32) -> (i32, i32) {
    %c0_i32 = arith.constant 0 : i32
    %c0_i32_0 = arith.constant 0 : i32
    return %arg0, %c0_i32 : i32, i32
  }
  func.func @transform_2(%arg0: i32) -> (i32, i32) {
    %c0_i32 = arith.constant 0 : i32
    %c0_i32_0 = arith.constant 0 : i32
    return %arg0, %c0_i32 : i32, i32
  }
}

</mosaic_0001>

<bundles_post_ra>
// kernel: tpu_custom_call.1
= control target key start
LH: loop header
LB: loop body
LE: loop exit
PB: predicated region body
PF: predicated region fallthrough
CT: control target
= control target key end

     0   :  { %7 = vsyncpa [#allocation3], 0  ;;  %s13428_s0 = inlined_call_operand.hbm [shape: f32[16,32], index: 0, kind: input, shape index: {}]   ;;  %s13429_s1 = inlined_call_operand.hbm [shape: f32[16,16], index: 1, kind: input, shape index: {}]   ;;  %s13430_s2 = inlined_call_operand.hbm [shape: f32[16,512], index: 2, kind: output, shape index: {}]  }
   0x1   :  { %8 = vsyncpa [#allocation6], 0 }
   0x2   :  { %9 = vsyncpa [#allocation4], 0  ;;  %s8500_s9 = smov [#allocation2]  }
   0x3   :  { %s15_s10 = sshll.u32 %s8500_s9, 4  ;;  %s16_s10 = int_to_ptr.vmem [resolvable:$true] %s15_s10 }
   0x4   :  { %s8442_s11 = scalar_lea.vmem %s16_s10, 256  ;;  %p8447_p1 = scmp.lt.s32.totalorder %s16_s10, %s16_s10 }
   0x5   :  { %p8443_p0 = scmp.ne.s32.totalorder %s16_s10, %s8442_s11  ;;  %p8448_p2 = scmp.lt.s32.totalorder %s8442_s11, %s8442_s11 }
   0x7   :  { %p8449_p3 = por %p8448_p2, %p8447_p1 }
   0x9   :  { %p8450_p4 = pnand %p8449_p3, %p8443_p0 }
   0xb   :  { %8453 = shalt.err (!%p8450_p4)
}
   0xc   :  { %s8501_s12 = smov 128   ;;  %s8502_s13 = smov 8  }
   0xd   :  { %21 = dma.hbm_to_vmem [thread:$0]  %s13428_s0, 256, %s16_s10, [#allocation3], %s8501_s12, %s8501_s12, %s8502_s13  }
   0xe   :  { %s8503_s16 = smov [#allocation5]  }
   0xf   :  { %s27_s17 = sshll.u32 %s8503_s16, 4  ;;  %s28_s17 = int_to_ptr.vmem [resolvable:$true] %s27_s17 }
  0x10   :  { %s8462_s18 = scalar_lea.vmem %s28_s17, 256  ;;  %p8467_p6 = scmp.lt.s32.totalorder %s28_s17, %s28_s17 }
  0x11   :  { %p8463_p5 = scmp.ne.s32.totalorder %s28_s17, %s8462_s18  ;;  %p8468_p7 = scmp.lt.s32.totalorder %s8462_s18, %s8462_s18 }
  0x13   :  { %p8469_p8 = por %p8468_p7, %p8467_p6 }
  0x15   :  { %p8470_p9 = pnand %p8469_p8, %p8463_p5 }
  0x17   :  { %8473 = shalt.err (!%p8470_p9)
}
  0x18   :  { %33 = dma.hbm_to_vmem [thread:$0]  %s13429_s1, 256, %s28_s17, [#allocation6], %s8501_s12, %s8501_s12, %s8502_s13  }
  0x19   :  { %8494 = dma.done.wait [#allocation3], 256  }
  0x1a   :  { %8495 = vsyncadd [#allocation3], 4294967040 }
  0x1b   :  { %8496 = dma.done.wait [#allocation6], 256  }
  0x1c   :  { %8497 = vsyncadd [#allocation6], 4294967040  ;;  %v50_v0 = vlaneseq  ;;  %v8504_v1 = vmov 1966171168   ;;  %v8505_v5 = vmov 1983009808  }
  0x1d   :  { %v48_v2 = vunpack.c.l.s4 %v8504_v1  ;;  %v227_v6 = vunpack.c.l.s4 %v8505_v5  ;;  %v8506_v7 = vmov 1934713408   ;;  %v42_v10 = vld [vmem:[#allocation5] sm:$0xff]  ;;  %v43_v14 = vld [vmem:[#allocation5 + $0x8] sm:$0xff]  ;;  %s8507_s0 = smov 124   ;;  %s8508_s1 = smov 4  }
  0x1e   :  { %v8545_v3 = vshrl.u32 %v50_v0, 7  ;;  %v291_v8 = vunpack.c.l.s4 %v8506_v7  ;;  %v46_v16 = vcombine.high %v42_v10, %v42_v10  ;;  %v95_v17 = vcombine.high %v43_v14, %v43_v14  ;;  %s8509_s21 = smov 12   ;;  %s8510_s22 = smov 16  }
  0x1f   :  { %v49_v4 = vunpack.c.0.s8 %v48_v2  ;;  %v228_v12 = vunpack.c.0.s8 %v227_v6  ;;  %s8511_s23 = smov 20   ;;  %s8512_s24 = smov 24   ;;  %vm552_vm0 = vcmask 31744   ;;  %vm555_vm1 = vcmask 64512  }
  0x20   :  { %v8549_v11 = vsub.s32 0, %v8545_v3  ;;  %v292_v13 = vunpack.c.0.s8 %v291_v8  ;;  %s8513_s25 = smov 28   ;;  %s8514_s26 = smov 120   ;;  %vm558_vm2 = vcmask 97280   ;;  %vm561_vm3 = vcmask 130048  }
  0x21   :  { %v52_v9 = vsub.s32 %v49_v4, %v8545_v3  ;;  %v8552_v23 = vsub.s32 %v228_v12, %v8545_v3  ;;  %s8515_s27 = smov 116   ;;  %vm564_vm4 = vcmask 162816   ;;  %vm567_vm5 = vcmask 195584   ;;  %s8517_s28 = smov 32  }
  0x22   :  { %13499 = vst [vmem:[#allocation11_spill] sm:$0xff] %v8549_v11  ;;  %v8555_v24 = vsub.s32 %v292_v13, %v8545_v3  ;;  %vm570_vm6 = vcmask 228352   ;;  %s8518_s29 = smov 64   ;;  %s8519_s30 = smov 96   ;;  %vm1767_vm7 = vcmask 261120   ;;  %vm1770_vm8 = vcmask 523264  }
  0x23   :  { %v53_v15 = vrot.slane %v42_v10, %v52_v9  ;;  %v102_v18 = vrot.slane %v43_v14, %v52_v9  ;;  %v60_v20 = vrot.slane %v46_v16, %v52_v9  ;;  %v109_v22 = vrot.slane %v95_v17, %v52_v9  ;;  %13500 = vst [vmem:[#allocation12_spill] sm:$0xff] %v8552_v23  ;;  %s8520_s3 = smov [#allocation7]  }
  0x24   :  { %13501 = vst [vmem:[#allocation13_spill] sm:$0xff] %v8555_v24  ;;  %vm1773_vm9 = vcmask 785408   ;;  %s8397_s4 = sshll.u32 %s8520_s3, 4  ;;  %s8398_s4 = int_to_ptr.vmem [resolvable:$true] %s8397_s4 }
  0x25   :  { %v69_v19 = vrot.slane %v53_v15, %v52_v9  ;;  %v61_v21 = vcombine.high %v53_v15, %v53_v15  ;;  %v110_v25 = vcombine.high %v102_v18, %v102_v18  ;;  %v118_v26 = vrot.slane %v102_v18, %v52_v9  ;;  %s8474_s5 = scalar_lea.vmem %s8398_s4, 1024  ;;  %p8479_p11 = scmp.lt.s32.totalorder %s8398_s4, %s8398_s4 }
  0x26   :  { %v62_v28 = vcombine.high %v60_v20, %v60_v20  ;;  %v76_v29 = vrot.slane %v60_v20, %v52_v9  ;;  %v111_v32 = vcombine.high %v109_v22, %v109_v22  ;;  %v125_v33 = vrot.slane %v109_v22, %v52_v9  ;;  %p8475_p10 = scmp.ne.s32.totalorder %s8398_s4, %s8474_s5  ;;  %p8480_p12 = scmp.lt.s32.totalorder %s8474_s5, %s8474_s5 }
  0x27   :  { %v8558_v27 = vrot.slane %v69_v19, %v8549_v11  ;;  %v91_v30 = vcombine.high %v69_v19, %v69_v19  ;;  %v83_v31 = vrot.slane %v61_v21, %v52_v9  ;;  %v132_v34 = vrot.slane %v110_v25, %v52_v9 }
  0x28   :  { %v90_v36 = vrot.slane %v62_v28, %v52_v9  ;;  %v92_v37 = vcombine.high %v76_v29, %v76_v29  ;;  %v8566_v38 = vrot.slane %v76_v29, %v8549_v11  ;;  %v139_v41 = vrot.slane %v111_v32, %v52_v9  ;;  %p8481_p13 = por %p8480_p12, %p8479_p11 }
  0x29   :  { %573 = vrot.lane.b32.xlu0 %v8558_v27, %s8507_s0  ;;  %v8563_v35 = vrot.slane %v91_v30, %v8549_v11  ;;  %v8569_v39 = vrot.slane %v83_v31, %v8549_v11  ;;  %v93_v40 = vcombine.high %v83_v31, %v83_v31  ;;  %v140_v42 = vcombine.high %v118_v26, %v118_v26 }
  0x2a   :  { %v94_v43 = vcombine.high %v90_v36, %v90_v36  ;;  %v8572_v44 = vrot.slane %v90_v36, %v8549_v11  ;;  %v8575_v45 = vrot.slane %v92_v37, %v8549_v11  ;;  %v141_v48 = vcombine.high %v125_v33, %v125_v33  ;;  %p8482_p0 = pnand %p8481_p13, %p8475_p10 }
  0x2b   :  { %v224_v46 = vcombine.low %v8558_v27, %v8563_v35  ;;  %575 = vrot.lane.b32.xlu1 %v8569_v39, %s8507_s0  ;;  %v8582_v47 = vrot.slane %v93_v40, %v8549_v11  ;;  %v142_v49 = vcombine.high %v132_v34, %v132_v34  ;;  %v143_v50 = vcombine.high %v139_v41, %v139_v41 }
  0x2c   :  { %v8585_v51 = vrot.slane %v94_v43, %v8549_v11  ;;  %v256_v53 = vcombine.low %v8566_v38, %v8575_v45  ;;  %v8591_v54 = vrot.slane %v118_v26, %v8549_v11  ;;  %v8596_v56 = vrot.slane %v132_v34, %v8549_v11 }
  0x2d   :  { %v232_v52 = vrot.slane %v224_v46, %v8552_v23  ;;  %v240_v55 = vcombine.low %v8569_v39, %v8582_v47  ;;  %v8599_v57 = vrot.slane %v140_v42, %v8549_v11  ;;  %v8602_v58 = vrot.slane %v142_v49, %v8549_v11 }
  0x2e   :  { %v264_v59 = vrot.slane %v256_v53, %v8552_v23  ;;  %v272_v60 = vcombine.low %v8572_v44, %v8585_v51  ;;  %v8608_v61 = vrot.slane %v125_v33, %v8549_v11  ;;  %v8611_v62 = vrot.slane %v139_v41, %v8549_v11 }
  0x2f   :  { %v248_v63 = vrot.slane %v240_v55, %v8552_v23  ;;  %v8615_v0 = vrot.slane %v141_v48, %v8549_v11  ;;  %v8618_v1 = vrot.slane %v143_v50, %v8549_v11  ;;  %v360_v2 = vcombine.low %v8591_v54, %v8599_v57 }
  0x30   :  { %v280_v4 = vrot.slane %v272_v60, %v8552_v23  ;;  %v376_v5 = vcombine.low %v8596_v56, %v8602_v58  ;;  %v361_v6 = vcombine.high %v8591_v54, %v8599_v57  ;;  %v377_v7 = vcombine.high %v8596_v56, %v8602_v58 }
  0x31   :  { %v289_v8 = vcombine.high %v232_v52, %v248_v63  ;;  %v288_v9 = vcombine.low %v232_v52, %v248_v63  ;;  %v368_v10 = vrot.slane %v360_v2, %v8552_v23  ;;  %v392_v12 = vcombine.low %v8608_v61, %v8615_v0 }
  0x32   :  { %v321_v13 = vcombine.high %v264_v59, %v280_v4  ;;  %v320_v14 = vcombine.low %v264_v59, %v280_v4  ;;  %v384_v15 = vrot.slane %v376_v5, %v8552_v23  ;;  %v408_v16 = vcombine.low %v8611_v62, %v8618_v1 }
  0x33   :  { %v303_v17 = vrot.slane %v289_v8, %v8555_v24  ;;  %v8637_v18 = vrot.slane %v288_v9, %v8555_v24  ;;  %v400_v19 = vrot.slane %v392_v12, %v8552_v23  ;;  %v375_v20 = vrot.slane %v361_v6, %v8552_v23 }
  0x34   :  { %v335_v21 = vrot.slane %v321_v13, %v8555_v24  ;;  %v8643_v22 = vrot.slane %v320_v14, %v8555_v24  ;;  %v416_v25 = vrot.slane %v408_v16, %v8552_v23  ;;  %v425_v26 = vcombine.high %v368_v10, %v384_v15 }
  0x35   :  { %13502 = vst [vmem:[#allocation14_spill] sm:$0xff] %v8637_v18  ;;  %v424_v28 = vcombine.low %v368_v10, %v384_v15  ;;  %v391_v29 = vrot.slane %v377_v7, %v8552_v23  ;;  %v393_v30 = vcombine.high %v8608_v61, %v8615_v0  ;;  %v409_v31 = vcombine.high %v8611_v62, %v8618_v1 }
  0x36   :  { %13503 = vst [vmem:[#allocation15_spill] sm:$0xff] %v8643_v22  ;;  %v354_v32 = vcombine.low %v303_v17, %v335_v21  ;;  %v353_v33 = vcombine.high %v8637_v18, %v8643_v22  ;;  %v439_v34 = vrot.slane %v425_v26, %v8555_v24  ;;  %v457_v36 = vcombine.high %v400_v19, %v416_v25 }
  0x37   :  { %v8655_v37 = vrot.slane %v424_v28, %v8555_v24  ;;  %v456_v40 = vcombine.low %v400_v19, %v416_v25  ;;  %v407_v41 = vrot.slane %v393_v30, %v8552_v23  ;;  %v423_v43 = vrot.slane %v409_v31, %v8552_v23 }
  0x38   :  { %506 = vrot.lane.b32.xlu1 %v354_v32, %s8502_s13  ;;  %498 = vrot.lane.b32.xlu0 %v353_v33, %s8508_s1  ;;  %v471_v42 = vrot.slane %v457_v36, %v8555_v24  ;;  %v440_v46 = vcombine.low %v375_v20, %v391_v29  ;;  %v225_v49 = vcombine.high %v8558_v27, %v8563_v35 }
  0x39   :  { %13504 = vst [vmem:[#allocation16_spill] sm:$0xff] %v8655_v37  ;;  %v8663_v48 = vrot.slane %v456_v40, %v8555_v24  ;;  %v241_v50 = vcombine.high %v8569_v39, %v8582_v47  ;;  %v257_v52 = vcombine.high %v8566_v38, %v8575_v45  ;;  %v472_v55 = vcombine.low %v407_v41, %v423_v43 }
  0x3a   :  { %v490_v53 = vcombine.low %v439_v34, %v471_v42  ;;  %v491_v60 = vcombine.high %v439_v34, %v471_v42  ;;  %v239_v63 = vrot.slane %v225_v49, %v8552_v23  ;;  %v448_v4 = vrot.slane %v440_v46, %v8555_v24 }
  0x3b   :  { %13505 = vst [vmem:[#allocation17_spill] sm:$0xff] %v8663_v48  ;;  %v489_v59 = vcombine.high %v8655_v37, %v8663_v48  ;;  %v255_v2 = vrot.slane %v241_v50, %v8552_v23  ;;  %v480_v5 = vrot.slane %v472_v55, %v8555_v24  ;;  %v271_v6 = vrot.slane %v257_v52, %v8552_v23 }
  0x3c   :  { %508 = vrot.lane.b32.xlu1 %v490_v53, %s8502_s13  ;;  %v273_v7 = vcombine.high %v8572_v44, %v8585_v51  ;;  %v355_v8 = vcombine.high %v303_v17, %v335_v21  ;;  %v441_v14 = vcombine.high %v375_v20, %v391_v29  ;;  %v473_v25 = vcombine.high %v407_v41, %v423_v43 }
  0x3d   :  { %500 = vrot.lane.b32.xlu0 %v489_v59, %s8508_s1  ;;  %v304_v9 = vcombine.low %v239_v63, %v255_v2  ;;  %v492_v15 = vcombine.low %v448_v4, %v480_v5  ;;  %v305_v21 = vcombine.high %v239_v63, %v255_v2  ;;  %v493_v30 = vcombine.high %v448_v4, %v480_v5 }
  0x3e   :  { %v287_v13 = vrot.slane %v273_v7, %v8552_v23  ;;  %v455_v20 = vrot.slane %v441_v14, %v8555_v24  ;;  %v487_v29 = vrot.slane %v473_v25, %v8555_v24 }
  0x3f   :  { %v312_v16 = vrot.slane %v304_v9, %v8555_v24  ;;  %v319_v32 = vrot.slane %v305_v21, %v8555_v24 }
  0x40   :  { %516 = vrot.lane.b32.xlu1 %v491_v60, %s8509_s21  ;;  %v336_v19 = vcombine.low %v271_v6, %v287_v13  ;;  %v337_v26 = vcombine.high %v271_v6, %v287_v13  ;;  %v494_v34 = vcombine.low %v455_v20, %v487_v29  ;;  %v495_v40 = vcombine.high %v455_v20, %v487_v29 }
  0x41   :  { %514 = vrot.lane.b32.xlu0 %v355_v8, %s8509_s21 }
  0x42   :  { %v344_v17 = vrot.slane %v336_v19, %v8555_v24  ;;  %v351_v33 = vrot.slane %v337_v26, %v8555_v24 }
  0x44   :  { %524 = vrot.lane.b32.xlu1 %v492_v15, %s8510_s22  ;;  %v356_v28 = vcombine.low %v312_v16, %v344_v17  ;;  %v357_v31 = vcombine.high %v312_v16, %v344_v17  ;;  %v358_v36 = vcombine.low %v319_v32, %v351_v33  ;;  %v359_v41 = vcombine.high %v319_v32, %v351_v33 }
  0x46   :  { %522 = vrot.lane.b32.xlu0 %v356_v28, %s8510_s22 }
  0x48   :  { %532 = vrot.lane.b32.xlu1 %v493_v30, %s8511_s23 }
  0x4a   :  { %530 = vrot.lane.b32.xlu0 %v357_v31, %s8511_s23 }
  0x4c   :  { %540 = vrot.lane.b32.xlu1 %v494_v34, %s8512_s24 }
  0x4e   :  { %538 = vrot.lane.b32.xlu0 %v358_v36, %s8512_s24 }
  0x50   :  { %548 = vrot.lane.b32.xlu1 %v495_v40, %s8513_s25 }
  0x52   :  { %546 = vrot.lane.b32.xlu0 %v359_v41, %s8513_s25 }
  0x54   :  { %579 = vrot.lane.b32.xlu1 %v8582_v47, %s8507_s0 }
  0x56   :  { %577 = vrot.lane.b32.xlu0 %v8563_v35, %s8507_s0 }
  0x58   :  { %583 = vrot.lane.b32.xlu1 %v8572_v44, %s8507_s0 }
  0x5a   :  { %581 = vrot.lane.b32.xlu0 %v8566_v38, %s8507_s0 }
  0x5c   :  { %587 = vrot.lane.b32.xlu1 %v8585_v51, %s8507_s0 }
  0x5e   :  { %585 = vrot.lane.b32.xlu0 %v8575_v45, %s8507_s0 }
  0x60   :  { %591 = vrot.lane.b32.xlu1 %v8596_v56, %s8507_s0 }
  0x62   :  { %589 = vrot.lane.b32.xlu0 %v8591_v54, %s8507_s0 }
  0x64   :  { %595 = vrot.lane.b32.xlu1 %v8602_v58, %s8507_s0 }
  0x66   :  { %593 = vrot.lane.b32.xlu0 %v8599_v57, %s8507_s0 }
  0x68   :  { %599 = vrot.lane.b32.xlu1 %v8611_v62, %s8507_s0 }
  0x6a   :  { %597 = vrot.lane.b32.xlu0 %v8608_v61, %s8507_s0 }
  0x6c   :  { %603 = vrot.lane.b32.xlu1 %v8618_v1, %s8507_s0 }
  0x6e   :  { %601 = vrot.lane.b32.xlu0 %v8615_v0, %s8507_s0 }
  0x70   :  { %965 = vrot.lane.b32.xlu1 %v8569_v39, %s8514_s26 }
  0x72   :  { %963 = vrot.lane.b32.xlu0 %v8558_v27, %s8514_s26 }
  0x74   :  { %969 = vrot.lane.b32.xlu1 %v8582_v47, %s8514_s26 }
  0x76   :  { %967 = vrot.lane.b32.xlu0 %v8563_v35, %s8514_s26 }
  0x78   :  { %973 = vrot.lane.b32.xlu1 %v8572_v44, %s8514_s26 }
  0x7a   :  { %971 = vrot.lane.b32.xlu0 %v8566_v38, %s8514_s26 }
  0x7c   :  { %977 = vrot.lane.b32.xlu1 %v8585_v51, %s8514_s26 }
  0x7e   :  { %975 = vrot.lane.b32.xlu0 %v8575_v45, %s8514_s26 }
  0x80   :  { %981 = vrot.lane.b32.xlu1 %v8596_v56, %s8514_s26 }
  0x82   :  { %979 = vrot.lane.b32.xlu0 %v8591_v54, %s8514_s26 }
  0x84   :  { %985 = vrot.lane.b32.xlu1 %v8602_v58, %s8514_s26 }
  0x86   :  { %983 = vrot.lane.b32.xlu0 %v8599_v57, %s8514_s26 }
  0x88   :  { %989 = vrot.lane.b32.xlu1 %v8611_v62, %s8514_s26 }
  0x8a   :  { %987 = vrot.lane.b32.xlu0 %v8608_v61, %s8514_s26 }
  0x8c   :  { %993 = vrot.lane.b32.xlu1 %v8618_v1, %s8514_s26 }
  0x8e   :  { %991 = vrot.lane.b32.xlu0 %v8615_v0, %s8514_s26 }
  0x9b   :  { %v574_v42 = vpop.permute.xlu0 %573 }
  0x9d   :  { %v576_v43 = vpop.permute.xlu1 %575 }
  0xaa   :  { %v8747_v46 = vpop.permute.xlu1 %506  ;;  %v8749_v49 = vpop.permute.xlu0 %498 }
  0xab   :  { %13506 = vst [vmem:[#allocation18_spill] sm:$0xff] %v8747_v46  ;;  %13507 = vst [vmem:[#allocation19_spill] sm:$0xff] %v8749_v49 }
  0xae   :  { %v8751_v50 = vpop.permute.xlu1 %508 }
  0xaf   :  { %13508 = vst [vmem:[#allocation20_spill] sm:$0xff] %v8751_v50  ;;  %v8753_v52 = vpop.permute.xlu0 %500 }
  0xb0   :  { %13509 = vst [vmem:[#allocation21_spill] sm:$0xff] %v8753_v52 }
  0xb2   :  { %v8755_v53 = vpop.permute.xlu1 %516 }
  0xb3   :  { %13510 = vst [vmem:[#allocation22_spill] sm:$0xff] %v8755_v53  ;;  %v8757_v55 = vpop.permute.xlu0 %514 }
  0xb4   :  { %13511 = vst [vmem:[#allocation23_spill] sm:$0xff] %v8757_v55 }
  0xb6   :  { %v8759_v59 = vpop.permute.xlu1 %524 }
  0xb7   :  { %13512 = vst [vmem:[#allocation24_spill] sm:$0xff] %v8759_v59 }
  0xb8   :  { %v8761_v60 = vpop.permute.xlu0 %522 }
  0xb9   :  { %13513 = vst [vmem:[#allocation25_spill] sm:$0xff] %v8761_v60 }
  0xba   :  { %v8763_v63 = vpop.permute.xlu1 %532 }
  0xbb   :  { %13514 = vst [vmem:[#allocation26_spill] sm:$0xff] %v8763_v63 }
  0xbc   :  { %v8765_v2 = vpop.permute.xlu0 %530 }
  0xbd   :  { %13515 = vst [vmem:[#allocation27_spill] sm:$0xff] %v8765_v2 }
  0xbe   :  { %v8767_v4 = vpop.permute.xlu1 %540 }
  0xbf   :  { %13516 = vst [vmem:[#allocation28_spill] sm:$0xff] %v8767_v4 }
  0xc0   :  { %v8769_v5 = vpop.permute.xlu0 %538 }
  0xc1   :  { %13517 = vst [vmem:[#allocation29_spill] sm:$0xff] %v8769_v5 }
  0xc2   :  { %v8771_v6 = vpop.permute.xlu1 %548 }
  0xc3   :  { %13518 = vst [vmem:[#allocation30_spill] sm:$0xff] %v8771_v6 }
  0xc4   :  { %v8773_v7 = vpop.permute.xlu0 %546 }
  0xc5   :  { %13519 = vst [vmem:[#allocation31_spill] sm:$0xff] %v8773_v7 }
  0xc6   :  { %v580_v8 = vpop.permute.xlu1 %579 }
  0xc7   :  { %v637_v14 = vcombine.low %v576_v43, %v580_v8 }
  0xc8   :  { %v578_v9 = vpop.permute.xlu0 %577 }
  0xc9   :  { %v621_v15 = vcombine.low %v574_v42, %v578_v9  ;;  %v645_v17 = vrot.slane %v637_v14, %v8552_v23  ;;  %v638_v14 = vcombine.high %v576_v43, %v580_v8  ;;  %v622_v12 = vcombine.high %v574_v42, %v578_v9 }
  0xca   :  { %v584_v13 = vpop.permute.xlu1 %583 }
  0xcb   :  { %v629_v21 = vrot.slane %v621_v15, %v8552_v23  ;;  %v652_v42 = vrot.slane %v638_v14, %v8552_v23  ;;  %v636_v43 = vrot.slane %v622_v12, %v8552_v23 }
  0xcc   :  { %v582_v16 = vpop.permute.xlu0 %581 }
  0xcd   :  { %v685_v31 = vcombine.low %v629_v21, %v645_v17  ;;  %v686_v6 = vcombine.high %v629_v21, %v645_v17 }
  0xce   :  { %v588_v19 = vpop.permute.xlu1 %587 }
  0xcf   :  { %v669_v25 = vcombine.low %v584_v13, %v588_v19  ;;  %v670_v34 = vcombine.high %v584_v13, %v588_v19  ;;  %v8789_v10 = vrot.slane %v685_v31, %v8555_v24  ;;  %v700_v21 = vrot.slane %v686_v6, %v8555_v24 }
  0xd0   :  { %v586_v26 = vpop.permute.xlu0 %585 }
  0xd1   :  { %v677_v28 = vrot.slane %v669_v25, %v8552_v23  ;;  %v653_v30 = vcombine.low %v582_v16, %v586_v26  ;;  %v654_v36 = vcombine.high %v582_v16, %v586_v26 }
  0xd2   :  { %v8778_v20 = vpop.permute.xlu1 %591 }
  0xd3   :  { %v661_v29 = vrot.slane %v653_v30, %v8552_v23  ;;  %v684_v30 = vrot.slane %v670_v34, %v8552_v23  ;;  %v668_v4 = vrot.slane %v654_v36, %v8552_v23  ;;  %v701_v34 = vcombine.low %v636_v43, %v652_v42 }
  0xd4   :  { %v8781_v32 = vpop.permute.xlu0 %589 }
  0xd5   :  { %v717_v33 = vcombine.low %v661_v29, %v677_v28  ;;  %v718_v41 = vcombine.high %v661_v29, %v677_v28  ;;  %v733_v28 = vcombine.low %v668_v4, %v684_v30 }
  0xd6   :  { %v8783_v40 = vpop.permute.xlu1 %595 }
  0xd7   :  { %v8786_v15 = vrot.slane %v717_v33, %v8555_v24  ;;  %v732_v19 = vrot.slane %v718_v41, %v8555_v24  ;;  %v773_v8 = vcombine.low %v8778_v20, %v8783_v40  ;;  %v741_v26 = vrot.slane %v733_v28, %v8555_v24 }
  0xd8   :  { %v594_v25 = vpop.permute.xlu0 %593  ;;  %v774_v28 = vcombine.high %v8778_v20, %v8783_v40 }
  0xd9   :  { %v750_v13 = vcombine.high %v8789_v10, %v8786_v15  ;;  %v757_v9 = vcombine.low %v8781_v32, %v594_v25  ;;  %v751_v29 = vcombine.low %v700_v21, %v732_v19  ;;  %v781_v12 = vrot.slane %v773_v8, %v8552_v23 }
  0xda   :  { %v600_v16 = vpop.permute.xlu1 %599  ;;  %v752_v63 = vcombine.high %v700_v21, %v732_v19  ;;  %v709_v8 = vrot.slane %v701_v34, %v8555_v24 }
  0xdb   :  { %895 = vrot.lane.b32.xlu0 %v750_v13, %s8508_s1  ;;  %v765_v36 = vrot.slane %v757_v9, %v8552_v23  ;;  %v702_v9 = vcombine.high %v636_v43, %v652_v42 }
  0xdc   :  { %v598_v17 = vpop.permute.xlu0 %597  ;;  %v753_v52 = vcombine.low %v709_v8, %v741_v26 }
  0xdd   :  { %v821_v53 = vcombine.low %v765_v36, %v781_v12  ;;  %v822_v7 = vcombine.high %v765_v36, %v781_v12 }
  0xde   :  { %v604_v31 = vpop.permute.xlu1 %603 }
  0xdf   :  { %v805_v33 = vcombine.low %v600_v16, %v604_v31  ;;  %903 = vrot.lane.b32.xlu0 %v751_v29, %s8502_s13  ;;  %v734_v29 = vcombine.high %v668_v4, %v684_v30  ;;  %v806_v37 = vcombine.high %v600_v16, %v604_v31  ;;  %v8829_v4 = vrot.slane %v821_v53, %v8555_v24 }
  0xe0   :  { %v602_v41 = vpop.permute.xlu0 %601  ;;  %v754_v30 = vcombine.high %v709_v8, %v741_v26  ;;  %v716_v53 = vrot.slane %v702_v9, %v8555_v24  ;;  %v836_v43 = vrot.slane %v822_v7, %v8555_v24 }
  0xe1   :  { %v813_v14 = vrot.slane %v805_v33, %v8552_v23  ;;  %v789_v13 = vcombine.low %v598_v17, %v602_v41  ;;  %v790_v33 = vcombine.high %v598_v17, %v602_v41  ;;  %v748_v16 = vrot.slane %v734_v29, %v8555_v24 }
  0xe2   :  { %v8809_v6 = vpop.permute.xlu1 %965 }
  0xe3   :  { %v797_v59 = vrot.slane %v789_v13, %v8552_v23  ;;  %911 = vrot.lane.b32.xlu0 %v752_v63, %s8509_s21  ;;  %v758_v13 = vcombine.high %v8781_v32, %v594_v25  ;;  %v804_v20 = vrot.slane %v790_v33, %v8552_v23  ;;  %v755_v12 = vcombine.low %v716_v53, %v748_v16 }
  0xe4   :  { %v8814_v50 = vpop.permute.xlu0 %963 }
  0xe5   :  { %v853_v48 = vcombine.low %v797_v59, %v813_v14  ;;  %v854_v21 = vcombine.high %v797_v59, %v813_v14  ;;  %v820_v59 = vrot.slane %v806_v37, %v8552_v23  ;;  %v772_v25 = vrot.slane %v758_v13, %v8552_v23 }
  0xe6   :  { %v8817_v19 = vpop.permute.xlu1 %969 }
  0xe7   :  { %v8823_v63 = vrot.slane %v853_v48, %v8555_v24  ;;  %919 = vrot.lane.b32.xlu0 %v753_v52, %s8510_s22  ;;  %v868_v40 = vrot.slane %v854_v21, %v8555_v24  ;;  %v788_v52 = vrot.slane %v774_v28, %v8552_v23  ;;  %v1027_v17 = vcombine.low %v8809_v6, %v8817_v19 }
  0xe8   :  { %v8826_v42 = vpop.permute.xlu0 %967  ;;  %v869_v34 = vcombine.low %v804_v20, %v820_v59  ;;  %v756_v28 = vcombine.high %v716_v53, %v748_v16 }
  0xe9   :  { %v886_v32 = vcombine.high %v8829_v4, %v8823_v63  ;;  %v1011_v37 = vcombine.low %v8814_v50, %v8826_v42  ;;  %v887_v36 = vcombine.low %v836_v43, %v868_v40  ;;  %v837_v7 = vcombine.low %v772_v25, %v788_v52 }
  0xea   :  { %v974_v48 = vpop.permute.xlu1 %973  ;;  %v1035_v8 = vrot.slane %v1027_v17, %v8552_v23  ;;  %v888_v13 = vcombine.high %v836_v43, %v868_v40 }
  0xeb   :  { %927 = vrot.lane.b32.xlu0 %v754_v30, %s8511_s23  ;;  %897 = vrot.lane.b32.xlu1 %v886_v32, %s8508_s1  ;;  %v1019_v9 = vrot.slane %v1011_v37, %v8552_v23  ;;  %v877_v32 = vrot.slane %v869_v34, %v8555_v24  ;;  %v845_v37 = vrot.slane %v837_v7, %v8555_v24 }
  0xec   :  { %v972_v26 = vpop.permute.xlu0 %971  ;;  %v838_v34 = vcombine.high %v772_v25, %v788_v52 }
  0xed   :  { %v1075_v5 = vcombine.low %v1019_v9, %v1035_v8  ;;  %v889_v40 = vcombine.low %v845_v37, %v877_v32 }
  0xee   :  { %v978_v41 = vpop.permute.xlu1 %977  ;;  %v852_v7 = vrot.slane %v838_v34, %v8555_v24 }
  0xef   :  { %v1059_v14 = vcombine.low %v974_v48, %v978_v41  ;;  %935 = vrot.lane.b32.xlu0 %v755_v12, %s8512_s24  ;;  %905 = vrot.lane.b32.xlu1 %v887_v36, %s8502_s13  ;;  %v870_v12 = vcombine.high %v804_v20, %v820_v59  ;;  %v8876_v20 = vrot.slane %v1075_v5, %v8555_v24 }
  0xf0   :  { %v976_v29 = vpop.permute.xlu0 %975 }
  0xf1   :  { %v1067_v33 = vrot.slane %v1059_v14, %v8552_v23  ;;  %v1043_v21 = vcombine.low %v972_v26, %v976_v29  ;;  %v1060_v14 = vcombine.high %v974_v48, %v978_v41  ;;  %v1044_v16 = vcombine.high %v972_v26, %v976_v29 }
  0xf2   :  { %v8854_v30 = vpop.permute.xlu1 %981  ;;  %v1076_v48 = vcombine.high %v1019_v9, %v1035_v8  ;;  %v890_v26 = vcombine.high %v845_v37, %v877_v32  ;;  %v884_v52 = vrot.slane %v870_v12, %v8555_v24 }
  0xf3   :  { %v1051_v31 = vrot.slane %v1043_v21, %v8552_v23  ;;  %943 = vrot.lane.b32.xlu0 %v756_v28, %s8513_s25  ;;  %913 = vrot.lane.b32.xlu1 %v888_v13, %s8509_s21  ;;  %v1028_v21 = vcombine.high %v8809_v6, %v8817_v19  ;;  %v1012_v13 = vcombine.high %v8814_v50, %v8826_v42 }
  0xf4   :  { %v8860_v17 = vpop.permute.xlu0 %979  ;;  %v1074_v25 = vrot.slane %v1060_v14, %v8552_v23  ;;  %v1058_v6 = vrot.slane %v1044_v16, %v8552_v23  ;;  %v1090_v29 = vrot.slane %v1076_v48, %v8555_v24  ;;  %v891_v37 = vcombine.low %v852_v7, %v884_v52 }
  0xf5   :  { %v1107_v36 = vcombine.low %v1051_v31, %v1067_v33  ;;  %v1108_v43 = vcombine.high %v1051_v31, %v1067_v33  ;;  %v1042_v42 = vrot.slane %v1028_v21, %v8552_v23  ;;  %v1026_v8 = vrot.slane %v1012_v13, %v8552_v23 }
  0xf6   :  { %v8863_v53 = vpop.permute.xlu1 %985  ;;  %v1123_v32 = vcombine.low %v1058_v6, %v1074_v25  ;;  %v892_v48 = vcombine.high %v852_v7, %v884_v52  ;;  %v1124_v55 = vcombine.high %v1058_v6, %v1074_v25 }
  0xf7   :  { %v8868_v28 = vrot.slane %v1107_v36, %v8555_v24  ;;  %921 = vrot.lane.b32.xlu1 %v889_v40, %s8510_s22  ;;  %v1122_v50 = vrot.slane %v1108_v43, %v8555_v24  ;;  %v1163_v5 = vcombine.low %v8854_v30, %v8863_v53  ;;  %v1091_v43 = vcombine.low %v1026_v8, %v1042_v42 }
  0xf8   :  { %v8873_v59 = vpop.permute.xlu0 %983  ;;  %v1164_v52 = vcombine.high %v8854_v30, %v8863_v53 }
  0xf9   :  { %v1140_v19 = vcombine.high %v8876_v20, %v8868_v28  ;;  %v1147_v41 = vcombine.low %v8860_v17, %v8873_v59  ;;  %v1141_v12 = vcombine.low %v1090_v29, %v1122_v50  ;;  %v1171_v14 = vrot.slane %v1163_v5, %v8552_v23 }
  0xfa   :  { %v990_v31 = vpop.permute.xlu1 %989  ;;  %v1099_v5 = vrot.slane %v1091_v43, %v8555_v24  ;;  %v1148_v7 = vcombine.high %v8860_v17, %v8873_v59  ;;  %v1092_v43 = vcombine.high %v1026_v8, %v1042_v42  ;;  %v1138_v59 = vrot.slane %v1124_v55, %v8555_v24 }
  0xfb   :  { %929 = vrot.lane.b32.xlu1 %v890_v26, %s8511_s23  ;;  %1285 = vrot.lane.b32.xlu0 %v1140_v19, %s8508_s1  ;;  %v1155_v16 = vrot.slane %v1147_v41, %v8552_v23  ;;  %v1142_v26 = vcombine.high %v1090_v29, %v1122_v50  ;;  %v1131_v19 = vrot.slane %v1123_v32, %v8555_v24 }
  0xfc   :  { %v988_v9 = vpop.permute.xlu0 %987  ;;  %v1162_v42 = vrot.slane %v1148_v7, %v8552_v23 }
  0xfd   :  { %v1211_v33 = vcombine.low %v1155_v16, %v1171_v14  ;;  %v1143_v50 = vcombine.low %v1099_v5, %v1131_v19  ;;  %v1144_v17 = vcombine.high %v1099_v5, %v1131_v19 }
  0xfe   :  { %v994_v36 = vpop.permute.xlu1 %993 }
  0xff   :  { %v1195_v40 = vcombine.low %v990_v31, %v994_v36  ;;  %937 = vrot.lane.b32.xlu1 %v891_v37, %s8512_s24  ;;  %1293 = vrot.lane.b32.xlu0 %v1141_v12, %s8502_s13  ;;  %v1196_v41 = vcombine.high %v990_v31, %v994_v36  ;;  %v8911_v29 = vrot.slane %v1211_v33, %v8555_v24 }
 0x100   :  { %v992_v34 = vpop.permute.xlu0 %991  ;;  %v1178_v31 = vrot.slane %v1164_v52, %v8552_v23 }
 0x101   :  { %v1203_v21 = vrot.slane %v1195_v40, %v8552_v23  ;;  %v1179_v13 = vcombine.low %v988_v9, %v992_v34  ;;  %v1180_v37 = vcombine.high %v988_v9, %v992_v34  ;;  %13520 = vst [vmem:[#allocation32_spill] sm:$0xff] %v8911_v29  ;;  %v1212_v40 = vcombine.high %v1155_v16, %v1171_v14 }
 0x102   :  { %v1106_v9 = vrot.slane %v1092_v43, %v8555_v24  ;;  %v1227_v14 = vcombine.low %v1162_v42, %v1178_v31 }
 0x103   :  { %v1187_v2 = vrot.slane %v1179_v13, %v8552_v23  ;;  %945 = vrot.lane.b32.xlu1 %v892_v48, %s8513_s25  ;;  %1301 = vrot.lane.b32.xlu0 %v1142_v26, %s8509_s21  ;;  %v1194_v25 = vrot.slane %v1180_v37, %v8552_v23  ;;  %v1226_v8 = vrot.slane %v1212_v40, %v8555_v24 }
 0x104   :  { %v1145_v36 = vcombine.low %v1106_v9, %v1138_v59  ;;  %v1146_v34 = vcombine.high %v1106_v9, %v1138_v59  ;;  %v1228_v26 = vcombine.high %v1162_v42, %v1178_v31 }
 0x105   :  { %v1243_v12 = vcombine.low %v1187_v2, %v1203_v21  ;;  %v1244_v60 = vcombine.high %v1187_v2, %v1203_v21  ;;  %v1210_v2 = vrot.slane %v1196_v41, %v8552_v23  ;;  %v1235_v21 = vrot.slane %v1227_v14, %v8555_v24 }
 0x106   :  { %v1242_v41 = vrot.slane %v1228_v26, %v8555_v24 }
 0x107   :  { %v8914_v32 = vrot.slane %v1243_v12, %v8555_v24  ;;  %1309 = vrot.lane.b32.xlu0 %v1143_v50, %s8510_s22  ;;  %v1258_v53 = vrot.slane %v1244_v60, %v8555_v24  ;;  %v1259_v33 = vcombine.low %v1194_v25, %v1210_v2  ;;  %v1260_v13 = vcombine.high %v1194_v25, %v1210_v2 }
 0x109   :  { %13521 = vst [vmem:[#allocation33_spill] sm:$0xff] %v8914_v32  ;;  %v1276_v30 = vcombine.high %v8911_v29, %v8914_v32  ;;  %v1277_v60 = vcombine.low %v1226_v8, %v1258_v53  ;;  %v1278_v55 = vcombine.high %v1226_v8, %v1258_v53  ;;  %v1267_v16 = vrot.slane %v1259_v33, %v8555_v24 }
 0x10a   :  { %v1274_v5 = vrot.slane %v1260_v13, %v8555_v24 }
 0x10b   :  { %1287 = vrot.lane.b32.xlu1 %v1276_v30, %s8508_s1  ;;  %1317 = vrot.lane.b32.xlu0 %v1144_v17, %s8511_s23  ;;  %v1279_v48 = vcombine.low %v1235_v21, %v1267_v16  ;;  %v1280_v19 = vcombine.high %v1235_v21, %v1267_v16 }
 0x10c   :  { %v1281_v37 = vcombine.low %v1242_v41, %v1274_v5  ;;  %v1282_v12 = vcombine.high %v1242_v41, %v1274_v5 }
 0x10f   :  { %1295 = vrot.lane.b32.xlu1 %v1277_v60, %s8502_s13  ;;  %1325 = vrot.lane.b32.xlu0 %v1145_v36, %s8512_s24 }
 0x113   :  { %1303 = vrot.lane.b32.xlu1 %v1278_v55, %s8509_s21  ;;  %1333 = vrot.lane.b32.xlu0 %v1146_v34, %s8513_s25 }
 0x117   :  { %1311 = vrot.lane.b32.xlu1 %v1279_v48, %s8510_s22  ;;  %1353 = vrot.lane.b32.xlu0 %v8558_v27, %s8515_s27 }
 0x11b   :  { %1319 = vrot.lane.b32.xlu1 %v1280_v19, %s8511_s23  ;;  %1357 = vrot.lane.b32.xlu0 %v8563_v35, %s8515_s27 }
 0x11f   :  { %1327 = vrot.lane.b32.xlu1 %v1281_v37, %s8512_s24  ;;  %1361 = vrot.lane.b32.xlu0 %v8566_v38, %s8515_s27 }
 0x123   :  { %1335 = vrot.lane.b32.xlu1 %v1282_v12, %s8513_s25  ;;  %1365 = vrot.lane.b32.xlu0 %v8575_v45, %s8515_s27 }
 0x127   :  { %1355 = vrot.lane.b32.xlu1 %v8569_v39, %s8515_s27  ;;  %1369 = vrot.lane.b32.xlu0 %v8591_v54, %s8515_s27 }
 0x12b   :  { %1359 = vrot.lane.b32.xlu1 %v8582_v47, %s8515_s27  ;;  %1373 = vrot.lane.b32.xlu0 %v8599_v57, %s8515_s27 }
 0x12f   :  { %1363 = vrot.lane.b32.xlu1 %v8572_v44, %s8515_s27  ;;  %1377 = vrot.lane.b32.xlu0 %v8608_v61, %s8515_s27 }
 0x133   :  { %1367 = vrot.lane.b32.xlu1 %v8585_v51, %s8515_s27  ;;  %1381 = vrot.lane.b32.xlu0 %v8615_v0, %s8515_s27 }
 0x137   :  { %1371 = vrot.lane.b32.xlu1 %v8596_v56, %s8515_s27 }
 0x13b   :  { %1375 = vrot.lane.b32.xlu1 %v8602_v58, %s8515_s27 }
 0x13f   :  { %1379 = vrot.lane.b32.xlu1 %v8611_v62, %s8515_s27 }
 0x143   :  { %1383 = vrot.lane.b32.xlu1 %v8618_v1, %s8515_s27 }
 0x14d   :  { %v8959_v27 = vpop.permute.xlu0 %895 }
 0x151   :  { %v8961_v35 = vpop.permute.xlu0 %903 }
 0x155   :  { %v8963_v38 = vpop.permute.xlu0 %911 }
 0x159   :  { %v8965_v39 = vpop.permute.xlu0 %919 }
 0x15d   :  { %v8967_v44 = vpop.permute.xlu1 %897  ;;  %v8969_v45 = vpop.permute.xlu0 %927 }
 0x161   :  { %v8971_v47 = vpop.permute.xlu1 %905  ;;  %v8973_v51 = vpop.permute.xlu0 %935 }
 0x165   :  { %v8975_v54 = vpop.permute.xlu1 %913  ;;  %v8977_v56 = vpop.permute.xlu0 %943 }
 0x169   :  { %v8979_v57 = vpop.permute.xlu1 %921 }
 0x16d   :  { %v8981_v58 = vpop.permute.xlu1 %929  ;;  %v8983_v61 = vpop.permute.xlu0 %1285 }
 0x16e   :  { %13522 = vst [vmem:[#allocation34_spill] sm:$0xff] %v8981_v58 }
 0x171   :  { %v8985_v62 = vpop.permute.xlu0 %1293  ;;  %v8987_v0 = vpop.permute.xlu1 %937 }
 0x172   :  { %13523 = vst [vmem:[#allocation35_spill] sm:$0xff] %v8987_v0 }
 0x175   :  { %v8989_v1 = vpop.permute.xlu0 %1301  ;;  %v8991_v52 = vpop.permute.xlu1 %945 }
 0x176   :  { %13524 = vst [vmem:[#allocation36_spill] sm:$0xff] %v8991_v52 }
 0x179   :  { %v8993_v50 = vpop.permute.xlu0 %1309 }
 0x17d   :  { %v8995_v7 = vpop.permute.xlu1 %1287  ;;  %v8997_v40 = vpop.permute.xlu0 %1317 }
 0x17e   :  { %13525 = vst [vmem:[#allocation37_spill] sm:$0xff] %v8995_v7 }
 0x181   :  { %v8999_v43 = vpop.permute.xlu1 %1295  ;;  %v9001_v2 = vpop.permute.xlu0 %1325 }
 0x182   :  { %13526 = vst [vmem:[#allocation38_spill] sm:$0xff] %v8999_v43 }
 0x185   :  { %v9003_v25 = vpop.permute.xlu1 %1303  ;;  %v9005_v30 = vpop.permute.xlu0 %1333 }
 0x186   :  { %13527 = vst [vmem:[#allocation39_spill] sm:$0xff] %v9003_v25 }
 0x189   :  { %v9007_v53 = vpop.permute.xlu1 %1311  ;;  %v1354_v17 = vpop.permute.xlu0 %1353 }
 0x18a   :  { %13528 = vst [vmem:[#allocation40_spill] sm:$0xff] %v9007_v53 }
 0x18d   :  { %v9009_v59 = vpop.permute.xlu1 %1319  ;;  %v1358_v31 = vpop.permute.xlu0 %1357 }
 0x18e   :  { %13529 = vst [vmem:[#allocation41_spill] sm:$0xff] %v9009_v59  ;;  %v1401_v34 = vcombine.low %v1354_v17, %v1358_v31  ;;  %v1402_v25 = vcombine.high %v1354_v17, %v1358_v31 }
 0x190   :  { %v1409_v19 = vrot.slane %v1401_v34, %v8552_v23 }
 0x191   :  { %v9011_v42 = vpop.permute.xlu1 %1327  ;;  %v1362_v8 = vpop.permute.xlu0 %1361 }
 0x192   :  { %13530 = vst [vmem:[#allocation42_spill] sm:$0xff] %v9011_v42 }
 0x195   :  { %v9013_v9 = vpop.permute.xlu1 %1335  ;;  %v1366_v60 = vpop.permute.xlu0 %1365 }
 0x196   :  { %13531 = vst [vmem:[#allocation43_spill] sm:$0xff] %v9013_v9  ;;  %v1433_v13 = vcombine.low %v1362_v8, %v1366_v60  ;;  %v1434_v49 = vcombine.high %v1362_v8, %v1366_v60 }
 0x198   :  { %v1441_v37 = vrot.slane %v1433_v13, %v8552_v23  ;;  %v1448_v8 = vrot.slane %v1434_v49, %v8552_v23 }
 0x199   :  { %v1356_v33 = vpop.permute.xlu1 %1355  ;;  %v9015_v14 = vpop.permute.xlu0 %1369 }
 0x19d   :  { %v1360_v36 = vpop.permute.xlu1 %1359  ;;  %v9018_v26 = vpop.permute.xlu0 %1373 }
 0x19e   :  { %v1417_v55 = vcombine.low %v1356_v33, %v1360_v36  ;;  %v1418_v42 = vcombine.high %v1356_v33, %v1360_v36 }
 0x1a0   :  { %v1425_v21 = vrot.slane %v1417_v55, %v8552_v23  ;;  %v1432_v33 = vrot.slane %v1418_v42, %v8552_v23 }
 0x1a1   :  { %v1364_v16 = vpop.permute.xlu1 %1363  ;;  %v1378_v9 = vpop.permute.xlu0 %1377 }
 0x1a2   :  { %v1465_v41 = vcombine.low %v1409_v19, %v1425_v21  ;;  %v1466_v34 = vcombine.high %v1409_v19, %v1425_v21 }
 0x1a4   :  { %v9024_v55 = vrot.slane %v1465_v41, %v8555_v24 }
 0x1a5   :  { %v1368_v48 = vpop.permute.xlu1 %1367  ;;  %v1382_v31 = vpop.permute.xlu0 %1381 }
 0x1a6   :  { %v1449_v5 = vcombine.low %v1364_v16, %v1368_v48  ;;  %v1450_v46 = vcombine.high %v1364_v16, %v1368_v48  ;;  %v1569_v19 = vcombine.low %v1378_v9, %v1382_v31 }
 0x1a8   :  { %v1457_v12 = vrot.slane %v1449_v5, %v8552_v23  ;;  %v1464_v13 = vrot.slane %v1450_v46, %v8552_v23  ;;  %v1416_v46 = vrot.slane %v1402_v25, %v8552_v23  ;;  %v1577_v25 = vrot.slane %v1569_v19, %v8552_v23 }
 0x1a9   :  { %v1372_v6 = vpop.permute.xlu1 %1371 }
 0x1aa   :  { %v1497_v22 = vcombine.low %v1441_v37, %v1457_v12  ;;  %v1498_v18 = vcombine.high %v1441_v37, %v1457_v12  ;;  %v1513_v21 = vcombine.low %v1448_v8, %v1464_v13  ;;  %v1481_v49 = vcombine.low %v1416_v46, %v1432_v33 }
 0x1ab   :  { %v1482_v7 = vcombine.high %v1416_v46, %v1432_v33 }
 0x1ac   :  { %v9027_v59 = vrot.slane %v1497_v22, %v8555_v24  ;;  %v1512_v16 = vrot.slane %v1498_v18, %v8555_v24  ;;  %v1480_v22 = vrot.slane %v1466_v34, %v8555_v24  ;;  %v1537_v18 = vcombine.low %v9015_v14, %v9018_v26 }
 0x1ad   :  { %v1376_v53 = vpop.permute.xlu1 %1375  ;;  %v1489_v43 = vrot.slane %v1481_v49, %v8555_v24  ;;  %v1538_v49 = vcombine.high %v9015_v14, %v9018_v26 }
 0x1ae   :  { %v1530_v5 = vcombine.high %v9024_v55, %v9027_v59  ;;  %v1553_v60 = vcombine.low %v1372_v6, %v1376_v53  ;;  %v1531_v48 = vcombine.low %v1480_v22, %v1512_v16  ;;  %v1545_v37 = vrot.slane %v1537_v18, %v8552_v23 }
 0x1af   :  { %v1532_v34 = vcombine.high %v1480_v22, %v1512_v16  ;;  %v1570_v18 = vcombine.high %v1378_v9, %v1382_v31  ;;  %v1554_v58 = vcombine.high %v1372_v6, %v1376_v53  ;;  %v1496_v9 = vrot.slane %v1482_v7, %v8555_v24  ;;  %v40_v7 = vld [vmem:[#allocation2] sm:$0xff] }
 0x1b0   :  { %1675 = vrot.lane.b32.xlu0 %v1530_v5, %s8508_s1  ;;  %v1561_v42 = vrot.slane %v1553_v60, %v8552_v23  ;;  %v1521_v5 = vrot.slane %v1513_v21, %v8555_v24  ;;  %v1514_v60 = vcombine.high %v1448_v8, %v1464_v13  ;;  %v9080_v19 = vrot.slane %v40_v7, %v8549_v11 }
 0x1b1   :  { %v1380_v17 = vpop.permute.xlu1 %1379  ;;  %v1568_v33 = vrot.slane %v1554_v58, %v8552_v23 }
 0x1b2   :  { %v1601_v36 = vcombine.low %v1545_v37, %v1561_v42  ;;  %v1602_v21 = vcombine.high %v1545_v37, %v1561_v42  ;;  %v1528_v13 = vrot.slane %v1514_v60, %v8555_v24  ;;  %13532 = vst [vmem:[#allocation44_spill] sm:$0xff] %v9080_v19 }
 0x1b4   :  { %1683 = vrot.lane.b32.xlu0 %v1531_v48, %s8502_s13  ;;  %v1533_v48 = vcombine.low %v1489_v43, %v1521_v5  ;;  %v9052_v16 = vrot.slane %v1601_v36, %v8555_v24  ;;  %v1584_v36 = vrot.slane %v1570_v18, %v8552_v23  ;;  %v1535_v26 = vcombine.low %v1496_v9, %v1528_v13 }
 0x1b5   :  { %v1384_v41 = vpop.permute.xlu1 %1383  ;;  %v1536_v58 = vcombine.high %v1496_v9, %v1528_v13 }
 0x1b6   :  { %v1585_v12 = vcombine.low %v1380_v17, %v1384_v41  ;;  %v1586_v0 = vcombine.high %v1380_v17, %v1384_v41  ;;  %v1792_v41 = vsub.s32 2, %v8545_v3 }
 0x1b8   :  { %v1593_v52 = vrot.slane %v1585_v12, %v8552_v23  ;;  %1691 = vrot.lane.b32.xlu0 %v1532_v34, %s8509_s21  ;;  %v1600_v8 = vrot.slane %v1586_v0, %v8552_v23  ;;  %v1616_v0 = vrot.slane %v1602_v21, %v8555_v24 }
 0x1ba   :  { %v1633_v32 = vcombine.low %v1577_v25, %v1593_v52  ;;  %v1634_v29 = vcombine.high %v1577_v25, %v1593_v52  ;;  %v1534_v52 = vcombine.high %v1489_v43, %v1521_v5  ;;  %v1552_v43 = vrot.slane %v1538_v49, %v8552_v23 }
 0x1bb   :  { %v1649_v14 = vcombine.low %v1584_v36, %v1600_v8  ;;  %v1650_v37 = vcombine.high %v1584_v36, %v1600_v8  ;;  %v9085_v5 = vrot.slane %v40_v7, %v1792_v41  ;;  %v1806_v25 = vsub.s32 4, %v8545_v3 }
 0x1bc   :  { %1699 = vrot.lane.b32.xlu0 %v1533_v48, %s8510_s22  ;;  %v9055_v22 = vrot.slane %v1633_v32, %v8555_v24  ;;  %v1648_v53 = vrot.slane %v1634_v29, %v8555_v24  ;;  %v1617_v17 = vcombine.low %v1552_v43, %v1568_v33  ;;  %v1618_v34 = vcombine.high %v1552_v43, %v1568_v33 }
 0x1bd   :  { %v1657_v46 = vrot.slane %v1649_v14, %v8555_v24  ;;  %13533 = vst [vmem:[#allocation45_spill] sm:$0xff] %v9085_v5  ;;  %v1664_v48 = vrot.slane %v1650_v37, %v8555_v24  ;;  %v9092_v21 = vrot.slane %v40_v7, %v1806_v25  ;;  %v1820_v49 = vsub.s32 6, %v8545_v3 }
 0x1be   :  { %v1666_v6 = vcombine.high %v9052_v16, %v9055_v22  ;;  %v1667_v29 = vcombine.low %v1616_v0, %v1648_v53  ;;  %v1668_v31 = vcombine.high %v1616_v0, %v1648_v53  ;;  %v1625_v42 = vrot.slane %v1617_v17, %v8555_v24 }
 0x1bf   :  { %v1632_v18 = vrot.slane %v1618_v34, %v8555_v24  ;;  %13534 = vst [vmem:[#allocation46_spill] sm:$0xff] %v9092_v21  ;;  %v9097_v8 = vrot.slane %v40_v7, %v1820_v49  ;;  %v1799_v33 = vsub.s32 3, %v8545_v3  ;;  %v1813_v43 = vsub.s32 5, %v8545_v3 }
 0x1c0   :  { %1707 = vrot.lane.b32.xlu0 %v1534_v52, %s8511_s23  ;;  %1677 = vrot.lane.b32.xlu1 %v1666_v6, %s8508_s1  ;;  %v1669_v12 = vcombine.low %v1625_v42, %v1657_v46  ;;  %v1670_v60 = vcombine.high %v1625_v42, %v1657_v46  ;;  %v1785_v52 = vsub.s32 1, %v8545_v3  ;;  %v41_v6 = vld [vmem:[#allocation2 + $0x8] sm:$0xff] }
 0x1c1   :  { %v1671_v13 = vcombine.low %v1632_v18, %v1664_v48  ;;  %13535 = vst [vmem:[#allocation47_spill] sm:$0xff] %v9097_v8  ;;  %v1672_v53 = vcombine.high %v1632_v18, %v1664_v48  ;;  %v9106_v36 = vrot.slane %v41_v6, %v8549_v11  ;;  %v9109_v0 = vrot.slane %v40_v7, %v1799_v33 }
 0x1c2   :  { %v9102_v9 = vrot.slane %v40_v7, %v1785_v52  ;;  %v9113_v14 = vrot.slane %v41_v6, %v1792_v41  ;;  %v9120_v17 = vrot.slane %v41_v6, %v1806_v25  ;;  %v9130_v46 = vrot.slane %v41_v6, %v1785_v52 }
 0x1c3   :  { %13537 = vst [vmem:[#allocation49_spill] sm:$0xff] %v9106_v36  ;;  %13538 = vst [vmem:[#allocation50_spill] sm:$0xff] %v9109_v0  ;;  %v9136_v42 = vrot.slane %v41_v6, %v1813_v43 }
 0x1c4   :  { %1715 = vrot.lane.b32.xlu0 %v1535_v26, %s8512_s24  ;;  %1685 = vrot.lane.b32.xlu1 %v1667_v29, %s8502_s13  ;;  %13536 = vst [vmem:[#allocation48_spill] sm:$0xff] %v9102_v9  ;;  %13539 = vst [vmem:[#allocation51_spill] sm:$0xff] %v9113_v14  ;;  %v9116_v26 = vrot.slane %v40_v7, %v1813_v43  ;;  %v1827_v29 = vsub.s32 7, %v8545_v3  ;;  %v9133_v3 = vrot.slane %v41_v6, %v1799_v33 }
 0x1c5   :  { %13541 = vst [vmem:[#allocation53_spill] sm:$0xff] %v9120_v17  ;;  %13544 = vst [vmem:[#allocation56_spill] sm:$0xff] %v9130_v46 }
 0x1c6   :  { %13540 = vst [vmem:[#allocation52_spill] sm:$0xff] %v9116_v26  ;;  %13545 = vst [vmem:[#allocation57_spill] sm:$0xff] %v9133_v3 }
 0x1c7   :  { %13546 = vst [vmem:[#allocation58_spill] sm:$0xff] %v9136_v42 }
 0x1c8   :  { %1723 = vrot.lane.b32.xlu0 %v1536_v58, %s8513_s25  ;;  %1693 = vrot.lane.b32.xlu1 %v1668_v31, %s8509_s21  ;;  %v9123_v58 = vrot.slane %v40_v7, %v1827_v29  ;;  %v9126_v31 = vrot.slane %v41_v6, %v1820_v49  ;;  %v9139_v7 = vrot.slane %v41_v6, %v1827_v29 }
 0x1ca   :  { %13542 = vst [vmem:[#allocation54_spill] sm:$0xff] %v9123_v58  ;;  %13543 = vst [vmem:[#allocation55_spill] sm:$0xff] %v9126_v31 }
 0x1cb   :  { %13547 = vst [vmem:[#allocation59_spill] sm:$0xff] %v9139_v7 }
 0x1cc   :  { %1701 = vrot.lane.b32.xlu1 %v1669_v12, %s8510_s22  ;;  %1781 = vbcast.lane.b32.xlu0 %v9080_v19, 256  ;;  %v13550_v19 = vmov 0.0  }
 0x1d0   :  { %1709 = vrot.lane.b32.xlu1 %v1670_v60, %s8511_s23  ;;  %1795 = vbcast.lane.b32.xlu0 %v9085_v5, 256 }
 0x1d4   :  { %1717 = vrot.lane.b32.xlu1 %v1671_v13, %s8512_s24  ;;  %1809 = vbcast.lane.b32.xlu0 %v9092_v21, 256  ;;  %v13549_v21 = vcombine.low %v8789_v10, %v8786_v15 }
 0x1d6   :  { %v949_v5 = vsel %vm552_vm0, %v13549_v21, %v8959_v27 }
 0x1d8   :  { %1725 = vrot.lane.b32.xlu1 %v1672_v53, %s8513_s25  ;;  %1823 = vbcast.lane.b32.xlu0 %v9097_v8, 256 }
 0x1dc   :  { %1788 = vbcast.lane.b32.xlu1 %v9102_v9, 256  ;;  %1837 = vbcast.lane.b32.xlu0 %v9106_v36, 256 }
 0x1e0   :  { %1802 = vbcast.lane.b32.xlu1 %v9109_v0, 256  ;;  %1851 = vbcast.lane.b32.xlu0 %v9113_v14, 256 }
 0x1e4   :  { %1816 = vbcast.lane.b32.xlu1 %v9116_v26, 256  ;;  %1865 = vbcast.lane.b32.xlu0 %v9120_v17, 256 }
 0x1e8   :  { %1830 = vbcast.lane.b32.xlu1 %v9123_v58, 256  ;;  %1879 = vbcast.lane.b32.xlu0 %v9126_v31, 256 }
 0x1ec   :  { %1844 = vbcast.lane.b32.xlu1 %v9130_v46, 256 }
 0x1f0   :  { %1858 = vbcast.lane.b32.xlu1 %v9133_v3, 256 }
 0x1f4   :  { %1872 = vbcast.lane.b32.xlu1 %v9136_v42, 256 }
 0x1f8   :  { %1886 = vbcast.lane.b32.xlu1 %v9139_v7, 256  ;;  %v13467_v7 = vmov 0.0  }
 0x222   :  { %v9142_v41 = vpop.permute.xlu0 %1675 }
 0x226   :  { %v9144_v37 = vpop.permute.xlu0 %1683 }
 0x22a   :  { %v9146_v12 = vpop.permute.xlu0 %1691 }
 0x22e   :  { %v9148_v34 = vpop.permute.xlu0 %1699 }
 0x232   :  { %v9150_v25 = vpop.permute.xlu1 %1677  ;;  %v9152_v60 = vpop.permute.xlu0 %1707 }
 0x236   :  { %v9154_v48 = vpop.permute.xlu1 %1685  ;;  %v9156_v18 = vpop.permute.xlu0 %1715 }
 0x23a   :  { %v9158_v49 = vpop.permute.xlu1 %1693  ;;  %v9160_v13 = vpop.permute.xlu0 %1723 }
 0x23e   :  { %v9162_v52 = vpop.permute.xlu1 %1701  ;;  %v9164_v6 = vpop.permute.xlu0 %1781 }
 0x23f   :  { %v9168_v53 = vrot.slane %v9164_v6, %v8552_v23 }
 0x241   :  { %v9172_v33 = vrot.slane %v9168_v53, %v8555_v24 }
 0x242   :  { %v9174_v43 = vpop.permute.xlu1 %1709  ;;  %v9176_v29 = vpop.permute.xlu0 %1795 }
 0x243   :  { %v9180_v32 = vrot.slane %v9176_v29, %v8552_v23  ;;  %v1933_v42 = vcombine.high %v9172_v33, %v13467_v7 }
 0x245   :  { %v9186_v3 = vrot.slane %v9180_v32, %v8555_v24  ;;  %2688 = vrot.lane.b32.xlu0 %v1933_v42, %s8508_s1 }
 0x246   :  { %v9189_v46 = vpop.permute.xlu1 %1717  ;;  %v9191_v58 = vpop.permute.xlu0 %1809 }
 0x247   :  { %v9195_v31 = vrot.slane %v9191_v58, %v8552_v23  ;;  %v2031_v26 = vcombine.high %v9186_v3, %v13467_v7 }
 0x249   :  { %v9201_v17 = vrot.slane %v9195_v31, %v8555_v24  ;;  %2692 = vrot.lane.b32.xlu0 %v2031_v26, %s8508_s1 }
 0x24a   :  { %v9204_v0 = vpop.permute.xlu1 %1725  ;;  %v9206_v42 = vpop.permute.xlu0 %1823 }
 0x24b   :  { %13548 = vst [vmem:[#allocation60_spill] sm:$0xff] %v9201_v17  ;;  %v9210_v14 = vrot.slane %v9206_v42, %v8552_v23  ;;  %v2129_v9 = vcombine.high %v9201_v17, %v13467_v7 }
 0x24d   :  { %v9216_v36 = vrot.slane %v9210_v14, %v8555_v24  ;;  %2696 = vrot.lane.b32.xlu0 %v2129_v9, %s8508_s1  ;;  %v951_v9 = vsel %vm555_vm1, %v949_v5, %v8961_v35 }
 0x24e   :  { %v9219_v8 = vpop.permute.xlu1 %1788  ;;  %v9221_v26 = vpop.permute.xlu0 %1837  ;;  %v953_v17 = vsel %vm558_vm2, %v951_v9, %v8963_v38  ;;  %v13551_v38 = vcombine.low %v8876_v20, %v8868_v28 }
 0x24f   :  { %v9230_v7 = vrot.slane %v9219_v8, %v8552_v23  ;;  %v2227_v11 = vcombine.high %v9216_v36, %v13550_v19  ;;  %v955_v15 = vsel %vm561_vm3, %v953_v17, %v8965_v39 }
 0x250   :  { %v957_v35 = vsel %vm564_vm4, %v955_v15, %v8969_v45  ;;  %v1339_v5 = vsel %vm552_vm0, %v13551_v38, %v8983_v61 }
 0x251   :  { %v9240_v10 = vrot.slane %v9230_v7, %v8555_v24  ;;  %2700 = vrot.lane.b32.xlu0 %v2227_v11, %s8508_s1  ;;  %v959_v11 = vsel %vm567_vm5, %v957_v35, %v8973_v51  ;;  %v1341_v45 = vsel %vm555_vm1, %v1339_v5, %v8985_v62 }
 0x252   :  { %v9245_v27 = vpop.permute.xlu1 %1802  ;;  %v9260_v17 = vpop.permute.xlu0 %1851  ;;  %v961_v28 = vsel %vm570_vm6, %v959_v11, %v8977_v56  ;;  %v1343_v20 = vsel %vm558_vm2, %v1341_v45, %v8989_v1  ;;  %v9282_v56 = vrot.slane %v9221_v26, %v8552_v23  ;;  %v13552_v1 = vcombine.low %v9024_v55, %v9027_v59 }
 0x253   :  { %v9256_v21 = vrot.slane %v9245_v27, %v8552_v23  ;;  %v1982_v39 = vcombine.high %v9240_v10, %v13550_v19  ;;  %v1345_v9 = vsel %vm561_vm3, %v1343_v20, %v8993_v50 }
 0x254   :  { %v1347_v62 = vsel %vm564_vm4, %v1345_v9, %v8997_v40  ;;  %v1729_v15 = vsel %vm552_vm0, %v13552_v1, %v9142_v41 }
 0x255   :  { %v9272_v61 = vrot.slane %v9256_v21, %v8555_v24  ;;  %2690 = vrot.lane.b32.xlu1 %v1982_v39, %s8508_s1  ;;  %1745 = vrot.lane.b32.xlu0 %v961_v28, %s8517_s28  ;;  %v1349_v38 = vsel %vm567_vm5, %v1347_v62, %v9001_v2  ;;  %v1731_v5 = vsel %vm555_vm1, %v1729_v15, %v9144_v37 }
 0x256   :  { %v9278_v51 = vpop.permute.xlu1 %1816  ;;  %v1351_v40 = vsel %vm570_vm6, %v1349_v38, %v9005_v30  ;;  %v1733_v59 = vsel %vm558_vm2, %v1731_v5, %v9146_v12  ;;  %v9310_v41 = vpop.permute.xlu0 %1865  ;;  %v9319_v30 = vrot.slane %v9282_v56, %v8555_v24  ;;  %v9323_v12 = vrot.slane %v9260_v17, %v8552_v23  ;;  %v13555_v5 = vld [vmem:[#allocation37_spill] sm:$0xff] }
 0x257   :  { %v9293_v50 = vrot.slane %v9278_v51, %v8552_v23  ;;  %v2080_v35 = vcombine.high %v9272_v61, %v13550_v19  ;;  %v1735_v2 = vsel %vm561_vm3, %v1733_v59, %v9148_v34  ;;  %v13553_v28 = vcombine.low %v8829_v4, %v8823_v63  ;;  %v13557_v59 = vld [vmem:[#allocation33_spill] sm:$0xff] }
 0x258   :  { %v1737_v39 = vsel %vm564_vm4, %v1735_v2, %v9152_v60  ;;  %v9352_v63 = vrot.slane %v9323_v12, %v8555_v24  ;;  %v2325_v4 = vcombine.high %v9319_v30, %v13550_v19 }
 0x259   :  { %v9307_v55 = vrot.slane %v9293_v50, %v8555_v24  ;;  %2694 = vrot.lane.b32.xlu1 %v2080_v35, %s8508_s1  ;;  %1753 = vrot.lane.b32.xlu0 %v1351_v40, %s8518_s29  ;;  %v1739_v45 = vsel %vm567_vm5, %v1737_v39, %v9156_v18  ;;  %v950_v20 = vsel %vm552_vm0, %v13553_v28, %v8967_v44  ;;  %v13554_v35 = vld [vmem:[#allocation34_spill] sm:$0xff]  ;;  %v13556_v40 = vld [vmem:[#allocation32_spill] sm:$0xff]  ;;  %v13559_v28 = vld [vmem:[#allocation35_spill] sm:$0xff] }
 0x25a   :  { %v9315_v37 = vpop.permute.xlu1 %1830  ;;  %v1741_v9 = vsel %vm570_vm6, %v1739_v45, %v9160_v13  ;;  %v952_v62 = vsel %vm555_vm1, %v950_v20, %v8971_v47  ;;  %v9358_v44 = vrot.slane %v9310_v41, %v8552_v23  ;;  %v9366_v1 = vpop.permute.xlu0 %1879  ;;  %v13558_v2 = vcombine.low %v13556_v40, %v13557_v59  ;;  %v13564_v59 = vld [vmem:[#allocation41_spill] sm:$0xff] }
 0x25b   :  { %v9329_v11 = vrot.slane %v9315_v37, %v8552_v23  ;;  %v2178_v34 = vcombine.high %v9307_v55, %v13550_v19  ;;  %v954_v13 = vsel %vm558_vm2, %v952_v62, %v8975_v54 }
 0x25c   :  { %v956_v15 = vsel %vm561_vm3, %v954_v13, %v8979_v57  ;;  %v1340_v39 = vsel %vm552_vm0, %v13558_v2, %v13555_v5  ;;  %v9381_v54 = vrot.slane %v9358_v44, %v8555_v24  ;;  %v2423_v57 = vcombine.high %v9352_v63, %v13550_v19 }
 0x25d   :  { %v9344_v60 = vrot.slane %v9329_v11, %v8555_v24  ;;  %2698 = vrot.lane.b32.xlu1 %v2178_v34, %s8508_s1  ;;  %1761 = vrot.lane.b32.xlu0 %v1741_v9, %s8519_s30  ;;  %v958_v38 = vsel %vm564_vm4, %v956_v15, %v13554_v35  ;;  %v9387_v34 = vrot.slane %v9366_v1, %v8552_v23  ;;  %v13560_v9 = vld [vmem:[#allocation38_spill] sm:$0xff]  ;;  %v13563_v35 = vld [vmem:[#allocation40_spill] sm:$0xff] }
 0x25e   :  { %v9360_v18 = vpop.permute.xlu1 %1844  ;;  %v960_v20 = vsel %vm567_vm5, %v958_v38, %v13559_v28  ;;  %v1342_v62 = vsel %vm555_vm1, %v1340_v39, %v13560_v9  ;;  %v13565_v2 = vcombine.low %v9052_v16, %v9055_v22  ;;  %v13566_v9 = vld [vmem:[#allocation42_spill] sm:$0xff] }
 0x25f   :  { %v2276_v47 = vcombine.high %v9344_v60, %v13550_v19  ;;  %v9404_v40 = vrot.slane %v9360_v18, %v8552_v23  ;;  %v9416_v28 = vrot.slane %v9387_v34, %v8555_v24 }
 0x260   :  { %v1730_v39 = vsel %vm552_vm0, %v13565_v2, %v9150_v25 }
 0x261   :  { %2702 = vrot.lane.b32.xlu1 %v2276_v47, %s8508_s1  ;;  %2704 = vrot.lane.b32.xlu0 %v2325_v4, %s8508_s1  ;;  %v13561_v4 = vld [vmem:[#allocation36_spill] sm:$0xff]  ;;  %v13562_v47 = vld [vmem:[#allocation39_spill] sm:$0xff] }
 0x262   :  { %v9389_v45 = vpop.permute.xlu1 %1858  ;;  %v962_v13 = vsel %vm570_vm6, %v960_v20, %v13561_v4  ;;  %v1344_v15 = vsel %vm558_vm2, %v1342_v62, %v13562_v47  ;;  %v2521_v20 = vcombine.high %v9381_v54, %v13550_v19  ;;  %v1732_v4 = vsel %vm555_vm1, %v1730_v39, %v9154_v48 }
 0x263   :  { %v1346_v5 = vsel %vm561_vm3, %v1344_v15, %v13563_v35  ;;  %v1734_v22 = vsel %vm558_vm2, %v1732_v4, %v9158_v49  ;;  %v9435_v47 = vrot.slane %v9404_v40, %v8555_v24  ;;  %v2434_v48 = vrot.slane %v9389_v45, %v8552_v23 }
 0x264   :  { %v1348_v38 = vsel %vm564_vm4, %v1346_v5, %v13564_v59  ;;  %v2619_v49 = vcombine.high %v9416_v28, %v13550_v19  ;;  %v1903_v35 = vcombine.high %v9168_v53, %v13550_v19  ;;  %v2001_v53 = vcombine.high %v9180_v32, %v13550_v19 }
 0x265   :  { %1747 = vrot.lane.b32.xlu1 %v962_v13, %s8517_s28  ;;  %2708 = vrot.lane.b32.xlu0 %v2423_v57, %s8508_s1  ;;  %v1350_v62 = vsel %vm567_vm5, %v1348_v38, %v13566_v9  ;;  %v13567_v13 = vld [vmem:[#allocation43_spill] sm:$0xff]  ;;  %v1736_v57 = vsel %vm561_vm3, %v1734_v22, %v9162_v52  ;;  %v9452_v59 = vrot.slane %v2434_v48, %v8555_v24 }
 0x266   :  { %v1352_v16 = vsel %vm570_vm6, %v1350_v62, %v13567_v13  ;;  %v9428_v25 = vpop.permute.xlu1 %1872  ;;  %v1738_v15 = vsel %vm564_vm4, %v1736_v57, %v9174_v43  ;;  %v2374_v43 = vcombine.high %v9435_v47, %v13550_v19  ;;  %v2099_v9 = vcombine.high %v9195_v31, %v13550_v19 }
 0x267   :  { %v1740_v52 = vsel %vm567_vm5, %v1738_v15, %v9189_v46  ;;  %v2532_v38 = vrot.slane %v9428_v25, %v8552_v23  ;;  %v2472_v39 = vcombine.high %v9452_v59, %v13550_v19  ;;  %v2015_v32 = vrot.slane %v2001_v53, %v8555_v24 }
 0x268   :  { %v1742_v5 = vsel %vm570_vm6, %v1740_v52, %v9204_v0  ;;  %v1917_v0 = vrot.slane %v1903_v35, %v8555_v24  ;;  %v2197_v13 = vcombine.high %v9210_v14, %v13550_v19  ;;  %v1952_v22 = vcombine.high %v9230_v7, %v13550_v19 }
 0x269   :  { %1755 = vrot.lane.b32.xlu1 %v1352_v16, %s8518_s29  ;;  %2712 = vrot.lane.b32.xlu0 %v2521_v20, %s8508_s1  ;;  %v9466_v2 = vrot.slane %v2532_v38, %v8555_v24  ;;  %v2113_v16 = vrot.slane %v2099_v9, %v8555_v24  ;;  %v2295_v57 = vcombine.high %v9282_v56, %v13550_v19 }
 0x26a   :  { %v9459_v46 = vpop.permute.xlu1 %1886  ;;  %v2211_v15 = vrot.slane %v2197_v13, %v8555_v24  ;;  %v2050_v14 = vcombine.high %v9256_v21, %v13550_v19  ;;  %v2393_v52 = vcombine.high %v9323_v12, %v13550_v19  ;;  %v2148_v7 = vcombine.high %v9293_v50, %v13550_v19 }
 0x26b   :  { %v2630_v20 = vrot.slane %v9459_v46, %v8552_v23  ;;  %v2570_v4 = vcombine.high %v9466_v2, %v13550_v19  ;;  %v2309_v35 = vrot.slane %v2295_v57, %v8555_v24  ;;  %v2246_v12 = vcombine.high %v9329_v11, %v13550_v19 }
 0x26c   :  { %v2064_v56 = vrot.slane %v2050_v14, %v8555_v24  ;;  %v2407_v21 = vrot.slane %v2393_v52, %v8555_v24  ;;  %v2589_v53 = vcombine.high %v9387_v34, %v13550_v19  ;;  %v2442_v11 = vcombine.high %v2434_v48, %v13550_v19 }
 0x26d   :  { %1763 = vrot.lane.b32.xlu1 %v1742_v5, %s8519_s30  ;;  %2716 = vrot.lane.b32.xlu0 %v2619_v49, %s8508_s1  ;;  %v9478_v62 = vrot.slane %v2630_v20, %v8555_v24  ;;  %v1966_v49 = vrot.slane %v1952_v22, %v8555_v24  ;;  %v2491_v5 = vcombine.high %v9358_v44, %v13550_v19 }
 0x26e   :  { %v2344_v44 = vcombine.high %v9404_v40, %v13550_v19  ;;  %v2603_v9 = vrot.slane %v2589_v53, %v8555_v24  ;;  %v2540_v40 = vcombine.high %v2532_v38, %v13550_v19  ;;  %v2456_v13 = vrot.slane %v2442_v11, %v8555_v24 }
 0x26f   :  { %v2668_v31 = vcombine.high %v9478_v62, %v13550_v19  ;;  %v2505_v50 = vrot.slane %v2491_v5, %v8555_v24  ;;  %v2638_v48 = vcombine.high %v2630_v20, %v13550_v19  ;;  %v2228_v57 = vcombine.high %v2211_v15, %v13550_v19 }
 0x270   :  { %v2358_v34 = vrot.slane %v2344_v44, %v8555_v24  ;;  %v2554_v22 = vrot.slane %v2540_v40, %v8555_v24  ;;  %v2326_v20 = vcombine.high %v2309_v35, %v13550_v19  ;;  %v2424_v14 = vcombine.high %v2407_v21, %v13550_v19 }
 0x271   :  { %2706 = vrot.lane.b32.xlu1 %v2374_v43, %s8508_s1  ;;  %2752 = vrot.lane.b32.xlu0 %v1917_v0, %s8502_s13  ;;  %v2162_v43 = vrot.slane %v2148_v7, %v8555_v24  ;;  %v2652_v38 = vrot.slane %v2638_v48, %v8555_v24  ;;  %v1888_v52 = vcombine.high %v9164_v6, %v13550_v19 }
 0x272   :  { %v2620_v5 = vcombine.high %v2603_v9, %v13550_v19  ;;  %v2375_v6 = vcombine.high %v2358_v34, %v13550_v19  ;;  %v1937_v44 = vcombine.high %v9219_v8, %v13550_v19 }
 0x273   :  { %v9562_v7 = vrot.slane %v1888_v52, %v8552_v23  ;;  %v2669_v40 = vcombine.high %v2652_v38, %v13550_v19 }
 0x274   :  { %v9613_v8 = vrot.slane %v1937_v44, %v8552_v23 }
 0x275   :  { %2710 = vrot.lane.b32.xlu1 %v2472_v39, %s8508_s1  ;;  %2756 = vrot.lane.b32.xlu0 %v2015_v32, %s8502_s13  ;;  %v2260_v39 = vrot.slane %v2246_v12, %v8555_v24  ;;  %v2084_v12 = vcombine.high %v9191_v58, %v13550_v19 }
 0x277   :  { %v9584_v53 = vrot.slane %v2084_v12, %v8552_v23 }
 0x279   :  { %2714 = vrot.lane.b32.xlu1 %v2570_v4, %s8508_s1  ;;  %2760 = vrot.lane.b32.xlu0 %v2113_v16, %s8502_s13  ;;  %v1934_v4 = vcombine.high %v1917_v0, %v13550_v19  ;;  %v2130_v0 = vcombine.high %v2113_v16, %v13550_v19  ;;  %v2081_v16 = vcombine.high %v2064_v56, %v13550_v19 }
 0x27d   :  { %2718 = vrot.lane.b32.xlu1 %v2668_v31, %s8508_s1  ;;  %2764 = vrot.lane.b32.xlu0 %v2211_v15, %s8502_s13  ;;  %v2032_v31 = vcombine.high %v2015_v32, %v13550_v19  ;;  %v1983_v32 = vcombine.high %v1966_v49, %v13550_v19  ;;  %v2179_v15 = vcombine.high %v2162_v43, %v13550_v19 }
 0x281   :  { %2754 = vrot.lane.b32.xlu1 %v1966_v49, %s8502_s13  ;;  %2768 = vrot.lane.b32.xlu0 %v2309_v35, %s8502_s13  ;;  %v2522_v49 = vcombine.high %v2505_v50, %v13550_v19  ;;  %v2277_v35 = vcombine.high %v2260_v39, %v13550_v19 }
 0x285   :  { %2758 = vrot.lane.b32.xlu1 %v2064_v56, %s8502_s13  ;;  %2772 = vrot.lane.b32.xlu0 %v2407_v21, %s8502_s13  ;;  %v1986_v56 = vcombine.high %v9176_v29, %v13550_v19  ;;  %v2473_v29 = vcombine.high %v2456_v13, %v13550_v19 }
 0x287   :  { %v9571_v21 = vrot.slane %v1986_v56, %v8552_v23 }
 0x289   :  { %2762 = vrot.lane.b32.xlu1 %v2162_v43, %s8502_s13  ;;  %2776 = vrot.lane.b32.xlu0 %v2505_v50, %s8502_s13  ;;  %v9577_v43 = vrot.slane %v9562_v7, %v8555_v24  ;;  %v2182_v50 = vcombine.high %v9206_v42, %v13550_v19  ;;  %v9590_v58 = vrot.slane %v9571_v21, %v8555_v24 }
 0x28a   :  { %v2280_v42 = vcombine.high %v9221_v26, %v13550_v19 }
 0x28c   :  { %v9619_v26 = vrot.slane %v2280_v42, %v8552_v23 }
 0x28d   :  { %2766 = vrot.lane.b32.xlu1 %v2260_v39, %s8502_s13  ;;  %2780 = vrot.lane.b32.xlu0 %v2603_v9, %s8502_s13  ;;  %v2571_v39 = vcombine.high %v2554_v22, %v13550_v19  ;;  %v9599_v9 = vrot.slane %v2182_v50, %v8552_v23 }
 0x28f   :  { %v9627_v48 = vrot.slane %v9599_v9, %v8555_v24 }
 0x291   :  { %2770 = vrot.lane.b32.xlu1 %v2358_v34, %s8502_s13  ;;  %2816 = vrot.lane.b32.xlu0 %v1934_v4, %s8509_s21  ;;  %v9607_v34 = vrot.slane %v9584_v53, %v8555_v24  ;;  %v2035_v4 = vcombine.high %v9245_v27, %v13550_v19 }
 0x293   :  { %v9633_v27 = vrot.slane %v2035_v4, %v8552_v23 }
 0x295   :  { %2774 = vrot.lane.b32.xlu1 %v2456_v13, %s8502_s13  ;;  %2820 = vrot.lane.b32.xlu0 %v2032_v31, %s8509_s21  ;;  %v2378_v13 = vcombine.high %v9260_v17, %v13550_v19  ;;  %v9639_v17 = vrot.slane %v9613_v8, %v8555_v24 }
 0x299   :  { %2778 = vrot.lane.b32.xlu1 %v2554_v22, %s8502_s13  ;;  %2824 = vrot.lane.b32.xlu0 %v2130_v0, %s8509_s21  ;;  %v2133_v22 = vcombine.high %v9278_v51, %v13550_v19  ;;  %v9642_v0 = vrot.slane %v2378_v13, %v8552_v23 }
 0x29b   :  { %v9654_v51 = vrot.slane %v2133_v22, %v8552_v23  ;;  %v2415_v52 = vrot.slane %v9642_v0, %v8555_v24  ;;  %v1935_v22 = vcombine.high %v9577_v43, %v13550_v19 }
 0x29d   :  { %2782 = vrot.lane.b32.xlu1 %v2652_v38, %s8502_s13  ;;  %2828 = vrot.lane.b32.xlu0 %v2228_v57, %s8509_s21  ;;  %v2476_v38 = vcombine.high %v9310_v41, %v13550_v19 }
 0x29f   :  { %v9661_v41 = vrot.slane %v2476_v38, %v8552_v23 }
 0x2a1   :  { %2818 = vrot.lane.b32.xlu1 %v1983_v32, %s8509_s21  ;;  %2832 = vrot.lane.b32.xlu0 %v2326_v20, %s8509_s21  ;;  %v2317_v32 = vrot.slane %v9619_v26, %v8555_v24  ;;  %v2231_v20 = vcombine.high %v9315_v37, %v13550_v19 }
 0x2a3   :  { %v9672_v37 = vrot.slane %v2231_v20, %v8552_v23 }
 0x2a5   :  { %2822 = vrot.lane.b32.xlu1 %v2081_v16, %s8509_s21  ;;  %2836 = vrot.lane.b32.xlu0 %v2424_v14, %s8509_s21  ;;  %v2072_v16 = vrot.slane %v9633_v27, %v8555_v24  ;;  %v2574_v14 = vcombine.high %v9366_v1, %v13550_v19  ;;  %v2170_v1 = vrot.slane %v9654_v51, %v8555_v24 }
 0x2a6   :  { %v2268_v50 = vrot.slane %v9672_v37, %v8555_v24 }
 0x2a7   :  { %v9681_v56 = vrot.slane %v2574_v14, %v8552_v23 }
 0x2a9   :  { %2826 = vrot.lane.b32.xlu1 %v2179_v15, %s8509_s21  ;;  %2840 = vrot.lane.b32.xlu0 %v2522_v49, %s8509_s21  ;;  %v2329_v49 = vcombine.high %v9360_v18, %v13550_v19  ;;  %v2427_v18 = vcombine.high %v9389_v45, %v13550_v19  ;;  %v2525_v45 = vcombine.high %v9428_v25, %v13550_v19 }
 0x2aa   :  { %v2623_v25 = vcombine.high %v9459_v46, %v13550_v19 }
 0x2ab   :  { %v9690_v12 = vrot.slane %v2329_v49, %v8552_v23  ;;  %v9705_v42 = vrot.slane %v2427_v18, %v8552_v23  ;;  %v9720_v38 = vrot.slane %v2525_v45, %v8552_v23 }
 0x2ac   :  { %v9735_v18 = vrot.slane %v2623_v25, %v8552_v23 }
 0x2ad   :  { %2830 = vrot.lane.b32.xlu1 %v2277_v35, %s8509_s21  ;;  %2844 = vrot.lane.b32.xlu0 %v2620_v5, %s8509_s21  ;;  %v2464_v14 = vrot.slane %v9705_v42, %v8555_v24  ;;  %v2562_v46 = vrot.slane %v9720_v38, %v8555_v24 }
 0x2ae   :  { %v2660_v25 = vrot.slane %v9735_v18, %v8555_v24 }
 0x2b1   :  { %2834 = vrot.lane.b32.xlu1 %v2375_v6, %s8509_s21  ;;  %2880 = vrot.lane.b32.xlu0 %v9577_v43, %s8510_s22  ;;  %v2513_v6 = vrot.slane %v9661_v41, %v8555_v24  ;;  %v2033_v43 = vcombine.high %v9590_v58, %v13550_v19 }
 0x2b5   :  { %2838 = vrot.lane.b32.xlu1 %v2473_v29, %s8509_s21  ;;  %2884 = vrot.lane.b32.xlu0 %v9590_v58, %s8510_s22 }
 0x2b7   :  { %v9603_v11 = vpop.permute.xlu0 %2688 }
 0x2b9   :  { %2842 = vrot.lane.b32.xlu1 %v2571_v39, %s8509_s21  ;;  %2888 = vrot.lane.b32.xlu0 %v9607_v34, %s8510_s22  ;;  %v2611_v39 = vrot.slane %v9681_v56, %v8555_v24 }
 0x2bb   :  { %v9623_v31 = vpop.permute.xlu0 %2692 }
 0x2bd   :  { %2846 = vrot.lane.b32.xlu1 %v2669_v40, %s8509_s21  ;;  %2892 = vrot.lane.b32.xlu0 %v9627_v48, %s8510_s22  ;;  %v2366_v40 = vrot.slane %v9690_v12, %v8555_v24 }
 0x2bf   :  { %v9646_v57 = vpop.permute.xlu0 %2696 }
 0x2c1   :  { %2882 = vrot.lane.b32.xlu1 %v9639_v17, %s8510_s22  ;;  %2896 = vrot.lane.b32.xlu0 %v2317_v32, %s8510_s22 }
 0x2c3   :  { %v9665_v15 = vpop.permute.xlu0 %2700 }
 0x2c5   :  { %2886 = vrot.lane.b32.xlu1 %v2072_v16, %s8510_s22  ;;  %2900 = vrot.lane.b32.xlu0 %v2415_v52, %s8510_s22 }
 0x2c7   :  { %v9676_v35 = vpop.permute.xlu1 %2690  ;;  %v9683_v5 = vpop.permute.xlu0 %1745 }
 0x2c8   :  { %13568 = vst [vmem:[#allocation34_spill] sm:$0xff] %v9683_v5 }
 0x2c9   :  { %2890 = vrot.lane.b32.xlu1 %v2170_v1, %s8510_s22  ;;  %2904 = vrot.lane.b32.xlu0 %v2513_v6, %s8510_s22 }
 0x2cb   :  { %v9694_v29 = vpop.permute.xlu1 %2694  ;;  %v9698_v44 = vpop.permute.xlu0 %1753 }
 0x2cc   :  { %13569 = vst [vmem:[#allocation37_spill] sm:$0xff] %v9698_v44 }
 0x2cd   :  { %2894 = vrot.lane.b32.xlu1 %v2268_v50, %s8510_s22  ;;  %2908 = vrot.lane.b32.xlu0 %v2611_v39, %s8510_s22 }
 0x2cf   :  { %v9709_v4 = vpop.permute.xlu1 %2698  ;;  %v9713_v13 = vpop.permute.xlu0 %1761 }
 0x2d0   :  { %13570 = vst [vmem:[#allocation32_spill] sm:$0xff] %v9713_v13  ;;  %v2131_v13 = vcombine.high %v9607_v34, %v13550_v19  ;;  %v1984_v34 = vcombine.high %v9639_v17, %v13550_v19 }
 0x2d1   :  { %2898 = vrot.lane.b32.xlu1 %v2366_v40, %s8510_s22  ;;  %2944 = vrot.lane.b32.xlu0 %v1935_v22, %s8511_s23 }
 0x2d3   :  { %v9724_v20 = vpop.permute.xlu1 %2702  ;;  %v9728_v49 = vpop.permute.xlu0 %2704 }
 0x2d5   :  { %2902 = vrot.lane.b32.xlu1 %v2464_v14, %s8510_s22  ;;  %2948 = vrot.lane.b32.xlu0 %v2033_v43, %s8511_s23 }
 0x2d7   :  { %v9737_v45 = vpop.permute.xlu1 %1747  ;;  %v9741_v22 = vpop.permute.xlu0 %2708 }
 0x2d8   :  { %13571 = vst [vmem:[#allocation33_spill] sm:$0xff] %v9737_v45  ;;  %v2229_v45 = vcombine.high %v9627_v48, %v13550_v19  ;;  %v2082_v48 = vcombine.high %v2072_v16, %v13550_v19 }
 0x2d9   :  { %2906 = vrot.lane.b32.xlu1 %v2562_v46, %s8510_s22  ;;  %2952 = vrot.lane.b32.xlu0 %v2131_v13, %s8511_s23 }
 0x2db   :  { %v9747_v58 = vpop.permute.xlu1 %1755  ;;  %v9751_v43 = vpop.permute.xlu0 %2712 }
 0x2dc   :  { %13572 = vst [vmem:[#allocation35_spill] sm:$0xff] %v9747_v58  ;;  %v2327_v58 = vcombine.high %v2317_v32, %v13550_v19  ;;  %v2180_v32 = vcombine.high %v2170_v1, %v13550_v19 }
 0x2dd   :  { %2910 = vrot.lane.b32.xlu1 %v2660_v25, %s8510_s22  ;;  %2956 = vrot.lane.b32.xlu0 %v2229_v45, %s8511_s23  ;;  %v2425_v45 = vcombine.high %v2415_v52, %v13550_v19  ;;  %v2278_v52 = vcombine.high %v2268_v50, %v13550_v19 }
 0x2df   :  { %v9757_v44 = vpop.permute.xlu1 %1763  ;;  %v9761_v13 = vpop.permute.xlu0 %2716 }
 0x2e0   :  { %13573 = vst [vmem:[#allocation38_spill] sm:$0xff] %v9757_v44 }
 0x2e1   :  { %2946 = vrot.lane.b32.xlu1 %v1984_v34, %s8511_s23  ;;  %2960 = vrot.lane.b32.xlu0 %v2327_v58, %s8511_s23  ;;  %v2523_v58 = vcombine.high %v2513_v6, %v13550_v19  ;;  %v1918_v34 = vcombine.high %v9562_v7, %v13550_v19  ;;  %v2376_v6 = vcombine.high %v2366_v40, %v13550_v19 }
 0x2e3   :  { %v9766_v5 = vpop.permute.xlu1 %2706  ;;  %v9769_v23 = vpop.permute.xlu0 %2752  ;;  %v1932_v50 = vrot.slane %v1918_v34, %v8555_v24  ;;  %v2572_v34 = vcombine.high %v2562_v46, %v13550_v19  ;;  %v2310_v46 = vcombine.high %v9619_v26, %v13550_v19 }
 0x2e5   :  { %2950 = vrot.lane.b32.xlu1 %v2082_v48, %s8511_s23  ;;  %2964 = vrot.lane.b32.xlu0 %v2425_v45, %s8511_s23  ;;  %v2621_v45 = vcombine.high %v2611_v39, %v13550_v19  ;;  %v2474_v39 = vcombine.high %v2464_v14, %v13550_v19  ;;  %v2324_v26 = vrot.slane %v2310_v46, %v8555_v24 }
 0x2e6   :  { %v2261_v46 = vcombine.high %v9672_v37, %v13550_v19 }
 0x2e7   :  { %v9774_v17 = vpop.permute.xlu1 %2710  ;;  %v9777_v44 = vpop.permute.xlu0 %2756 }
 0x2e8   :  { %v2275_v37 = vrot.slane %v2261_v46, %v8555_v24  ;;  %v2555_v46 = vcombine.high %v9720_v38, %v13550_v19 }
 0x2e9   :  { %2954 = vrot.lane.b32.xlu1 %v2180_v32, %s8511_s23  ;;  %2968 = vrot.lane.b32.xlu0 %v2523_v58, %s8511_s23  ;;  %v2016_v32 = vcombine.high %v9571_v21, %v13550_v19 }
 0x2eb   :  { %v9782_v16 = vpop.permute.xlu1 %2714  ;;  %v9787_v48 = vpop.permute.xlu0 %2760  ;;  %v2030_v40 = vrot.slane %v2016_v32, %v8555_v24 }
 0x2ed   :  { %2958 = vrot.lane.b32.xlu1 %v2278_v52, %s8511_s23  ;;  %2972 = vrot.lane.b32.xlu0 %v2621_v45, %s8511_s23  ;;  %v2114_v52 = vcombine.high %v9584_v53, %v13550_v19  ;;  %v1967_v53 = vcombine.high %v9613_v8, %v13550_v19 }
 0x2ef   :  { %v9792_v1 = vpop.permute.xlu1 %2718  ;;  %v9797_v58 = vpop.permute.xlu0 %2764  ;;  %v2128_v14 = vrot.slane %v2114_v52, %v8555_v24  ;;  %v2065_v52 = vcombine.high %v9633_v27, %v13550_v19  ;;  %v1981_v8 = vrot.slane %v1967_v53, %v8555_v24  ;;  %v2506_v53 = vcombine.high %v9661_v41, %v13550_v19 }
 0x2f1   :  { %2962 = vrot.lane.b32.xlu1 %v2376_v6, %s8511_s23  ;;  %3008 = vrot.lane.b32.xlu0 %v1932_v50, %s8512_s24  ;;  %v2212_v6 = vcombine.high %v9599_v9, %v13550_v19  ;;  %v2079_v27 = vrot.slane %v2065_v52, %v8555_v24  ;;  %v2604_v52 = vcombine.high %v9681_v56, %v13550_v19 }
 0x2f2   :  { %v2520_v41 = vrot.slane %v2506_v53, %v8555_v24  ;;  %v2457_v56 = vcombine.high %v9705_v42, %v13550_v19 }
 0x2f3   :  { %v9802_v7 = vpop.permute.xlu1 %2754  ;;  %v9807_v45 = vpop.permute.xlu0 %2768  ;;  %v2226_v9 = vrot.slane %v2212_v6, %v8555_v24  ;;  %v2163_v6 = vcombine.high %v9654_v51, %v13550_v19 }
 0x2f4   :  { %13574 = vst [vmem:[#allocation36_spill] sm:$0xff] %v9802_v7 }
 0x2f5   :  { %2966 = vrot.lane.b32.xlu1 %v2474_v39, %s8511_s23  ;;  %3012 = vrot.lane.b32.xlu0 %v2030_v40, %s8512_s24  ;;  %v2670_v39 = vcombine.high %v2660_v25, %v13550_v19  ;;  %v2408_v25 = vcombine.high %v9642_v0, %v13550_v19  ;;  %v2177_v51 = vrot.slane %v2163_v6, %v8555_v24 }
 0x2f6   :  { %v2618_v6 = vrot.slane %v2604_v52, %v8555_v24 }
 0x2f7   :  { %v9812_v21 = vpop.permute.xlu1 %2758  ;;  %v9817_v7 = vpop.permute.xlu0 %2772  ;;  %v2422_v0 = vrot.slane %v2408_v25, %v8555_v24  ;;  %v2359_v25 = vcombine.high %v9690_v12, %v13550_v19 }
 0x2f8   :  { %13575 = vst [vmem:[#allocation39_spill] sm:$0xff] %v9812_v21 }
 0x2f9   :  { %2970 = vrot.lane.b32.xlu1 %v2572_v34, %s8511_s23  ;;  %3016 = vrot.lane.b32.xlu0 %v2128_v14, %s8512_s24 }
 0x2fb   :  { %v9824_v32 = vpop.permute.xlu1 %2762  ;;  %v9829_v21 = vpop.permute.xlu0 %2776 }
 0x2fc   :  { %13576 = vst [vmem:[#allocation40_spill] sm:$0xff] %v9824_v32 }
 0x2fd   :  { %2974 = vrot.lane.b32.xlu1 %v2670_v39, %s8511_s23  ;;  %3020 = vrot.lane.b32.xlu0 %v2226_v9, %s8512_s24 }
 0x2ff   :  { %v9836_v34 = vpop.permute.xlu1 %2766  ;;  %v9841_v32 = vpop.permute.xlu0 %2780 }
 0x300   :  { %13577 = vst [vmem:[#allocation41_spill] sm:$0xff] %v9836_v34  ;;  %13578 = vst [vmem:[#allocation42_spill] sm:$0xff] %v9841_v32 }
 0x301   :  { %3010 = vrot.lane.b32.xlu1 %v1981_v8, %s8512_s24  ;;  %3024 = vrot.lane.b32.xlu0 %v2324_v26, %s8512_s24 }
 0x303   :  { %v9848_v39 = vpop.permute.xlu1 %2770  ;;  %v9853_v34 = vpop.permute.xlu0 %2816 }
 0x304   :  { %13579 = vst [vmem:[#allocation43_spill] sm:$0xff] %v9848_v39  ;;  %13580 = vst [vmem:[#allocation61_spill] sm:$0xff] %v9853_v34 }
 0x305   :  { %3014 = vrot.lane.b32.xlu1 %v2079_v27, %s8512_s24  ;;  %3028 = vrot.lane.b32.xlu0 %v2422_v0, %s8512_s24 }
 0x307   :  { %v9860_v32 = vpop.permute.xlu1 %2774  ;;  %v9865_v39 = vpop.permute.xlu0 %2820 }
 0x308   :  { %13581 = vst [vmem:[#allocation62_spill] sm:$0xff] %v9860_v32  ;;  %13582 = vst [vmem:[#allocation63_spill] sm:$0xff] %v9865_v39  ;;  %v2373_v39 = vrot.slane %v2359_v25, %v8555_v24 }
 0x309   :  { %3018 = vrot.lane.b32.xlu1 %v2177_v51, %s8512_s24  ;;  %3032 = vrot.lane.b32.xlu0 %v2520_v41, %s8512_s24 }
 0x30b   :  { %v9872_v34 = vpop.permute.xlu1 %2778  ;;  %v9875_v32 = vpop.permute.xlu0 %2824 }
 0x30c   :  { %13583 = vst [vmem:[#allocation64_spill] sm:$0xff] %v9872_v34  ;;  %13584 = vst [vmem:[#allocation65_spill] sm:$0xff] %v9875_v32  ;;  %v1936_v34 = vcombine.high %v1932_v50, %v13550_v19  ;;  %v2471_v32 = vrot.slane %v2457_v56, %v8555_v24  ;;  %v2653_v50 = vcombine.high %v9735_v18, %v13550_v19 }
 0x30d   :  { %3022 = vrot.lane.b32.xlu1 %v2275_v37, %s8512_s24  ;;  %3036 = vrot.lane.b32.xlu0 %v2618_v6, %s8512_s24  ;;  %v2230_v18 = vcombine.high %v2226_v9, %v13550_v19  ;;  %v2083_v9 = vcombine.high %v2079_v27, %v13550_v19 }
 0x30e   :  { %v2667_v56 = vrot.slane %v2653_v50, %v8555_v24 }
 0x30f   :  { %v9882_v53 = vpop.permute.xlu1 %2782  ;;  %v9885_v12 = vpop.permute.xlu0 %2828 }
 0x310   :  { %13585 = vst [vmem:[#allocation66_spill] sm:$0xff] %v9882_v53  ;;  %v2034_v53 = vcombine.high %v2030_v40, %v13550_v19 }
 0x311   :  { %3026 = vrot.lane.b32.xlu1 %v2373_v39, %s8512_s24  ;;  %3072 = vrot.lane.b32.xlu0 %v1936_v34, %s8513_s25  ;;  %v2569_v34 = vrot.slane %v2555_v46, %v8555_v24 }
 0x313   :  { %v9892_v52 = vpop.permute.xlu1 %2818  ;;  %v9895_v42 = vpop.permute.xlu0 %2832 }
 0x314   :  { %13586 = vst [vmem:[#allocation67_spill] sm:$0xff] %v9892_v52  ;;  %v2132_v52 = vcombine.high %v2128_v14, %v13550_v19  ;;  %v1985_v14 = vcombine.high %v1981_v8, %v13550_v19 }
 0x315   :  { %3030 = vrot.lane.b32.xlu1 %v2471_v32, %s8512_s24  ;;  %3076 = vrot.lane.b32.xlu0 %v2034_v53, %s8513_s25 }
 0x317   :  { %v9902_v25 = vpop.permute.xlu1 %2822  ;;  %v9905_v38 = vpop.permute.xlu0 %2836 }
 0x318   :  { %13587 = vst [vmem:[#allocation68_spill] sm:$0xff] %v9905_v38 }
 0x319   :  { %3034 = vrot.lane.b32.xlu1 %v2569_v34, %s8512_s24  ;;  %3080 = vrot.lane.b32.xlu0 %v2132_v52, %s8513_s25  ;;  %v2328_v52 = vcombine.high %v2324_v26, %v13550_v19  ;;  %v2181_v26 = vcombine.high %v2177_v51, %v13550_v19 }
 0x31b   :  { %v9910_v40 = vpop.permute.xlu1 %2826  ;;  %v9913_v53 = vpop.permute.xlu0 %2840 }
 0x31c   :  { %13588 = vst [vmem:[#allocation69_spill] sm:$0xff] %v9913_v53 }
 0x31d   :  { %3038 = vrot.lane.b32.xlu1 %v2667_v56, %s8512_s24  ;;  %3084 = vrot.lane.b32.xlu0 %v2230_v18, %s8513_s25  ;;  %v2426_v18 = vcombine.high %v2422_v0, %v13550_v19  ;;  %v2279_v0 = vcombine.high %v2275_v37, %v13550_v19  ;;  %v2475_v37 = vcombine.high %v2471_v32, %v13550_v19 }
 0x31f   :  { %v9918_v46 = vpop.permute.xlu1 %2830  ;;  %v9921_v38 = vpop.permute.xlu0 %2844 }
 0x320   :  { %13589 = vst [vmem:[#allocation70_spill] sm:$0xff] %v9918_v46  ;;  %13590 = vst [vmem:[#allocation71_spill] sm:$0xff] %v9921_v38 }
 0x321   :  { %3074 = vrot.lane.b32.xlu1 %v1985_v14, %s8513_s25  ;;  %3088 = vrot.lane.b32.xlu0 %v2328_v52, %s8513_s25  ;;  %v2524_v14 = vcombine.high %v2520_v41, %v13550_v19  ;;  %v2377_v41 = vcombine.high %v2373_v39, %v13550_v19 }
 0x323   :  { %v9926_v50 = vpop.permute.xlu1 %2834  ;;  %v9929_v24 = vpop.permute.xlu0 %2880 }
 0x324   :  { %13591 = vst [vmem:[#allocation72_spill] sm:$0xff] %v9926_v50 }
 0x325   :  { %3078 = vrot.lane.b32.xlu1 %v2083_v9, %s8513_s25  ;;  %3092 = vrot.lane.b32.xlu0 %v2426_v18, %s8513_s25  ;;  %v2622_v9 = vcombine.high %v2618_v6, %v13550_v19 }
 0x327   :  { %v9934_v8 = vpop.permute.xlu1 %2838  ;;  %v9937_v38 = vpop.permute.xlu0 %2884 }
 0x328   :  { %13592 = vst [vmem:[#allocation73_spill] sm:$0xff] %v9934_v8 }
 0x329   :  { %3082 = vrot.lane.b32.xlu1 %v2181_v26, %s8513_s25  ;;  %3096 = vrot.lane.b32.xlu0 %v2524_v14, %s8513_s25 }
 0x32b   :  { %v9942_v27 = vpop.permute.xlu1 %2842  ;;  %v9945_v52 = vpop.permute.xlu0 %2888 }
 0x32c   :  { %13593 = vst [vmem:[#allocation74_spill] sm:$0xff] %v9942_v27  ;;  %13594 = vst [vmem:[#allocation75_spill] sm:$0xff] %v9945_v52 }
 0x32d   :  { %3086 = vrot.lane.b32.xlu1 %v2279_v0, %s8513_s25  ;;  %3100 = vrot.lane.b32.xlu0 %v2622_v9, %s8513_s25  ;;  %v2573_v0 = vcombine.high %v2569_v34, %v13550_v19 }
 0x32f   :  { %v9950_v51 = vpop.permute.xlu1 %2846  ;;  %v9953_v18 = vpop.permute.xlu0 %2892 }
 0x330   :  { %13595 = vst [vmem:[#allocation76_spill] sm:$0xff] %v9950_v51 }
 0x331   :  { %3090 = vrot.lane.b32.xlu1 %v2377_v41, %s8513_s25  ;;  %v2671_v41 = vcombine.high %v2667_v56, %v13550_v19 }
 0x333   :  { %v9956_v26 = vpop.permute.xlu1 %2882  ;;  %v9959_v14 = vpop.permute.xlu0 %2896 }
 0x334   :  { %13596 = vst [vmem:[#allocation77_spill] sm:$0xff] %v9959_v14 }
 0x335   :  { %3094 = vrot.lane.b32.xlu1 %v2475_v37, %s8513_s25 }
 0x337   :  { %v9962_v6 = vpop.permute.xlu1 %2886  ;;  %v9965_v9 = vpop.permute.xlu0 %2900 }
 0x338   :  { %13597 = vst [vmem:[#allocation78_spill] sm:$0xff] %v9965_v9 }
 0x339   :  { %3098 = vrot.lane.b32.xlu1 %v2573_v0, %s8513_s25 }
 0x33b   :  { %v9968_v39 = vpop.permute.xlu1 %2890  ;;  %v9971_v51 = vpop.permute.xlu0 %2904 }
 0x33c   :  { %13598 = vst [vmem:[#allocation79_spill] sm:$0xff] %v9968_v39  ;;  %13599 = vst [vmem:[#allocation80_spill] sm:$0xff] %v9971_v51 }
 0x33d   :  { %3102 = vrot.lane.b32.xlu1 %v2671_v41, %s8513_s25 }
 0x33f   :  { %v9974_v32 = vpop.permute.xlu1 %2894  ;;  %v9976_v14 = vpop.permute.xlu0 %2908 }
 0x340   :  { %13600 = vst [vmem:[#allocation81_spill] sm:$0xff] %v9974_v32  ;;  %13601 = vst [vmem:[#allocation82_spill] sm:$0xff] %v9976_v14 }
 0x343   :  { %v9978_v37 = vpop.permute.xlu1 %2898  ;;  %v9980_v27 = vpop.permute.xlu0 %2944 }
 0x344   :  { %13602 = vst [vmem:[#allocation83_spill] sm:$0xff] %v9978_v37 }
 0x347   :  { %v9982_v34 = vpop.permute.xlu1 %2902  ;;  %v9984_v9 = vpop.permute.xlu0 %2948 }
 0x348   :  { %13603 = vst [vmem:[#allocation84_spill] sm:$0xff] %v9982_v34 }
 0x34b   :  { %v9986_v0 = vpop.permute.xlu1 %2906  ;;  %v9988_v8 = vpop.permute.xlu0 %2952 }
 0x34c   :  { %13604 = vst [vmem:[#allocation85_spill] sm:$0xff] %v9986_v0  ;;  %13605 = vst [vmem:[#allocation86_spill] sm:$0xff] %v9988_v8 }
 0x34f   :  { %v9990_v56 = vpop.permute.xlu1 %2910  ;;  %v9992_v19 = vpop.permute.xlu0 %2956 }
 0x350   :  { %13606 = vst [vmem:[#allocation87_spill] sm:$0xff] %v9990_v56  ;;  %13607 = vst [vmem:[#allocation88_spill] sm:$0xff] %v9992_v19 }
 0x353   :  { %v9994_v41 = vpop.permute.xlu1 %2946  ;;  %v9996_v51 = vpop.permute.xlu0 %2960 }
 0x354   :  { %13608 = vst [vmem:[#allocation89_spill] sm:$0xff] %v9996_v51 }
 0x357   :  { %v9998_v14 = vpop.permute.xlu1 %2950  ;;  %v10000_v37 = vpop.permute.xlu0 %2964 }
 0x358   :  { %13609 = vst [vmem:[#allocation90_spill] sm:$0xff] %v10000_v37 }
 0x35b   :  { %v10002_v50 = vpop.permute.xlu1 %2954  ;;  %v10004_v34 = vpop.permute.xlu0 %2968 }
 0x35c   :  { %13610 = vst [vmem:[#allocation91_spill] sm:$0xff] %v10002_v50  ;;  %13611 = vst [vmem:[#allocation92_spill] sm:$0xff] %v10004_v34 }
 0x35f   :  { %v10006_v53 = vpop.permute.xlu1 %2958  ;;  %v10008_v0 = vpop.permute.xlu0 %2972 }
 0x360   :  { %13612 = vst [vmem:[#allocation93_spill] sm:$0xff] %v10006_v53  ;;  %13613 = vst [vmem:[#allocation94_spill] sm:$0xff] %v10008_v0 }
 0x363   :  { %v10010_v32 = vpop.permute.xlu1 %2962  ;;  %v10012_v56 = vpop.permute.xlu0 %3008 }
 0x364   :  { %13614 = vst [vmem:[#allocation95_spill] sm:$0xff] %v10010_v32  ;;  %13615 = vst [vmem:[#allocation96_spill] sm:$0xff] %v10012_v56 }
 0x367   :  { %v10014_v39 = vpop.permute.xlu1 %2966  ;;  %v10016_v8 = vpop.permute.xlu0 %3012 }
 0x368   :  { %13616 = vst [vmem:[#allocation97_spill] sm:$0xff] %v10014_v39 }
 0x36b   :  { %v10018_v51 = vpop.permute.xlu1 %2970  ;;  %v10020_v46 = vpop.permute.xlu0 %3016 }
 0x36c   :  { %13617 = vst [vmem:[#allocation98_spill] sm:$0xff] %v10018_v51  ;;  %13618 = vst [vmem:[#allocation99_spill] sm:$0xff] %v10020_v46 }
 0x36f   :  { %v10022_v37 = vpop.permute.xlu1 %2974  ;;  %v10024_v50 = vpop.permute.xlu0 %3020 }
 0x370   :  { %13619 = vst [vmem:[#allocation100_spill] sm:$0xff] %v10022_v37  ;;  %13620 = vst [vmem:[#allocation101_spill] sm:$0xff] %v10024_v50 }
 0x373   :  { %v10026_v34 = vpop.permute.xlu1 %3010  ;;  %v10028_v53 = vpop.permute.xlu0 %3024 }
 0x374   :  { %13621 = vst [vmem:[#allocation102_spill] sm:$0xff] %v10028_v53  ;;  %v3120_v53 = vsel %vm552_vm0, %v9172_v33, %v9603_v11  ;;  %v3123_v33 = vsel %vm552_vm0, %v9272_v61, %v9694_v29  ;;  %v3127_v11 = vsel %vm552_vm0, %v9344_v60, %v9724_v20  ;;  %v3132_v61 = vsel %vm552_vm0, %v9381_v54, %v9751_v43  ;;  %v13630_v29 = vld [vmem:[#allocation39_spill] sm:$0xff]  ;;  %v13631_v20 = vld [vmem:[#allocation40_spill] sm:$0xff] }
 0x375   :  { %v3129_v60 = vsel %vm552_vm0, %v9435_v47, %v9766_v5  ;;  %v3133_v54 = vsel %vm552_vm0, %v9466_v2, %v9782_v16  ;;  %v3135_v47 = vsel %vm552_vm0, %v9478_v62, %v9792_v1  ;;  %v3139_v2 = vsel %vm555_vm1, %v3123_v33, %v13630_v29  ;;  %v13634_v16 = vld [vmem:[#allocation43_spill] sm:$0xff]  ;;  %v13635_v1 = vld [vmem:[#allocation61_spill] sm:$0xff] }
 0x377   :  { %v10030_v0 = vpop.permute.xlu1 %3014  ;;  %v10032_v32 = vpop.permute.xlu0 %3028 }
 0x378   :  { %13622 = vst [vmem:[#allocation103_spill] sm:$0xff] %v10032_v32  ;;  %v3122_v32 = vsel %vm552_vm0, %v9186_v3, %v9623_v31  ;;  %v3125_v3 = vsel %vm552_vm0, %v9307_v55, %v9709_v4  ;;  %v3134_v55 = vsel %vm552_vm0, %v9416_v28, %v9761_v13  ;;  %v13633_v13 = vld [vmem:[#allocation42_spill] sm:$0xff] }
 0x379   :  { %v3141_v62 = vsel %vm555_vm1, %v3125_v3, %v13631_v20 }
 0x37b   :  { %v10034_v56 = vpop.permute.xlu1 %3018  ;;  %v10036_v39 = vpop.permute.xlu0 %3032 }
 0x37c   :  { %13623 = vst [vmem:[#allocation104_spill] sm:$0xff] %v10036_v39  ;;  %v13628_v39 = vld [vmem:[#allocation60_spill] sm:$0xff] }
 0x37f   :  { %v10038_v52 = vpop.permute.xlu1 %3022  ;;  %v10040_v51 = vpop.permute.xlu0 %3036 }
 0x380   :  { %13624 = vst [vmem:[#allocation105_spill] sm:$0xff] %v10038_v52  ;;  %13625 = vst [vmem:[#allocation106_spill] sm:$0xff] %v10040_v51  ;;  %v3124_v52 = vsel %vm552_vm0, %v13628_v39, %v9646_v57  ;;  %v3126_v51 = vsel %vm552_vm0, %v9216_v36, %v9665_v15  ;;  %v3128_v36 = vsel %vm552_vm0, %v9319_v30, %v9728_v49 }
 0x381   :  { %v3136_v57 = vsel %vm555_vm1, %v3120_v53, %v9769_v23  ;;  %v3131_v30 = vsel %vm552_vm0, %v9452_v59, %v9774_v17  ;;  %v3140_v28 = vsel %vm555_vm1, %v3124_v52, %v9787_v48  ;;  %v3142_v23 = vsel %vm555_vm1, %v3126_v51, %v9797_v58  ;;  %v13629_v59 = vld [vmem:[#allocation36_spill] sm:$0xff]  ;;  %v13637_v53 = vld [vmem:[#allocation63_spill] sm:$0xff]  ;;  %v13639_v51 = vld [vmem:[#allocation65_spill] sm:$0xff] }
 0x382   :  { %v3144_v5 = vsel %vm555_vm1, %v3128_v36, %v9807_v45  ;;  %v3148_v49 = vsel %vm555_vm1, %v3132_v61, %v9829_v21  ;;  %v3150_v17 = vsel %vm555_vm1, %v3134_v55, %v13633_v13  ;;  %v3145_v48 = vsel %vm555_vm1, %v3129_v60, %v13634_v16  ;;  %v13638_v52 = vld [vmem:[#allocation64_spill] sm:$0xff]  ;;  %v13641_v36 = vld [vmem:[#allocation67_spill] sm:$0xff] }
 0x383   :  { %v10042_v46 = vpop.permute.xlu1 %3026  ;;  %v10044_v37 = vpop.permute.xlu0 %3072  ;;  %v3152_v58 = vsel %vm558_vm2, %v3136_v57, %v13635_v1  ;;  %v3149_v21 = vsel %vm555_vm1, %v3133_v54, %v13638_v52  ;;  %v3156_v39 = vsel %vm558_vm2, %v3140_v28, %v13639_v51  ;;  %v3158_v3 = vsel %vm558_vm2, %v3142_v23, %v9885_v12  ;;  %v13649_v16 = vld [vmem:[#allocation79_spill] sm:$0xff]  ;;  %v13651_v51 = vld [vmem:[#allocation68_spill] sm:$0xff] }
 0x384   :  { %13626 = vst [vmem:[#allocation107_spill] sm:$0xff] %v10042_v46  ;;  %v3160_v61 = vsel %vm558_vm2, %v3144_v5, %v9895_v42  ;;  %v3155_v55 = vsel %vm558_vm2, %v3139_v2, %v9902_v25  ;;  %v3157_v60 = vsel %vm558_vm2, %v3141_v62, %v9910_v40  ;;  %v3168_v57 = vsel %vm561_vm3, %v3152_v58, %v9929_v24  ;;  %v13647_v2 = vld [vmem:[#allocation70_spill] sm:$0xff]  ;;  %v13650_v58 = vld [vmem:[#allocation99_spill] sm:$0xff] }
 0x385   :  { %v3174_v42 = vsel %vm561_vm3, %v3158_v3, %v9953_v18  ;;  %v3184_v40 = vsel %vm564_vm4, %v3168_v57, %v9980_v27  ;;  %v13643_v27 = vld [vmem:[#allocation75_spill] sm:$0xff]  ;;  %v13648_v62 = vld [vmem:[#allocation86_spill] sm:$0xff]  ;;  %v3173_v1 = vsel %vm561_vm3, %v3157_v60, %v13649_v16  ;;  %v13654_v57 = vld [vmem:[#allocation69_spill] sm:$0xff] }
 0x386   :  { %v13653_v3 = vld [vmem:[#allocation91_spill] sm:$0xff] }
 0x387   :  { %v10046_v50 = vpop.permute.xlu1 %3030  ;;  %v3077_v19 = vpop.permute.xlu0 %3076 }
 0x388   :  { %13627 = vst [vmem:[#allocation108_spill] sm:$0xff] %v10046_v50  ;;  %v3121_v50 = vsel %vm552_vm0, %v9240_v10, %v9676_v35  ;;  %v3130_v10 = vsel %vm552_vm0, %v9352_v63, %v9741_v22  ;;  %v3138_v63 = vsel %vm555_vm1, %v3122_v32, %v9777_v44  ;;  %v13632_v22 = vld [vmem:[#allocation41_spill] sm:$0xff]  ;;  %v13640_v32 = vld [vmem:[#allocation66_spill] sm:$0xff] }
 0x389   :  { %v3137_v35 = vsel %vm555_vm1, %v3121_v50, %v13629_v59  ;;  %v3146_v44 = vsel %vm555_vm1, %v3130_v10, %v9817_v7  ;;  %v3143_v43 = vsel %vm555_vm1, %v3127_v11, %v13632_v22  ;;  %v13636_v7 = vld [vmem:[#allocation62_spill] sm:$0xff]  ;;  %v3154_v50 = vsel %vm558_vm2, %v3138_v63, %v13637_v53 }
 0x38a   :  { %v3147_v45 = vsel %vm555_vm1, %v3131_v30, %v13636_v7  ;;  %v3151_v33 = vsel %vm555_vm1, %v3135_v47, %v13640_v32  ;;  %v3153_v10 = vsel %vm558_vm2, %v3137_v35, %v13641_v36  ;;  %v3170_v30 = vsel %vm561_vm3, %v3154_v50, %v9937_v38  ;;  %v13652_v32 = vld [vmem:[#allocation81_spill] sm:$0xff] }
 0x38b   :  { %v10060_v46 = vpop.permute.xlu1 %3034  ;;  %v10074_v31 = vpop.permute.xlu0 %3080  ;;  %v3169_v12 = vsel %vm561_vm3, %v3153_v10, %v9956_v26  ;;  %v3171_v63 = vsel %vm561_vm3, %v3155_v55, %v9962_v6  ;;  %v3186_v25 = vsel %vm564_vm4, %v3170_v30, %v9984_v9  ;;  %v13642_v9 = vld [vmem:[#allocation88_spill] sm:$0xff]  ;;  %v3172_v59 = vsel %vm561_vm3, %v3156_v39, %v13643_v27  ;;  %v13655_v30 = vld [vmem:[#allocation71_spill] sm:$0xff] }
 0x38c   :  { %v3185_v24 = vsel %vm564_vm4, %v3169_v12, %v9994_v41  ;;  %v3187_v38 = vsel %vm564_vm4, %v3171_v63, %v9998_v14  ;;  %v3202_v26 = vsel %vm567_vm5, %v3186_v25, %v10016_v8  ;;  %v3190_v47 = vsel %vm564_vm4, %v3174_v42, %v13642_v9  ;;  %v13644_v8 = vld [vmem:[#allocation96_spill] sm:$0xff]  ;;  %v13656_v63 = vld [vmem:[#allocation93_spill] sm:$0xff] }
 0x38d   :  { %v3201_v6 = vsel %vm567_vm5, %v3185_v24, %v10026_v34  ;;  %v3203_v18 = vsel %vm567_vm5, %v3187_v38, %v10030_v0  ;;  %v3218_v41 = vsel %vm570_vm6, %v3202_v26, %v3077_v19  ;;  %v3200_v35 = vsel %vm567_vm5, %v3184_v40, %v13644_v8  ;;  %v13645_v34 = vld [vmem:[#allocation101_spill] sm:$0xff]  ;;  %v13646_v0 = vld [vmem:[#allocation11_spill] sm:$0xff]  ;;  %v13661_v9 = vld [vmem:[#allocation76_spill] sm:$0xff] }
 0x38e   :  { %v3206_v5 = vsel %vm567_vm5, %v3190_v47, %v13645_v34  ;;  %v3159_v20 = vsel %vm558_vm2, %v3143_v43, %v13647_v2  ;;  %v3188_v19 = vsel %vm564_vm4, %v3172_v59, %v13648_v62  ;;  %v3216_v22 = vsel %vm570_vm6, %v3200_v35, %v10044_v37  ;;  %v13663_v35 = vld [vmem:[#allocation77_spill] sm:$0xff] }
 0x38f   :  { %v10108_v15 = vpop.permute.xlu1 %3038  ;;  %v3085_v4 = vpop.permute.xlu0 %3084  ;;  %v3204_v7 = vsel %vm567_vm5, %v3188_v19, %v13650_v58  ;;  %v3243_v53 = vrot.slane %v3218_v41, %v13646_v0  ;;  %v3162_v39 = vsel %vm558_vm2, %v3146_v44, %v13651_v51  ;;  %v3175_v37 = vsel %vm561_vm3, %v3159_v20, %v13652_v32  ;;  %v13667_v20 = vld [vmem:[#allocation83_spill] sm:$0xff]  ;;  %v13668_v19 = vld [vmem:[#allocation84_spill] sm:$0xff]  ;;  %v13673_v32 = vld [vmem:[#allocation94_spill] sm:$0xff] }
 0x390   :  { %v3222_v13 = vsel %vm570_vm6, %v3206_v5, %v3085_v4  ;;  %v3189_v4 = vsel %vm564_vm4, %v3173_v1, %v13653_v3  ;;  %v3235_v10 = vrot.slane %v3216_v22, %v13646_v0  ;;  %v3164_v44 = vsel %vm558_vm2, %v3148_v49, %v13654_v57  ;;  %v13672_v51 = vld [vmem:[#allocation92_spill] sm:$0xff]  ;;  %v13676_v57 = vld [vmem:[#allocation102_spill] sm:$0xff] }
 0x391   :  { %v3205_v36 = vsel %vm567_vm5, %v3189_v4, %v10034_v56  ;;  %v3259_v55 = vrot.slane %v3222_v13, %v13646_v0  ;;  %v3166_v12 = vsel %vm558_vm2, %v3150_v17, %v13655_v30  ;;  %v3191_v42 = vsel %vm564_vm4, %v3175_v37, %v13656_v63  ;;  %v13658_v56 = vld [vmem:[#allocation105_spill] sm:$0xff]  ;;  %v13677_v30 = vld [vmem:[#allocation103_spill] sm:$0xff] }
 0x392   :  { %v3207_v38 = vsel %vm567_vm5, %v3191_v42, %v13658_v56  ;;  %v3296_v40 = vcombine.low %v3235_v10, %v3243_v53  ;;  %v3167_v47 = vsel %vm558_vm2, %v3151_v33, %v13661_v9  ;;  %v3176_v34 = vsel %vm561_vm3, %v3160_v61, %v13663_v35  ;;  %v13666_v33 = vld [vmem:[#allocation82_spill] sm:$0xff]  ;;  %v13669_v61 = vld [vmem:[#allocation85_spill] sm:$0xff]  ;;  %v13678_v63 = vld [vmem:[#allocation107_spill] sm:$0xff] }
 0x393   :  { %v3075_v11 = vpop.permute.xlu1 %3074  ;;  %v10158_v54 = vpop.permute.xlu0 %3088  ;;  %v3182_v2 = vsel %vm561_vm3, %v3166_v12, %v13666_v33 }
 0x394   :  { %v3217_v14 = vsel %vm570_vm6, %v3201_v6, %v3075_v11  ;;  %v3220_v11 = vsel %vm570_vm6, %v3204_v7, %v10074_v31  ;;  %v13657_v31 = vld [vmem:[#allocation72_spill] sm:$0xff]  ;;  %v13670_v7 = vld [vmem:[#allocation89_spill] sm:$0xff]  ;;  %v3198_v37 = vsel %vm564_vm4, %v3182_v2, %v13673_v32 }
 0x395   :  { %v3239_v50 = vrot.slane %v3217_v14, %v13646_v0  ;;  %v3161_v24 = vsel %vm558_vm2, %v3145_v48, %v13657_v31  ;;  %v3251_v26 = vrot.slane %v3220_v11, %v13646_v0  ;;  %v13662_v48 = vld [vmem:[#allocation12_spill] sm:$0xff]  ;;  %v3192_v53 = vsel %vm564_vm4, %v3176_v34, %v13670_v7 }
 0x396   :  { %v3177_v62 = vsel %vm561_vm3, %v3161_v24, %v13667_v20  ;;  %v3303_v13 = vrot.slane %v3296_v40, %v13662_v48  ;;  %v13683_v34 = vld [vmem:[#allocation104_spill] sm:$0xff]  ;;  %v13684_v20 = vld [vmem:[#allocation87_spill] sm:$0xff] }
 0x397   :  { %v3079_v28 = vpop.permute.xlu1 %3078  ;;  %v3093_v52 = vpop.permute.xlu0 %3092  ;;  %v3312_v14 = vcombine.low %v3251_v26, %v3259_v55  ;;  %v13675_v55 = vld [vmem:[#allocation97_spill] sm:$0xff]  ;;  %v13680_v26 = vld [vmem:[#allocation106_spill] sm:$0xff] }
 0x398   :  { %v3219_v23 = vsel %vm570_vm6, %v3203_v18, %v3079_v28  ;;  %v13659_v18 = vld [vmem:[#allocation73_spill] sm:$0xff]  ;;  %v13660_v28 = vld [vmem:[#allocation74_spill] sm:$0xff] }
 0x399   :  { %v3247_v29 = vrot.slane %v3219_v23, %v13646_v0  ;;  %v3163_v49 = vsel %vm558_vm2, %v3147_v45, %v13659_v18  ;;  %v3165_v17 = vsel %vm558_vm2, %v3149_v21, %v13660_v28  ;;  %v13664_v45 = vld [vmem:[#allocation78_spill] sm:$0xff]  ;;  %v13665_v21 = vld [vmem:[#allocation80_spill] sm:$0xff]  ;;  %v3319_v3 = vrot.slane %v3312_v14, %v13662_v48 }
 0x39a   :  { %v3178_v5 = vsel %vm561_vm3, %v3162_v39, %v13664_v45  ;;  %v3179_v22 = vsel %vm561_vm3, %v3163_v49, %v13668_v19  ;;  %v3181_v58 = vsel %vm561_vm3, %v3165_v17, %v13669_v61 }
 0x39b   :  { %v3083_v43 = vpop.permute.xlu1 %3082  ;;  %v3304_v60 = vcombine.low %v3239_v50, %v3247_v29  ;;  %v3097_v59 = vpop.permute.xlu0 %3096  ;;  %v3180_v29 = vsel %vm561_vm3, %v3164_v44, %v13665_v21  ;;  %v13671_v50 = vld [vmem:[#allocation90_spill] sm:$0xff]  ;;  %v3208_v44 = vsel %vm567_vm5, %v3192_v53, %v13676_v57 }
 0x39c   :  { %v3221_v25 = vsel %vm570_vm6, %v3205_v36, %v3083_v43  ;;  %v3194_v43 = vsel %vm564_vm4, %v3178_v5, %v13671_v50  ;;  %v3196_v39 = vsel %vm564_vm4, %v3180_v29, %v13672_v51  ;;  %v13674_v36 = vld [vmem:[#allocation95_spill] sm:$0xff] }
 0x39d   :  { %v3311_v23 = vrot.slane %v3304_v60, %v13662_v48  ;;  %v3255_v27 = vrot.slane %v3221_v25, %v13646_v0  ;;  %v3193_v10 = vsel %vm564_vm4, %v3177_v62, %v13674_v36  ;;  %v3195_v60 = vsel %vm564_vm4, %v3179_v22, %v13675_v55  ;;  %v13679_v25 = vld [vmem:[#allocation108_spill] sm:$0xff] }
 0x39e   :  { %v3210_v12 = vsel %vm567_vm5, %v3194_v43, %v13677_v30  ;;  %v3209_v42 = vsel %vm567_vm5, %v3193_v10, %v13678_v63  ;;  %v3211_v31 = vsel %vm567_vm5, %v3195_v60, %v13679_v25  ;;  %v3212_v45 = vsel %vm567_vm5, %v3196_v39, %v13683_v34  ;;  %v13686_v30 = vld [vmem:[#allocation44_spill] sm:$0xff]  ;;  %v13697_v34 = vld [vmem:[#allocation54_spill] sm:$0xff] }
 0x39f   :  { %v3087_v6 = vpop.permute.xlu1 %3086  ;;  %v3328_v4 = vcombine.low %v3303_v13, %v3311_v23  ;;  %v3226_v18 = vsel %vm570_vm6, %v3210_v12, %v3093_v52  ;;  %v3329_v17 = vcombine.high %v3303_v13, %v3311_v23  ;;  %v3224_v52 = vsel %vm570_vm6, %v3208_v44, %v10158_v54 }
 0x3a0   :  { %v3223_v41 = vsel %vm570_vm6, %v3207_v38, %v3087_v6  ;;  %v3101_v38 = vpop.permute.xlu0 %3100  ;;  %v3214_v6 = vsel %vm567_vm5, %v3198_v37, %v13680_v26  ;;  %v3275_v23 = vrot.slane %v3226_v18, %v13646_v0  ;;  %v3183_v62 = vsel %vm561_vm3, %v3167_v47, %v13684_v20  ;;  %v13690_v18 = vld [vmem:[#allocation49_spill] sm:$0xff] }
 0x3a1   :  { %v3263_v8 = vrot.slane %v3223_v41, %v13646_v0  ;;  %v13681_v41 = vld [vmem:[#allocation13_spill] sm:$0xff]  ;;  %v3230_v5 = vsel %vm570_vm6, %v3214_v6, %v3101_v38  ;;  %v3228_v54 = vsel %vm570_vm6, %v3212_v45, %v3097_v59  ;;  %v3267_v13 = vrot.slane %v3224_v52, %v13646_v0  ;;  %v13689_v6 = vld [vmem:[#allocation47_spill] sm:$0xff]  ;;  %v13698_v45 = vld [vmem:[#allocation56_spill] sm:$0xff] }
 0x3a2   :  { %v10279_v14 = vrot.slane %v3328_v4, %v13681_v41  ;;  %v3343_v61 = vrot.slane %v3329_v17, %v13681_v41  ;;  %v3283_v53 = vrot.slane %v3228_v54, %v13646_v0  ;;  %v13693_v17 = vld [vmem:[#allocation50_spill] sm:$0xff]  ;;  %v13699_v52 = vld [vmem:[#allocation57_spill] sm:$0xff] }
 0x3a3   :  { %v3320_v16 = vcombine.low %v3255_v27, %v3263_v8  ;;  %v3091_v1 = vpop.permute.xlu1 %3090  ;;  %v13682_v8 = vld [vmem:[#allocation98_spill] sm:$0xff]  ;;  %v3364_v59 = vcombine.low %v3267_v13, %v3275_v23  ;;  %v13701_v23 = vld [vmem:[#allocation59_spill] sm:$0xff] }
 0x3a4   :  { %v3225_v49 = vsel %vm570_vm6, %v3209_v42, %v3091_v1  ;;  %v3197_v35 = vsel %vm564_vm4, %v3181_v58, %v13682_v8  ;;  %v13685_v58 = vld [vmem:[#allocation100_spill] sm:$0xff]  ;;  %v13707_v13 = vld [vmem:[#allocation23_spill] sm:$0xff] }
 0x3a5   :  { %v3327_v11 = vrot.slane %v3320_v16, %v13662_v48  ;;  %v3271_v21 = vrot.slane %v3225_v49, %v13646_v0  ;;  %v3213_v19 = vsel %vm567_vm5, %v3197_v35, %v10060_v46  ;;  %v3291_v16 = vrot.slane %v3230_v5, %v13646_v0  ;;  %v13691_v49 = vld [vmem:[#allocation48_spill] sm:$0xff]  ;;  %v13696_v35 = vld [vmem:[#allocation55_spill] sm:$0xff]  ;;  %v13700_v5 = vld [vmem:[#allocation58_spill] sm:$0xff] }
 0x3a6   :  { %v3199_v47 = vsel %vm564_vm4, %v3183_v62, %v13685_v58  ;;  %v3371_v4 = vrot.slane %v3364_v59, %v13662_v48  ;;  %v13695_v8 = vld [vmem:[#allocation52_spill] sm:$0xff]  ;;  %v13709_v58 = vld [vmem:[#allocation27_spill] sm:$0xff] }
 0x3a7   :  { %v3344_v24 = vcombine.low %v3319_v3, %v3327_v11  ;;  %v3345_v56 = vcombine.high %v3319_v3, %v3327_v11  ;;  %v3095_v40 = vpop.permute.xlu1 %3094  ;;  %v3215_v46 = vsel %vm567_vm5, %v3199_v47, %v10108_v15  ;;  %v3380_v39 = vcombine.low %v3283_v53, %v3291_v16  ;;  %v13711_v53 = vld [vmem:[#allocation31_spill] sm:$0xff] }
 0x3a8   :  { %v3227_v28 = vsel %vm570_vm6, %v3211_v31, %v3095_v40  ;;  %v13688_v40 = vld [vmem:[#allocation46_spill] sm:$0xff] }
 0x3a9   :  { %v3279_v9 = vrot.slane %v3227_v28, %v13646_v0  ;;  %v10282_v27 = vrot.slane %v3344_v24, %v13681_v41  ;;  %v3359_v2 = vrot.slane %v3345_v56, %v13681_v41  ;;  %v3387_v36 = vrot.slane %v3380_v39, %v13662_v48  ;;  %v13687_v24 = vld [vmem:[#allocation45_spill] sm:$0xff]  ;;  %v13692_v28 = vld [vmem:[#allocation51_spill] sm:$0xff] }
 0x3ab   :  { %v3099_v29 = vpop.permute.xlu1 %3098  ;;  %v3361_v33 = vcombine.high %v10279_v14, %v10282_v27  ;;  %v3360_v22 = vcombine.low %v10279_v14, %v10282_v27  ;;  %v3372_v1 = vcombine.low %v3271_v21, %v3279_v9  ;;  %v3362_v43 = vcombine.low %v3343_v61, %v3359_v2  ;;  %v13694_v9 = vld [vmem:[#allocation53_spill] sm:$0xff]  ;;  %v13702_v21 = vld [vmem:[#allocation19_spill] sm:$0xff] }
 0x3ac   :  { %v3229_v7 = vsel %vm570_vm6, %v3213_v19, %v3099_v29  ;;  %v3363_v15 = vcombine.high %v3343_v61, %v3359_v2  ;;  %v13703_v29 = vld [vmem:[#allocation14_spill] sm:$0xff]  ;;  %v13716_v27 = vld [vmem:[#allocation21_spill] sm:$0xff] }
 0x3ad   :  { %3434 = vrot.lane.b32.xlu0 %v3361_v33, %s8517_s28  ;;  %v3379_v32 = vrot.slane %v3372_v1, %v13662_v48  ;;  %v3287_v37 = vrot.slane %v3229_v7, %v13646_v0  ;;  %v13704_v33 = vld [vmem:[#allocation15_spill] sm:$0xff]  ;;  %v13706_v19 = vld [vmem:[#allocation18_spill] sm:$0xff]  ;;  %v13708_v1 = vld [vmem:[#allocation25_spill] sm:$0xff] }
 0x3ae   :  { %v13705_v2 = vcombine.low %v13703_v29, %v13704_v33  ;;  %v13721_v29 = vld [vmem:[#allocation22_spill] sm:$0xff] }
 0x3af   :  { %v3103_v50 = vpop.permute.xlu1 %3102  ;;  %v3396_v10 = vcombine.low %v3371_v4, %v3379_v32  ;;  %v3397_v44 = vcombine.high %v3371_v4, %v3379_v32  ;;  %v13713_v32 = vld [vmem:[#allocation37_spill] sm:$0xff] }
 0x3b0   :  { %v3231_v51 = vsel %vm570_vm6, %v3215_v46, %v3103_v50  ;;  %v553_v20 = vsel %vm552_vm0, %v13705_v2, %v13702_v21  ;;  %v13710_v46 = vld [vmem:[#allocation29_spill] sm:$0xff]  ;;  %v13722_v2 = vmov 0.0  }
 0x3b1   :  { %v3295_v3 = vrot.slane %v3231_v51, %v13646_v0  ;;  %3442 = vrot.lane.b32.xlu0 %v3362_v43, %s8518_s29  ;;  %v10324_v12 = vrot.slane %v3396_v10, %v13681_v41  ;;  %v3411_v56 = vrot.slane %v3397_v44, %v13681_v41  ;;  %v556_v54 = vsel %vm555_vm1, %v553_v20, %v13706_v19  ;;  %v13712_v43 = vld [vmem:[#allocation34_spill] sm:$0xff] }
 0x3b2   :  { %v559_v16 = vsel %vm558_vm2, %v556_v54, %v13707_v13  ;;  %v13724_v13 = vld [vmem:[#allocation26_spill] sm:$0xff] }
 0x3b3   :  { %v3388_v11 = vcombine.low %v3287_v37, %v3295_v3  ;;  %v562_v61 = vsel %vm561_vm3, %v559_v16, %v13708_v1 }
 0x3b4   :  { %v565_v47 = vsel %vm564_vm4, %v562_v61, %v13709_v58  ;;  %v13725_v58 = vld [vmem:[#allocation28_spill] sm:$0xff] }
 0x3b5   :  { %v3395_v55 = vrot.slane %v3388_v11, %v13662_v48  ;;  %3450 = vrot.lane.b32.xlu0 %v3363_v15, %s8519_s30  ;;  %v568_v59 = vsel %vm567_vm5, %v565_v47, %v13710_v46  ;;  %v13714_v11 = vld [vmem:[#allocation32_spill] sm:$0xff]  ;;  %v13726_v46 = vld [vmem:[#allocation30_spill] sm:$0xff] }
 0x3b6   :  { %v571_v50 = vsel %vm570_vm6, %v568_v59, %v13711_v53 }
 0x3b7   :  { %v3412_v60 = vcombine.low %v3387_v36, %v3395_v55  ;;  %v3413_v57 = vcombine.high %v3387_v36, %v3395_v55  ;;  %v1768_v51 = vsel %vm1767_vm7, %v571_v50, %v13712_v43  ;;  %v13727_v50 = vld [vmem:[#allocation33_spill] sm:$0xff] }
 0x3b8   :  { %v1771_v37 = vsel %vm1770_vm8, %v1768_v51, %v13713_v32  ;;  %v13728_v32 = vld [vmem:[#allocation35_spill] sm:$0xff] }
 0x3b9   :  { %3468 = vbcast.lane.b32.xlu0 %v13686_v30, 264  ;;  %v10327_v63 = vrot.slane %v3412_v60, %v13681_v41  ;;  %v3427_v25 = vrot.slane %v3413_v57, %v13681_v41  ;;  %v10381_v15 = vsel %vm1773_vm9, %v1771_v37, %v13714_v11  ;;  %v13718_v60 = vld [vmem:[#allocation17_spill] sm:$0xff] }
 0x3ba   :  { %13715 = vst [vmem:[#allocation60_spill] sm:$0xff] %v10381_v15 }
 0x3bb   :  { %v3429_v42 = vcombine.high %v10324_v12, %v10327_v63  ;;  %v3428_v31 = vcombine.low %v10324_v12, %v10327_v63  ;;  %v3430_v38 = vcombine.low %v3411_v56, %v3427_v25  ;;  %v3431_v26 = vcombine.high %v3411_v56, %v3427_v25 }
 0x3bd   :  { %3476 = vbcast.lane.b32.xlu0 %v13687_v24, 264  ;;  %3436 = vrot.lane.b32.xlu1 %v3429_v42, %s8517_s28 }
 0x3c1   :  { %3484 = vbcast.lane.b32.xlu0 %v13688_v40, 264  ;;  %3444 = vrot.lane.b32.xlu1 %v3430_v38, %s8518_s29  ;;  %v13720_v38 = vld [vmem:[#allocation20_spill] sm:$0xff] }
 0x3c5   :  { %3492 = vbcast.lane.b32.xlu0 %v13689_v6, 264  ;;  %3452 = vrot.lane.b32.xlu1 %v3431_v26, %s8519_s30 }
 0x3c9   :  { %3500 = vbcast.lane.b32.xlu0 %v13690_v18, 264  ;;  %3472 = vbcast.lane.b32.xlu1 %v13691_v49, 264 }
 0x3cd   :  { %3508 = vbcast.lane.b32.xlu0 %v13692_v28, 264  ;;  %3480 = vbcast.lane.b32.xlu1 %v13693_v17, 264 }
 0x3d1   :  { %3516 = vbcast.lane.b32.xlu0 %v13694_v9, 264  ;;  %3488 = vbcast.lane.b32.xlu1 %v13695_v8, 264 }
 0x3d5   :  { %3524 = vbcast.lane.b32.xlu0 %v13696_v35, 264  ;;  %3496 = vbcast.lane.b32.xlu1 %v13697_v34, 264 }
 0x3d9   :  { %3504 = vbcast.lane.b32.xlu1 %v13698_v45, 264 }
 0x3dd   :  { %3512 = vbcast.lane.b32.xlu1 %v13699_v52, 264 }
 0x3e1   :  { %3520 = vbcast.lane.b32.xlu1 %v13700_v5, 264 }
 0x3e5   :  { %3528 = vbcast.lane.b32.xlu1 %v13701_v23, 264 }
 0x41f   :  { %v3435_v62 = vpop.permute.xlu0 %3434 }
 0x420   :  { %v3456_v39 = vsel %vm1767_vm7, %v3360_v22, %v3435_v62  ;;  %v13717_v22 = vld [vmem:[#allocation16_spill] sm:$0xff] }
 0x421   :  { %v13719_v57 = vcombine.low %v13717_v22, %v13718_v60  ;;  %v13723_v62 = vld [vmem:[#allocation24_spill] sm:$0xff] }
 0x423   :  { %v3443_v7 = vpop.permute.xlu0 %3442  ;;  %v554_v44 = vsel %vm552_vm0, %v13719_v57, %v13716_v27 }
 0x424   :  { %v3458_v3 = vsel %vm1770_vm8, %v3456_v39, %v3443_v7  ;;  %v557_v26 = vsel %vm555_vm1, %v554_v44, %v13720_v38 }
 0x425   :  { %v560_v33 = vsel %vm558_vm2, %v557_v26, %v13721_v29 }
 0x426   :  { %v563_v19 = vsel %vm561_vm3, %v560_v33, %v13723_v62 }
 0x427   :  { %v3451_v4 = vpop.permute.xlu0 %3450  ;;  %v566_v16 = vsel %vm564_vm4, %v563_v19, %v13724_v13 }
 0x428   :  { %v3460_v36 = vsel %vm1773_vm9, %v3458_v3, %v3451_v4  ;;  %v569_v47 = vsel %vm567_vm5, %v566_v16, %v13725_v58 }
 0x429   :  { %v3462_v10 = vmul.f32 %v3460_v36, %v10381_v15  ;;  %v572_v59 = vsel %vm570_vm6, %v569_v47, %v13726_v46  ;;  %v13729_v36 = vld [vmem:[#allocation38_spill] sm:$0xff] }
 0x42a   :  { %v1769_v43 = vsel %vm1767_vm7, %v572_v59, %v13727_v50 }
 0x42b   :  { %3464 = vst [vmem:[#allocation7] sm:$0xff] %v3462_v10  ;;  %v10385_v55 = vpop.permute.xlu0 %3468  ;;  %v1772_v37 = vsel %vm1770_vm8, %v1769_v43, %v13728_v32 }
 0x42c   :  { %v10389_v14 = vrot.slane %v10385_v55, %v13662_v48  ;;  %v10451_v10 = vsel %vm1773_vm9, %v1772_v37, %v13729_v36 }
 0x42d   :  { %13730 = vst [vmem:[#allocation36_spill] sm:$0xff] %v10451_v10 }
 0x42e   :  { %v10398_v42 = vrot.slane %v10389_v14, %v13681_v41 }
 0x42f   :  { %v3437_v25 = vpop.permute.xlu1 %3436  ;;  %v10400_v56 = vpop.permute.xlu0 %3476 }
 0x430   :  { %v10406_v21 = vrot.slane %v10400_v56, %v13662_v48  ;;  %v3575_v20 = vcombine.high %v10398_v42, %v13722_v2  ;;  %v3457_v51 = vsel %vm1767_vm7, %v3428_v31, %v3437_v25 }
 0x432   :  { %v10416_v54 = vrot.slane %v10406_v21, %v13681_v41  ;;  %4330 = vrot.lane.b32.xlu0 %v3575_v20, %s8508_s1 }
 0x433   :  { %v3445_v1 = vpop.permute.xlu1 %3444  ;;  %v10421_v61 = vpop.permute.xlu0 %3484 }
 0x434   :  { %v10427_v7 = vrot.slane %v10421_v61, %v13662_v48  ;;  %v3673_v53 = vcombine.high %v10416_v54, %v13722_v2  ;;  %v3459_v3 = vsel %vm1770_vm8, %v3457_v51, %v3445_v1 }
 0x436   :  { %v10441_v39 = vrot.slane %v10427_v7, %v13681_v41  ;;  %4334 = vrot.lane.b32.xlu0 %v3673_v53, %s8508_s1 }
 0x437   :  { %v3453_v4 = vpop.permute.xlu1 %3452  ;;  %v10447_v11 = vpop.permute.xlu0 %3492 }
 0x438   :  { %v3461_v12 = vsel %vm1773_vm9, %v3459_v3, %v3453_v4  ;;  %v10456_v63 = vrot.slane %v10447_v11, %v13662_v48  ;;  %v3771_v27 = vcombine.high %v10441_v39, %v13722_v2 }
 0x439   :  { %v3463_v31 = vmul.f32 %v3461_v12, %v10451_v10 }
 0x43a   :  { %v10463_v22 = vrot.slane %v10456_v63, %v13681_v41  ;;  %4338 = vrot.lane.b32.xlu0 %v3771_v27, %s8508_s1 }
 0x43b   :  { %3465 = vst [vmem:[#allocation7 + $0x20] sm:$0xff] %v3463_v31  ;;  %v10466_v60 = vpop.permute.xlu1 %3472  ;;  %v10468_v57 = vpop.permute.xlu0 %3500 }
 0x43c   :  { %v10472_v44 = vrot.slane %v10466_v60, %v13662_v48  ;;  %v10476_v25 = vrot.slane %v10468_v57, %v13662_v48  ;;  %v3869_v38 = vcombine.high %v10463_v22, %v13722_v2 }
 0x43e   :  { %v10482_v26 = vrot.slane %v10472_v44, %v13681_v41  ;;  %v10486_v29 = vrot.slane %v10476_v25, %v13681_v41  ;;  %4342 = vrot.lane.b32.xlu0 %v3869_v38, %s8508_s1  ;;  %v3594_v17 = vcombine.high %v10472_v44, %v13722_v2  ;;  %v3937_v28 = vcombine.high %v10476_v25, %v13722_v2 }
 0x43f   :  { %v10489_v33 = vpop.permute.xlu1 %3480  ;;  %v10491_v20 = vpop.permute.xlu0 %3508 }
 0x440   :  { %v10495_v62 = vrot.slane %v10489_v33, %v13662_v48  ;;  %v10499_v19 = vrot.slane %v10491_v20, %v13662_v48  ;;  %v3624_v13 = vcombine.high %v10482_v26, %v13722_v2  ;;  %v3967_v16 = vcombine.high %v10486_v29, %v13722_v2 }
 0x441   :  { %v3608_v49 = vrot.slane %v3594_v17, %v13681_v41  ;;  %v3951_v18 = vrot.slane %v3937_v28, %v13681_v41 }
 0x442   :  { %v10507_v1 = vrot.slane %v10495_v62, %v13681_v41  ;;  %v10511_v58 = vrot.slane %v10499_v19, %v13681_v41  ;;  %4332 = vrot.lane.b32.xlu1 %v3624_v13, %s8508_s1  ;;  %4346 = vrot.lane.b32.xlu0 %v3967_v16, %s8508_s1 }
 0x443   :  { %v10515_v47 = vpop.permute.xlu1 %3488  ;;  %v10517_v46 = vpop.permute.xlu0 %3516 }
 0x444   :  { %v3782_v59 = vrot.slane %v10515_v47, %v13662_v48  ;;  %v4125_v53 = vrot.slane %v10517_v46, %v13662_v48  ;;  %v3722_v50 = vcombine.high %v10507_v1, %v13722_v2  ;;  %v4065_v43 = vcombine.high %v10511_v58, %v13722_v2 }
 0x446   :  { %v10528_v51 = vrot.slane %v3782_v59, %v13681_v41  ;;  %v10531_v32 = vrot.slane %v4125_v53, %v13681_v41  ;;  %4336 = vrot.lane.b32.xlu1 %v3722_v50, %s8508_s1  ;;  %4350 = vrot.lane.b32.xlu0 %v4065_v43, %s8508_s1  ;;  %v3545_v43 = vcombine.high %v10389_v14, %v13722_v2 }
 0x447   :  { %v10535_v37 = vpop.permute.xlu1 %3496  ;;  %v10537_v3 = vpop.permute.xlu0 %3524  ;;  %v3643_v14 = vcombine.high %v10406_v21, %v13722_v2  ;;  %v3741_v21 = vcombine.high %v10427_v7, %v13722_v2  ;;  %v3839_v7 = vcombine.high %v10456_v63, %v13722_v2  ;;  %v3790_v44 = vcombine.high %v3782_v59, %v13722_v2 }
 0x448   :  { %v3880_v4 = vrot.slane %v10535_v37, %v13662_v48  ;;  %v4223_v36 = vrot.slane %v10537_v3, %v13662_v48  ;;  %v3820_v12 = vcombine.high %v10528_v51, %v13722_v2  ;;  %v4163_v31 = vcombine.high %v10531_v32, %v13722_v2 }
 0x449   :  { %v3559_v5 = vrot.slane %v3545_v43, %v13681_v41  ;;  %v3657_v43 = vrot.slane %v3643_v14, %v13681_v41  ;;  %v3755_v14 = vrot.slane %v3741_v21, %v13681_v41  ;;  %v3853_v63 = vrot.slane %v3839_v7, %v13681_v41 }
 0x44a   :  { %v10548_v27 = vrot.slane %v3880_v4, %v13681_v41  ;;  %v10551_v38 = vrot.slane %v4223_v36, %v13681_v41  ;;  %4340 = vrot.lane.b32.xlu1 %v3820_v12, %s8508_s1  ;;  %4354 = vrot.lane.b32.xlu0 %v4163_v31, %s8508_s1  ;;  %v4035_v21 = vcombine.high %v10499_v19, %v13722_v2 }
 0x44b   :  { %v10555_v13 = vpop.permute.xlu1 %3504  ;;  %v4133_v25 = vcombine.high %v4125_v53, %v13722_v2  ;;  %v3888_v17 = vcombine.high %v3880_v4, %v13722_v2  ;;  %v4231_v28 = vcombine.high %v4223_v36, %v13722_v2  ;;  %v3576_v36 = vcombine.high %v3559_v5, %v13722_v2 }
 0x44c   :  { %v3978_v16 = vrot.slane %v10555_v13, %v13662_v48  ;;  %v3918_v50 = vcombine.high %v10548_v27, %v13722_v2  ;;  %v4261_v10 = vcombine.high %v10551_v38, %v13722_v2 }
 0x44d   :  { %v4147_v19 = vrot.slane %v4133_v25, %v13681_v41  ;;  %v3902_v53 = vrot.slane %v3888_v17, %v13681_v41 }
 0x44e   :  { %v10566_v15 = vrot.slane %v3978_v16, %v13681_v41  ;;  %4344 = vrot.lane.b32.xlu1 %v3918_v50, %s8508_s1  ;;  %4358 = vrot.lane.b32.xlu0 %v4261_v10, %s8508_s1  ;;  %v3986_v59 = vcombine.high %v3978_v16, %v13722_v2 }
 0x44f   :  { %v10570_v12 = vpop.permute.xlu1 %3512 }
 0x450   :  { %v4076_v31 = vrot.slane %v10570_v12, %v13662_v48  ;;  %v4016_v23 = vcombine.high %v10566_v15, %v13722_v2 }
 0x452   :  { %v10580_v52 = vrot.slane %v4076_v31, %v13681_v41  ;;  %4348 = vrot.lane.b32.xlu1 %v4016_v23, %s8508_s1  ;;  %4394 = vrot.lane.b32.xlu0 %v3559_v5, %s8502_s13  ;;  %v4084_v4 = vcombine.high %v4076_v31, %v13722_v2  ;;  %v3772_v5 = vcombine.high %v3755_v14, %v13722_v2 }
 0x453   :  { %v10584_v10 = vpop.permute.xlu1 %3520 }
 0x454   :  { %v4174_v50 = vrot.slane %v10584_v10, %v13662_v48  ;;  %v4114_v45 = vcombine.high %v10580_v52, %v13722_v2  ;;  %v4098_v25 = vrot.slane %v4084_v4, %v13681_v41 }
 0x456   :  { %v10594_v34 = vrot.slane %v4174_v50, %v13681_v41  ;;  %4352 = vrot.lane.b32.xlu1 %v4114_v45, %s8508_s1  ;;  %4398 = vrot.lane.b32.xlu0 %v3657_v43, %s8502_s13  ;;  %v4182_v16 = vcombine.high %v4174_v50, %v13722_v2  ;;  %v3870_v50 = vcombine.high %v3853_v63, %v13722_v2 }
 0x457   :  { %v10598_v23 = vpop.permute.xlu1 %3528 }
 0x458   :  { %v4272_v35 = vrot.slane %v10598_v23, %v13662_v48  ;;  %v4212_v8 = vcombine.high %v10594_v34, %v13722_v2  ;;  %v4196_v17 = vrot.slane %v4182_v16, %v13681_v41 }
 0x45a   :  { %v10608_v9 = vrot.slane %v4272_v35, %v13681_v41  ;;  %4356 = vrot.lane.b32.xlu1 %v4212_v8, %s8508_s1  ;;  %4402 = vrot.lane.b32.xlu0 %v3755_v14, %s8502_s13  ;;  %v3692_v8 = vcombine.high %v10495_v62, %v13722_v2  ;;  %v3804_v62 = vrot.slane %v3790_v44, %v13681_v41 }
 0x45b   :  { %v3674_v44 = vcombine.high %v3657_v43, %v13722_v2  ;;  %v4280_v31 = vcombine.high %v4272_v35, %v13722_v2  ;;  %v3968_v35 = vcombine.high %v3951_v18, %v13722_v2 }
 0x45c   :  { %13731 = vst [vmem:[#allocation39_spill] sm:$0xff] %v10608_v9  ;;  %v4310_v45 = vcombine.high %v10608_v9, %v13722_v2  ;;  %v3706_v7 = vrot.slane %v3692_v8, %v13681_v41  ;;  %v4245_v8 = vrot.slane %v4231_v28, %v13681_v41  ;;  %v3625_v28 = vcombine.high %v3608_v49, %v13722_v2 }
 0x45d   :  { %v4294_v43 = vrot.slane %v4280_v31, %v13681_v41  ;;  %v3821_v4 = vcombine.high %v3804_v62, %v13722_v2  ;;  %v4213_v31 = vcombine.high %v4196_v17, %v13722_v2 }
 0x45e   :  { %4360 = vrot.lane.b32.xlu1 %v4310_v45, %s8508_s1  ;;  %4406 = vrot.lane.b32.xlu0 %v3853_v63, %s8502_s13  ;;  %v4049_v45 = vrot.slane %v4035_v21, %v13681_v41  ;;  %v4000_v21 = vrot.slane %v3986_v59, %v13681_v41  ;;  %v3723_v14 = vcombine.high %v3706_v7, %v13722_v2 }
 0x45f   :  { %v3530_v63 = vcombine.high %v10385_v55, %v13722_v2 }
 0x460   :  { %v4066_v59 = vcombine.high %v4049_v45, %v13722_v2 }
 0x462   :  { %4396 = vrot.lane.b32.xlu1 %v3608_v49, %s8502_s13  ;;  %4410 = vrot.lane.b32.xlu0 %v3951_v18, %s8502_s13  ;;  %v4164_v49 = vcombine.high %v4147_v19, %v13722_v2  ;;  %v10680_v18 = vrot.slane %v3530_v63, %v13662_v48 }
 0x464   :  { %v3567_v16 = vrot.slane %v10680_v18, %v13681_v41 }
 0x466   :  { %4400 = vrot.lane.b32.xlu1 %v3706_v7, %s8502_s13  ;;  %4414 = vrot.lane.b32.xlu0 %v4049_v45, %s8502_s13  ;;  %v3628_v7 = vcombine.high %v10400_v56, %v13722_v2  ;;  %v3919_v45 = vcombine.high %v3902_v53, %v13722_v2  ;;  %v3824_v56 = vcombine.high %v10447_v11, %v13722_v2 }
 0x467   :  { %v3922_v11 = vcombine.high %v10468_v57, %v13722_v2 }
 0x468   :  { %v10689_v55 = vrot.slane %v3628_v7, %v13662_v48 }
 0x469   :  { %v10730_v57 = vrot.slane %v3922_v11, %v13662_v48 }
 0x46a   :  { %4404 = vrot.lane.b32.xlu1 %v3804_v62, %s8502_s13  ;;  %4418 = vrot.lane.b32.xlu0 %v4147_v19, %s8502_s13  ;;  %v3726_v62 = vcombine.high %v10421_v61, %v13722_v2  ;;  %v4017_v19 = vcombine.high %v4000_v21, %v13722_v2  ;;  %v3665_v61 = vrot.slane %v10689_v55, %v13681_v41 }
 0x46e   :  { %4408 = vrot.lane.b32.xlu1 %v3902_v53, %s8502_s13  ;;  %4422 = vrot.lane.b32.xlu0 %v4245_v8, %s8502_s13  ;;  %v10701_v53 = vrot.slane %v3726_v62, %v13662_v48 }
 0x472   :  { %4412 = vrot.lane.b32.xlu1 %v4000_v21, %s8502_s13  ;;  %4458 = vrot.lane.b32.xlu0 %v3576_v36, %s8509_s21  ;;  %v4262_v36 = vcombine.high %v4245_v8, %v13722_v2  ;;  %v4115_v8 = vcombine.high %v4098_v25, %v13722_v2  ;;  %v10709_v21 = vrot.slane %v3824_v56, %v13662_v48 }
 0x476   :  { %4416 = vrot.lane.b32.xlu1 %v4098_v25, %s8502_s13  ;;  %4462 = vrot.lane.b32.xlu0 %v3674_v44, %s8509_s21  ;;  %v3579_v44 = vcombine.high %v10466_v60, %v13722_v2  ;;  %v3763_v25 = vrot.slane %v10701_v53, %v13681_v41 }
 0x478   :  { %v10727_v60 = vrot.slane %v3579_v44, %v13662_v48  ;;  %v4069_v44 = vcombine.high %v10570_v12, %v13722_v2  ;;  %v3773_v6 = vcombine.high %v3763_v25, %v13722_v2 }
 0x47a   :  { %4420 = vrot.lane.b32.xlu1 %v4196_v17, %s8502_s13  ;;  %4466 = vrot.lane.b32.xlu0 %v3772_v5, %s8509_s21  ;;  %v3677_v5 = vcombine.high %v10489_v33, %v13722_v2  ;;  %v4020_v17 = vcombine.high %v10491_v20, %v13722_v2  ;;  %v3616_v20 = vrot.slane %v10727_v60, %v13681_v41 }
 0x47c   :  { %v10739_v33 = vrot.slane %v3677_v5, %v13662_v48  ;;  %v10802_v5 = vrot.slane %v4069_v44, %v13662_v48  ;;  %v3675_v44 = vcombine.high %v3665_v61, %v13722_v2 }
 0x47e   :  { %4424 = vrot.lane.b32.xlu1 %v4294_v43, %s8502_s13  ;;  %4470 = vrot.lane.b32.xlu0 %v3870_v50, %s8509_s21  ;;  %v10724_v50 = vrot.slane %v10709_v21, %v13681_v41  ;;  %v3714_v7 = vrot.slane %v10739_v33, %v13681_v41 }
 0x482   :  { %4460 = vrot.lane.b32.xlu1 %v3625_v28, %s8509_s21  ;;  %4474 = vrot.lane.b32.xlu0 %v3968_v35, %s8509_s21  ;;  %v4311_v28 = vcombine.high %v4294_v43, %v13722_v2  ;;  %v3775_v35 = vcombine.high %v10515_v47, %v13722_v2  ;;  %v3959_v43 = vrot.slane %v10730_v57, %v13681_v41 }
 0x483   :  { %v3873_v47 = vcombine.high %v10535_v37, %v13722_v2 }
 0x484   :  { %v10755_v63 = vrot.slane %v3775_v35, %v13662_v48  ;;  %v3577_v35 = vcombine.high %v3567_v16, %v13722_v2  ;;  %v3969_v30 = vcombine.high %v3959_v43, %v13722_v2 }
 0x485   :  { %v10773_v37 = vrot.slane %v3873_v47, %v13662_v48  ;;  %v4265_v47 = vcombine.high %v10598_v23, %v13722_v2 }
 0x486   :  { %4464 = vrot.lane.b32.xlu1 %v3723_v14, %s8509_s21  ;;  %4478 = vrot.lane.b32.xlu0 %v4066_v59, %s8509_s21  ;;  %v10744_v14 = vrot.slane %v4020_v17, %v13662_v48  ;;  %v4118_v59 = vcombine.high %v10517_v46, %v13722_v2  ;;  %v4216_v46 = vcombine.high %v10537_v3, %v13722_v2 }
 0x487   :  { %v3971_v3 = vcombine.high %v10555_v13, %v13722_v2  ;;  %v3910_v13 = vrot.slane %v10773_v37, %v13681_v41  ;;  %v4167_v17 = vcombine.high %v10584_v10, %v13722_v2 }
 0x48a   :  { %4468 = vrot.lane.b32.xlu1 %v3821_v4, %s8509_s21  ;;  %4482 = vrot.lane.b32.xlu0 %v4164_v49, %s8509_s21  ;;  %v10760_v4 = vrot.slane %v4118_v59, %v13662_v48  ;;  %v10814_v59 = vrot.slane %v4167_v17, %v13662_v48 }
 0x48c   :  { %v4155_v56 = vrot.slane %v10760_v4, %v13681_v41  ;;  %v4204_v23 = vrot.slane %v10814_v59, %v13681_v41 }
 0x48e   :  { %4472 = vrot.lane.b32.xlu1 %v3919_v45, %s8509_s21  ;;  %4486 = vrot.lane.b32.xlu0 %v4262_v36, %s8509_s21  ;;  %v4057_v45 = vrot.slane %v10744_v14, %v13681_v41  ;;  %v10776_v36 = vrot.slane %v4216_v46, %v13662_v48 }
 0x492   :  { %4476 = vrot.lane.b32.xlu1 %v4017_v19, %s8509_s21  ;;  %4522 = vrot.lane.b32.xlu0 %v3567_v16, %s8510_s22  ;;  %v3812_v19 = vrot.slane %v10755_v63, %v13681_v41  ;;  %v10828_v16 = vrot.slane %v4265_v47, %v13662_v48 }
 0x494   :  { %v4302_v47 = vrot.slane %v10828_v16, %v13681_v41 }
 0x496   :  { %4480 = vrot.lane.b32.xlu1 %v4115_v8, %s8509_s21  ;;  %4526 = vrot.lane.b32.xlu0 %v3665_v61, %s8510_s22  ;;  %v10789_v8 = vrot.slane %v3971_v3, %v13662_v48  ;;  %v4106_v3 = vrot.slane %v10802_v5, %v13681_v41 }
 0x498   :  { %v4008_v12 = vrot.slane %v10789_v8, %v13681_v41 }
 0x49a   :  { %4484 = vrot.lane.b32.xlu1 %v4213_v31, %s8509_s21  ;;  %4530 = vrot.lane.b32.xlu0 %v3763_v25, %s8510_s22  ;;  %v4253_v31 = vrot.slane %v10776_v36, %v13681_v41 }
 0x49e   :  { %4488 = vrot.lane.b32.xlu1 %v4311_v28, %s8509_s21  ;;  %4534 = vrot.lane.b32.xlu0 %v10724_v50, %s8510_s22 }
 0x4a2   :  { %4524 = vrot.lane.b32.xlu1 %v3616_v20, %s8510_s22  ;;  %4538 = vrot.lane.b32.xlu0 %v3959_v43, %s8510_s22  ;;  %v3822_v43 = vcombine.high %v3812_v19, %v13722_v2 }
 0x4a4   :  { %v10764_v49 = vpop.permute.xlu0 %4330 }
 0x4a6   :  { %4528 = vrot.lane.b32.xlu1 %v3714_v7, %s8510_s22  ;;  %4542 = vrot.lane.b32.xlu0 %v4057_v45, %s8510_s22 }
 0x4a8   :  { %v10780_v62 = vpop.permute.xlu0 %4334 }
 0x4aa   :  { %4532 = vrot.lane.b32.xlu1 %v3812_v19, %s8510_s22  ;;  %4546 = vrot.lane.b32.xlu0 %v4155_v56, %s8510_s22  ;;  %v3658_v19 = vcombine.high %v10689_v55, %v13722_v2  ;;  %v4116_v55 = vcombine.high %v4106_v3, %v13722_v2 }
 0x4ac   :  { %v10793_v11 = vpop.permute.xlu0 %4338 }
 0x4ae   :  { %4536 = vrot.lane.b32.xlu1 %v3910_v13, %s8510_s22  ;;  %4550 = vrot.lane.b32.xlu0 %v4253_v31, %s8510_s22 }
 0x4b0   :  { %v10806_v28 = vpop.permute.xlu0 %4342 }
 0x4b2   :  { %4540 = vrot.lane.b32.xlu1 %v4008_v12, %s8510_s22  ;;  %4586 = vrot.lane.b32.xlu0 %v3577_v35, %s8511_s23 }
 0x4b4   :  { %v10818_v46 = vpop.permute.xlu1 %4332  ;;  %v10820_v10 = vpop.permute.xlu0 %4346 }
 0x4b6   :  { %4544 = vrot.lane.b32.xlu1 %v4106_v3, %s8510_s22  ;;  %4590 = vrot.lane.b32.xlu0 %v3675_v44, %s8511_s23  ;;  %v3871_v44 = vcombine.high %v10724_v50, %v13722_v2  ;;  %v3724_v50 = vcombine.high %v3714_v7, %v13722_v2  ;;  %v3560_v7 = vcombine.high %v10680_v18, %v13722_v2 }
 0x4b7   :  { %v4018_v18 = vcombine.high %v4008_v12, %v13722_v2  ;;  %v3854_v12 = vcombine.high %v10709_v21, %v13722_v2  ;;  %v3609_v3 = vcombine.high %v10727_v60, %v13722_v2  ;;  %v4050_v60 = vcombine.high %v10744_v14, %v13722_v2 }
 0x4b8   :  { %v10830_v17 = vpop.permute.xlu1 %4336  ;;  %v10832_v35 = vpop.permute.xlu0 %4350 }
 0x4ba   :  { %4548 = vrot.lane.b32.xlu1 %v4204_v23, %s8510_s22  ;;  %4594 = vrot.lane.b32.xlu0 %v3773_v6, %s8511_s23  ;;  %v3626_v6 = vcombine.high %v3616_v20, %v13722_v2 }
 0x4bc   :  { %v10839_v61 = vpop.permute.xlu1 %4340  ;;  %v10841_v40 = vpop.permute.xlu0 %4354 }
 0x4be   :  { %4552 = vrot.lane.b32.xlu1 %v4302_v47, %s8510_s22  ;;  %4598 = vrot.lane.b32.xlu0 %v3871_v44, %s8511_s23  ;;  %v4067_v44 = vcombine.high %v4057_v45, %v13722_v2 }
 0x4c0   :  { %v10849_v24 = vpop.permute.xlu1 %4344  ;;  %v10851_v25 = vpop.permute.xlu0 %4358 }
 0x4c2   :  { %4588 = vrot.lane.b32.xlu1 %v3626_v6, %s8511_s23  ;;  %4602 = vrot.lane.b32.xlu0 %v3969_v30, %s8511_s23  ;;  %v4165_v30 = vcombine.high %v4155_v56, %v13722_v2 }
 0x4c4   :  { %v10857_v48 = vpop.permute.xlu1 %4348  ;;  %v10859_v0 = vpop.permute.xlu0 %4394 }
 0x4c6   :  { %4592 = vrot.lane.b32.xlu1 %v3724_v50, %s8511_s23  ;;  %4606 = vrot.lane.b32.xlu0 %v4067_v44, %s8511_s23  ;;  %v3920_v50 = vcombine.high %v3910_v13, %v13722_v2  ;;  %v4263_v44 = vcombine.high %v4253_v31, %v13722_v2  ;;  %v3756_v13 = vcombine.high %v10701_v53, %v13722_v2 }
 0x4c7   :  { %v4214_v53 = vcombine.high %v4204_v23, %v13722_v2  ;;  %v3868_v23 = vrot.slane %v3854_v12, %v13681_v41  ;;  %v3805_v12 = vcombine.high %v10755_v63, %v13722_v2  ;;  %v4246_v63 = vcombine.high %v10776_v36, %v13722_v2 }
 0x4c8   :  { %v10865_v9 = vpop.permute.xlu1 %4352  ;;  %v10867_v20 = vpop.permute.xlu0 %4398 }
 0x4ca   :  { %4596 = vrot.lane.b32.xlu1 %v3822_v43, %s8511_s23  ;;  %4610 = vrot.lane.b32.xlu0 %v4165_v30, %s8511_s23  ;;  %v3574_v30 = vrot.slane %v3560_v7, %v13681_v41 }
 0x4cc   :  { %v10875_v45 = vpop.permute.xlu1 %4356  ;;  %v10877_v6 = vpop.permute.xlu0 %4402 }
 0x4ce   :  { %4600 = vrot.lane.b32.xlu1 %v3920_v50, %s8511_s23  ;;  %4614 = vrot.lane.b32.xlu0 %v4263_v44, %s8511_s23  ;;  %v3672_v44 = vrot.slane %v3658_v19, %v13681_v41  ;;  %v3952_v19 = vcombine.high %v10730_v57, %v13722_v2 }
 0x4d0   :  { %v10885_v56 = vpop.permute.xlu1 %4360  ;;  %v10887_v43 = vpop.permute.xlu0 %4406 }
 0x4d2   :  { %4604 = vrot.lane.b32.xlu1 %v4018_v18, %s8511_s23  ;;  %4650 = vrot.lane.b32.xlu0 %v3574_v30, %s8512_s24 }
 0x4d4   :  { %v10895_v31 = vpop.permute.xlu1 %4396  ;;  %v10897_v50 = vpop.permute.xlu0 %4410 }
 0x4d5   :  { %13732 = vst [vmem:[#allocation40_spill] sm:$0xff] %v10895_v31  ;;  %v3770_v31 = vrot.slane %v3756_v13, %v13681_v41  ;;  %v3707_v13 = vcombine.high %v10739_v33, %v13722_v2  ;;  %v4148_v33 = vcombine.high %v10760_v4, %v13722_v2 }
 0x4d6   :  { %4608 = vrot.lane.b32.xlu1 %v4116_v55, %s8511_s23  ;;  %4654 = vrot.lane.b32.xlu0 %v3672_v44, %s8512_s24 }
 0x4d8   :  { %v10905_v7 = vpop.permute.xlu1 %4400  ;;  %v10907_v18 = vpop.permute.xlu0 %4414 }
 0x4d9   :  { %13733 = vst [vmem:[#allocation41_spill] sm:$0xff] %v10907_v18  ;;  %v4312_v18 = vcombine.high %v4302_v47, %v13722_v2  ;;  %v3966_v47 = vrot.slane %v3952_v19, %v13681_v41  ;;  %v3903_v19 = vcombine.high %v10773_v37, %v13722_v2 }
 0x4da   :  { %4612 = vrot.lane.b32.xlu1 %v4214_v53, %s8511_s23  ;;  %4658 = vrot.lane.b32.xlu0 %v3770_v31, %s8512_s24 }
 0x4db   :  { %v3917_v36 = vrot.slane %v3903_v19, %v13681_v41  ;;  %v4197_v19 = vcombine.high %v10814_v59, %v13722_v2 }
 0x4dc   :  { %v10917_v55 = vpop.permute.xlu1 %4404  ;;  %v10919_v21 = vpop.permute.xlu0 %4418 }
 0x4dd   :  { %13734 = vst [vmem:[#allocation42_spill] sm:$0xff] %v10919_v21  ;;  %v3623_v21 = vrot.slane %v3609_v3, %v13681_v41  ;;  %v4064_v3 = vrot.slane %v4050_v60, %v13681_v41  ;;  %v4001_v60 = vcombine.high %v10789_v8, %v13722_v2  ;;  %v4211_v59 = vrot.slane %v4197_v19, %v13681_v41 }
 0x4de   :  { %4616 = vrot.lane.b32.xlu1 %v4312_v18, %s8511_s23  ;;  %4662 = vrot.lane.b32.xlu0 %v3868_v23, %s8512_s24 }
 0x4df   :  { %v4015_v8 = vrot.slane %v4001_v60, %v13681_v41 }
 0x4e0   :  { %v10929_v53 = vpop.permute.xlu1 %4408  ;;  %v10931_v57 = vpop.permute.xlu0 %4422 }
 0x4e1   :  { %13735 = vst [vmem:[#allocation43_spill] sm:$0xff] %v10929_v53  ;;  %13736 = vst [vmem:[#allocation61_spill] sm:$0xff] %v10931_v57  ;;  %v3721_v57 = vrot.slane %v3707_v13, %v13681_v41  ;;  %v4162_v13 = vrot.slane %v4148_v33, %v13681_v41 }
 0x4e2   :  { %4652 = vrot.lane.b32.xlu1 %v3623_v21, %s8512_s24  ;;  %4666 = vrot.lane.b32.xlu0 %v3966_v47, %s8512_s24 }
 0x4e4   :  { %v10941_v18 = vpop.permute.xlu1 %4412  ;;  %v10943_v14 = vpop.permute.xlu0 %4458 }
 0x4e5   :  { %13737 = vst [vmem:[#allocation62_spill] sm:$0xff] %v10941_v18  ;;  %13738 = vst [vmem:[#allocation63_spill] sm:$0xff] %v10943_v14  ;;  %v3819_v14 = vrot.slane %v3805_v12, %v13681_v41  ;;  %v4099_v12 = vcombine.high %v10802_v5, %v13722_v2 }
 0x4e6   :  { %4656 = vrot.lane.b32.xlu1 %v3721_v57, %s8512_s24  ;;  %4670 = vrot.lane.b32.xlu0 %v4064_v3, %s8512_s24 }
 0x4e7   :  { %v4113_v5 = vrot.slane %v4099_v12, %v13681_v41 }
 0x4e8   :  { %v10953_v53 = vpop.permute.xlu1 %4416  ;;  %v10955_v4 = vpop.permute.xlu0 %4462 }
 0x4e9   :  { %13739 = vst [vmem:[#allocation64_spill] sm:$0xff] %v10953_v53  ;;  %13740 = vst [vmem:[#allocation65_spill] sm:$0xff] %v10955_v4  ;;  %v4260_v53 = vrot.slane %v4246_v63, %v13681_v41 }
 0x4ea   :  { %4660 = vrot.lane.b32.xlu1 %v3819_v14, %s8512_s24  ;;  %4674 = vrot.lane.b32.xlu0 %v4162_v13, %s8512_s24 }
 0x4ec   :  { %v10963_v18 = vpop.permute.xlu1 %4420  ;;  %v10965_v37 = vpop.permute.xlu0 %4466 }
 0x4ed   :  { %13741 = vst [vmem:[#allocation66_spill] sm:$0xff] %v10963_v18  ;;  %13742 = vst [vmem:[#allocation67_spill] sm:$0xff] %v10965_v37  ;;  %v3578_v18 = vcombine.high %v3574_v30, %v13722_v2  ;;  %v4295_v30 = vcombine.high %v10828_v16, %v13722_v2  ;;  %v3872_v16 = vcombine.high %v3868_v23, %v13722_v2 }
 0x4ee   :  { %4664 = vrot.lane.b32.xlu1 %v3917_v36, %s8512_s24  ;;  %4678 = vrot.lane.b32.xlu0 %v4260_v53, %s8512_s24  ;;  %v3725_v23 = vcombine.high %v3721_v57, %v13722_v2 }
 0x4f0   :  { %v10973_v33 = vpop.permute.xlu1 %4424  ;;  %v10975_v4 = vpop.permute.xlu0 %4470 }
 0x4f1   :  { %13743 = vst [vmem:[#allocation88_spill] sm:$0xff] %v10973_v33  ;;  %v3676_v33 = vcombine.high %v3672_v44, %v13722_v2 }
 0x4f2   :  { %4668 = vrot.lane.b32.xlu1 %v4015_v8, %s8512_s24  ;;  %4714 = vrot.lane.b32.xlu0 %v3578_v18, %s8513_s25 }
 0x4f4   :  { %v10983_v63 = vpop.permute.xlu1 %4460  ;;  %v10985_v37 = vpop.permute.xlu0 %4474 }
 0x4f5   :  { %13744 = vst [vmem:[#allocation75_spill] sm:$0xff] %v10983_v63  ;;  %v3774_v63 = vcombine.high %v3770_v31, %v13722_v2  ;;  %v3627_v31 = vcombine.high %v3623_v21, %v13722_v2 }
 0x4f6   :  { %4672 = vrot.lane.b32.xlu1 %v4113_v5, %s8512_s24  ;;  %4718 = vrot.lane.b32.xlu0 %v3676_v33, %s8513_s25  ;;  %v4309_v33 = vrot.slane %v4295_v30, %v13681_v41 }
 0x4f8   :  { %v10993_v60 = vpop.permute.xlu1 %4464  ;;  %v10995_v18 = vpop.permute.xlu0 %4478 }
 0x4f9   :  { %13745 = vst [vmem:[#allocation96_spill] sm:$0xff] %v10995_v18 }
 0x4fa   :  { %4676 = vrot.lane.b32.xlu1 %v4211_v59, %s8512_s24  ;;  %4722 = vrot.lane.b32.xlu0 %v3774_v63, %s8513_s25  ;;  %v3970_v63 = vcombine.high %v3966_v47, %v13722_v2  ;;  %v3823_v47 = vcombine.high %v3819_v14, %v13722_v2 }
 0x4fc   :  { %v11001_v44 = vpop.permute.xlu1 %4468  ;;  %v11003_v12 = vpop.permute.xlu0 %4482 }
 0x4fd   :  { %13746 = vst [vmem:[#allocation101_spill] sm:$0xff] %v11003_v12 }
 0x4fe   :  { %4680 = vrot.lane.b32.xlu1 %v4309_v33, %s8512_s24  ;;  %4726 = vrot.lane.b32.xlu0 %v3872_v16, %s8513_s25  ;;  %v4068_v16 = vcombine.high %v4064_v3, %v13722_v2  ;;  %v3921_v3 = vcombine.high %v3917_v36, %v13722_v2  ;;  %v4117_v36 = vcombine.high %v4113_v5, %v13722_v2 }
 0x500   :  { %v11009_v18 = vpop.permute.xlu1 %4472  ;;  %v11011_v19 = vpop.permute.xlu0 %4486 }
 0x501   :  { %13747 = vst [vmem:[#allocation70_spill] sm:$0xff] %v11009_v18  ;;  %13748 = vst [vmem:[#allocation86_spill] sm:$0xff] %v11011_v19 }
 0x502   :  { %4716 = vrot.lane.b32.xlu1 %v3627_v31, %s8513_s25  ;;  %4730 = vrot.lane.b32.xlu0 %v3970_v63, %s8513_s25  ;;  %v4166_v31 = vcombine.high %v4162_v13, %v13722_v2  ;;  %v4019_v13 = vcombine.high %v4015_v8, %v13722_v2 }
 0x504   :  { %v11017_v12 = vpop.permute.xlu1 %4476  ;;  %v11019_v30 = vpop.permute.xlu0 %4522 }
 0x505   :  { %13749 = vst [vmem:[#allocation79_spill] sm:$0xff] %v11017_v12 }
 0x506   :  { %4720 = vrot.lane.b32.xlu1 %v3725_v23, %s8513_s25  ;;  %4734 = vrot.lane.b32.xlu0 %v4068_v16, %s8513_s25  ;;  %v4264_v23 = vcombine.high %v4260_v53, %v13722_v2 }
 0x508   :  { %v11025_v41 = vpop.permute.xlu1 %4480  ;;  %v11027_v21 = vpop.permute.xlu0 %4526 }
 0x509   :  { %13750 = vst [vmem:[#allocation99_spill] sm:$0xff] %v11025_v41 }
 0x50a   :  { %4724 = vrot.lane.b32.xlu1 %v3823_v47, %s8513_s25  ;;  %4738 = vrot.lane.b32.xlu0 %v4166_v31, %s8513_s25 }
 0x50c   :  { %v11033_v63 = vpop.permute.xlu1 %4484  ;;  %v11035_v57 = vpop.permute.xlu0 %4530 }
 0x50d   :  { %13751 = vst [vmem:[#allocation68_spill] sm:$0xff] %v11033_v63  ;;  %13752 = vst [vmem:[#allocation81_spill] sm:$0xff] %v11035_v57 }
 0x50e   :  { %4728 = vrot.lane.b32.xlu1 %v3921_v3, %s8513_s25  ;;  %4742 = vrot.lane.b32.xlu0 %v4264_v23, %s8513_s25  ;;  %v4215_v23 = vcombine.high %v4211_v59, %v13722_v2 }
 0x510   :  { %v11041_v16 = vpop.permute.xlu1 %4488  ;;  %v11043_v14 = vpop.permute.xlu0 %4534 }
 0x511   :  { %13753 = vst [vmem:[#allocation91_spill] sm:$0xff] %v11041_v16 }
 0x512   :  { %4732 = vrot.lane.b32.xlu1 %v4019_v13, %s8513_s25  ;;  %v4313_v13 = vcombine.high %v4309_v33, %v13722_v2 }
 0x514   :  { %v11047_v47 = vpop.permute.xlu1 %4524  ;;  %v11049_v31 = vpop.permute.xlu0 %4538 }
 0x515   :  { %13754 = vst [vmem:[#allocation69_spill] sm:$0xff] %v11049_v31 }
 0x516   :  { %4736 = vrot.lane.b32.xlu1 %v4117_v36, %s8513_s25 }
 0x518   :  { %v11053_v53 = vpop.permute.xlu1 %4528  ;;  %v11055_v3 = vpop.permute.xlu0 %4542 }
 0x519   :  { %13755 = vst [vmem:[#allocation71_spill] sm:$0xff] %v11055_v3 }
 0x51a   :  { %4740 = vrot.lane.b32.xlu1 %v4215_v23, %s8513_s25 }
 0x51c   :  { %v11059_v16 = vpop.permute.xlu1 %4532  ;;  %v11061_v8 = vpop.permute.xlu0 %4546 }
 0x51d   :  { %13756 = vst [vmem:[#allocation93_spill] sm:$0xff] %v11059_v16  ;;  %13757 = vst [vmem:[#allocation72_spill] sm:$0xff] %v11061_v8 }
 0x51e   :  { %4744 = vrot.lane.b32.xlu1 %v4313_v13, %s8513_s25 }
 0x520   :  { %v11065_v31 = vpop.permute.xlu1 %4536  ;;  %v11067_v5 = vpop.permute.xlu0 %4550 }
 0x521   :  { %13758 = vst [vmem:[#allocation105_spill] sm:$0xff] %v11065_v31  ;;  %13759 = vst [vmem:[#allocation73_spill] sm:$0xff] %v11067_v5 }
 0x524   :  { %v11069_v36 = vpop.permute.xlu1 %4540  ;;  %v11071_v63 = vpop.permute.xlu0 %4586 }
 0x525   :  { %13760 = vst [vmem:[#allocation74_spill] sm:$0xff] %v11069_v36 }
 0x528   :  { %v11073_v3 = vpop.permute.xlu1 %4544  ;;  %v11075_v59 = vpop.permute.xlu0 %4590 }
 0x529   :  { %13761 = vst [vmem:[#allocation76_spill] sm:$0xff] %v11073_v3 }
 0x52c   :  { %v11077_v23 = vpop.permute.xlu1 %4548  ;;  %v11079_v41 = vpop.permute.xlu0 %4594 }
 0x52d   :  { %13762 = vst [vmem:[#allocation77_spill] sm:$0xff] %v11077_v23  ;;  %13763 = vst [vmem:[#allocation78_spill] sm:$0xff] %v11079_v41 }
 0x530   :  { %v11081_v8 = vpop.permute.xlu1 %4552  ;;  %v11083_v33 = vpop.permute.xlu0 %4598 }
 0x531   :  { %13764 = vst [vmem:[#allocation80_spill] sm:$0xff] %v11081_v8  ;;  %13765 = vst [vmem:[#allocation82_spill] sm:$0xff] %v11083_v33 }
 0x534   :  { %v11085_v13 = vpop.permute.xlu1 %4588  ;;  %v11087_v2 = vpop.permute.xlu0 %4602 }
 0x535   :  { %13766 = vst [vmem:[#allocation83_spill] sm:$0xff] %v11087_v2 }
 0x538   :  { %v11089_v5 = vpop.permute.xlu1 %4592  ;;  %v11091_v36 = vpop.permute.xlu0 %4606 }
 0x539   :  { %13767 = vst [vmem:[#allocation84_spill] sm:$0xff] %v11091_v36 }
 0x53c   :  { %v11093_v12 = vpop.permute.xlu1 %4596  ;;  %v11095_v3 = vpop.permute.xlu0 %4610 }
 0x53d   :  { %13768 = vst [vmem:[#allocation85_spill] sm:$0xff] %v11093_v12  ;;  %13769 = vst [vmem:[#allocation89_spill] sm:$0xff] %v11095_v3 }
 0x540   :  { %v11097_v19 = vpop.permute.xlu1 %4600  ;;  %v11099_v23 = vpop.permute.xlu0 %4614 }
 0x541   :  { %13770 = vst [vmem:[#allocation90_spill] sm:$0xff] %v11097_v19  ;;  %13771 = vst [vmem:[#allocation92_spill] sm:$0xff] %v11099_v23 }
 0x544   :  { %v11101_v31 = vpop.permute.xlu1 %4604  ;;  %v11103_v8 = vpop.permute.xlu0 %4650 }
 0x545   :  { %13772 = vst [vmem:[#allocation94_spill] sm:$0xff] %v11101_v31  ;;  %13773 = vst [vmem:[#allocation95_spill] sm:$0xff] %v11103_v8 }
 0x548   :  { %v11105_v16 = vpop.permute.xlu1 %4608  ;;  %v11107_v41 = vpop.permute.xlu0 %4654 }
 0x549   :  { %13774 = vst [vmem:[#allocation97_spill] sm:$0xff] %v11105_v16 }
 0x54c   :  { %v11109_v2 = vpop.permute.xlu1 %4612  ;;  %v11111_v18 = vpop.permute.xlu0 %4658 }
 0x54d   :  { %13775 = vst [vmem:[#allocation102_spill] sm:$0xff] %v11109_v2  ;;  %13776 = vst [vmem:[#allocation103_spill] sm:$0xff] %v11111_v18 }
 0x550   :  { %v11113_v36 = vpop.permute.xlu1 %4616  ;;  %v11115_v12 = vpop.permute.xlu0 %4662 }
 0x551   :  { %13777 = vst [vmem:[#allocation107_spill] sm:$0xff] %v11113_v36  ;;  %13778 = vst [vmem:[#allocation108_spill] sm:$0xff] %v11115_v12 }
 0x554   :  { %v11117_v3 = vpop.permute.xlu1 %4652  ;;  %v11119_v19 = vpop.permute.xlu0 %4666 }
 0x555   :  { %13779 = vst [vmem:[#allocation106_spill] sm:$0xff] %v11119_v19  ;;  %v4762_v19 = vsel %vm552_vm0, %v10398_v42, %v10764_v49  ;;  %v4763_v42 = vsel %vm552_vm0, %v10482_v26, %v10818_v46  ;;  %v4767_v49 = vsel %vm552_vm0, %v10528_v51, %v10839_v61  ;;  %v4774_v26 = vsel %vm552_vm0, %v10531_v32, %v10841_v40 }
 0x556   :  { %v4773_v51 = vsel %vm552_vm0, %v10580_v52, %v10865_v9  ;;  %v13786_v52 = vld [vmem:[#allocation40_spill] sm:$0xff] }
 0x558   :  { %v11121_v23 = vpop.permute.xlu1 %4656  ;;  %v11123_v31 = vpop.permute.xlu0 %4670 }
 0x559   :  { %13780 = vst [vmem:[#allocation98_spill] sm:$0xff] %v11123_v31  ;;  %v4764_v31 = vsel %vm552_vm0, %v10416_v54, %v10780_v62  ;;  %v4770_v54 = vsel %vm552_vm0, %v10486_v29, %v10820_v10  ;;  %v4769_v29 = vsel %vm552_vm0, %v10548_v27, %v10849_v24  ;;  %v4778_v62 = vsel %vm555_vm1, %v4762_v19, %v10859_v0  ;;  %v13785_v27 = vld [vmem:[#allocation39_spill] sm:$0xff]  ;;  %v13794_v19 = vld [vmem:[#allocation65_spill] sm:$0xff] }
 0x55a   :  { %v4780_v40 = vsel %vm555_vm1, %v4764_v31, %v10867_v20  ;;  %v4775_v24 = vsel %vm552_vm0, %v10594_v34, %v10875_v45  ;;  %v4783_v10 = vsel %vm555_vm1, %v4767_v49, %v10917_v55  ;;  %v13791_v45 = vld [vmem:[#allocation62_spill] sm:$0xff] }
 0x55b   :  { %v4796_v55 = vsel %vm558_vm2, %v4780_v40, %v13794_v19 }
 0x55c   :  { %v11125_v8 = vpop.permute.xlu1 %4660  ;;  %v11127_v16 = vpop.permute.xlu0 %4674 }
 0x55d   :  { %13781 = vst [vmem:[#allocation104_spill] sm:$0xff] %v11127_v16  ;;  %v4766_v16 = vsel %vm552_vm0, %v10441_v39, %v10793_v11  ;;  %v4765_v39 = vsel %vm552_vm0, %v10507_v1, %v10830_v17  ;;  %v4776_v1 = vsel %vm552_vm0, %v10551_v38, %v10851_v25  ;;  %v4779_v38 = vsel %vm555_vm1, %v4763_v42, %v13786_v52  ;;  %v13788_v17 = vld [vmem:[#allocation42_spill] sm:$0xff]  ;;  %v13790_v25 = vld [vmem:[#allocation61_spill] sm:$0xff]  ;;  %v13796_v42 = vld [vmem:[#allocation67_spill] sm:$0xff] }
 0x55e   :  { %v4782_v32 = vsel %vm555_vm1, %v4766_v16, %v10877_v6  ;;  %v4786_v11 = vsel %vm555_vm1, %v4770_v54, %v10897_v50  ;;  %v4781_v34 = vsel %vm555_vm1, %v4765_v39, %v10905_v7  ;;  %v4792_v20 = vsel %vm555_vm1, %v4776_v1, %v13790_v25  ;;  %v13793_v50 = vld [vmem:[#allocation64_spill] sm:$0xff]  ;;  %v13795_v16 = vld [vmem:[#allocation66_spill] sm:$0xff] }
 0x55f   :  { %v4789_v7 = vsel %vm555_vm1, %v4773_v51, %v13793_v50  ;;  %v4791_v31 = vsel %vm555_vm1, %v4775_v24, %v13795_v16  ;;  %v4798_v54 = vsel %vm558_vm2, %v4782_v32, %v13796_v42  ;;  %v13797_v39 = vld [vmem:[#allocation88_spill] sm:$0xff]  ;;  %v4799_v51 = vsel %vm558_vm2, %v4783_v10, %v11001_v44  ;;  %v13804_v10 = vld [vmem:[#allocation70_spill] sm:$0xff]  ;;  %v13807_v50 = vld [vmem:[#allocation103_spill] sm:$0xff] }
 0x560   :  { %v11129_v57 = vpop.permute.xlu1 %4664  ;;  %v11131_v2 = vpop.permute.xlu0 %4678  ;;  %v4812_v24 = vsel %vm561_vm3, %v4796_v55, %v11027_v21 }
 0x561   :  { %13782 = vst [vmem:[#allocation87_spill] sm:$0xff] %v11131_v2  ;;  %v4768_v2 = vsel %vm552_vm0, %v10463_v22, %v10806_v28  ;;  %v4772_v22 = vsel %vm552_vm0, %v10511_v58, %v10832_v35  ;;  %v4771_v58 = vsel %vm552_vm0, %v10566_v15, %v10857_v48  ;;  %v4777_v48 = vsel %vm552_vm0, %v13785_v27, %v10885_v56  ;;  %v13787_v28 = vld [vmem:[#allocation41_spill] sm:$0xff]  ;;  %v13789_v35 = vld [vmem:[#allocation43_spill] sm:$0xff] }
 0x562   :  { %v4784_v0 = vsel %vm555_vm1, %v4768_v2, %v10887_v43  ;;  %v4788_v46 = vsel %vm555_vm1, %v4772_v22, %v13787_v28  ;;  %v4790_v2 = vsel %vm555_vm1, %v4774_v26, %v13788_v17  ;;  %v4785_v61 = vsel %vm555_vm1, %v4769_v29, %v13789_v35  ;;  %v13792_v56 = vld [vmem:[#allocation63_spill] sm:$0xff]  ;;  %v13805_v35 = vld [vmem:[#allocation78_spill] sm:$0xff] }
 0x563   :  { %v4787_v6 = vsel %vm555_vm1, %v4771_v58, %v13791_v45  ;;  %v4794_v43 = vsel %vm558_vm2, %v4778_v62, %v13792_v56  ;;  %v4793_v22 = vsel %vm555_vm1, %v4777_v48, %v13797_v39  ;;  %v4800_v49 = vsel %vm558_vm2, %v4784_v0, %v10975_v4  ;;  %v13798_v29 = vld [vmem:[#allocation75_spill] sm:$0xff]  ;;  %v13806_v56 = vld [vmem:[#allocation93_spill] sm:$0xff] }
 0x564   :  { %v11133_v18 = vpop.permute.xlu1 %4668  ;;  %v11135_v36 = vpop.permute.xlu0 %4714  ;;  %v4795_v1 = vsel %vm558_vm2, %v4779_v38, %v13798_v29  ;;  %v4802_v58 = vsel %vm558_vm2, %v4786_v11, %v10985_v37  ;;  %v4797_v62 = vsel %vm558_vm2, %v4781_v34, %v10993_v60  ;;  %v4810_v40 = vsel %vm561_vm3, %v4794_v43, %v11019_v30 }
 0x565   :  { %13783 = vst [vmem:[#allocation100_spill] sm:$0xff] %v11133_v18  ;;  %v4811_v4 = vsel %vm561_vm3, %v4795_v1, %v11047_v47  ;;  %v4813_v32 = vsel %vm561_vm3, %v4797_v62, %v11053_v53  ;;  %v4816_v37 = vsel %vm561_vm3, %v4800_v49, %v11043_v14  ;;  %v4828_v60 = vsel %vm564_vm4, %v4812_v24, %v11075_v59  ;;  %v13799_v59 = vld [vmem:[#allocation82_spill] sm:$0xff]  ;;  %v13809_v49 = vld [vmem:[#allocation105_spill] sm:$0xff] }
 0x566   :  { %v4827_v44 = vsel %vm564_vm4, %v4811_v4, %v11085_v13  ;;  %v4829_v30 = vsel %vm564_vm4, %v4813_v32, %v11089_v5  ;;  %v4826_v21 = vsel %vm564_vm4, %v4810_v40, %v11071_v63  ;;  %v4844_v47 = vsel %vm567_vm5, %v4828_v60, %v11107_v41  ;;  %v13800_v63 = vld [vmem:[#allocation81_spill] sm:$0xff]  ;;  %v13801_v41 = vld [vmem:[#allocation95_spill] sm:$0xff]  ;;  %v13812_v4 = vld [vmem:[#allocation86_spill] sm:$0xff] }
 0x567   :  { %v4843_v53 = vsel %vm567_vm5, %v4827_v44, %v11117_v3  ;;  %v4845_v14 = vsel %vm567_vm5, %v4829_v30, %v11121_v23  ;;  %v4832_v0 = vsel %vm564_vm4, %v4816_v37, %v13799_v59  ;;  %v4814_v38 = vsel %vm561_vm3, %v4798_v54, %v13800_v63  ;;  %v13802_v3 = vld [vmem:[#allocation108_spill] sm:$0xff]  ;;  %v13803_v23 = vld [vmem:[#allocation11_spill] sm:$0xff]  ;;  %v13811_v24 = vld [vmem:[#allocation101_spill] sm:$0xff] }
 0x568   :  { %v11137_v12 = vpop.permute.xlu1 %4672  ;;  %v4719_v33 = vpop.permute.xlu0 %4718  ;;  %v4842_v11 = vsel %vm567_vm5, %v4826_v21, %v13801_v41  ;;  %v4848_v34 = vsel %vm567_vm5, %v4832_v0, %v13802_v3  ;;  %v4801_v17 = vsel %vm558_vm2, %v4785_v61, %v13804_v10  ;;  %v4815_v43 = vsel %vm561_vm3, %v4799_v51, %v13806_v56  ;;  %v13808_v54 = vld [vmem:[#allocation96_spill] sm:$0xff]  ;;  %v13813_v37 = vld [vmem:[#allocation90_spill] sm:$0xff]  ;;  %v13817_v59 = vld [vmem:[#allocation91_spill] sm:$0xff] }
 0x569   :  { %13784 = vst [vmem:[#allocation19_spill] sm:$0xff] %v11137_v12  ;;  %v4860_v13 = vsel %vm570_vm6, %v4844_v47, %v4719_v33  ;;  %v4830_v33 = vsel %vm564_vm4, %v4814_v38, %v13805_v35  ;;  %v4858_v25 = vsel %vm570_vm6, %v4842_v11, %v11135_v36  ;;  %v4804_v39 = vsel %vm558_vm2, %v4788_v46, %v13808_v54  ;;  %v13819_v41 = vld [vmem:[#allocation69_spill] sm:$0xff]  ;;  %v13823_v10 = vld [vmem:[#allocation74_spill] sm:$0xff]  ;;  %v13824_v35 = vld [vmem:[#allocation76_spill] sm:$0xff] }
 0x56a   :  { %v4846_v19 = vsel %vm567_vm5, %v4830_v33, %v13807_v50  ;;  %v4885_v55 = vrot.slane %v4860_v13, %v13803_v23  ;;  %v4817_v36 = vsel %vm561_vm3, %v4801_v17, %v13809_v49  ;;  %v4877_v62 = vrot.slane %v4858_v25, %v13803_v23  ;;  %v13826_v50 = vld [vmem:[#allocation83_spill] sm:$0xff] }
 0x56b   :  { %v4806_v46 = vsel %vm558_vm2, %v4790_v2, %v13811_v24  ;;  %v4808_v32 = vsel %vm558_vm2, %v4792_v20, %v13812_v4  ;;  %v4833_v60 = vsel %vm564_vm4, %v4817_v36, %v13813_v37  ;;  %v4809_v0 = vsel %vm558_vm2, %v4793_v22, %v13817_v59  ;;  %v13822_v22 = vld [vmem:[#allocation73_spill] sm:$0xff] }
 0x56c   :  { %v11151_v18 = vpop.permute.xlu1 %4676  ;;  %v11153_v12 = vpop.permute.xlu0 %4722  ;;  %v4938_v21 = vcombine.low %v4877_v62, %v4885_v55  ;;  %v4818_v11 = vsel %vm561_vm3, %v4802_v58, %v13819_v41  ;;  %v13825_v58 = vld [vmem:[#allocation77_spill] sm:$0xff]  ;;  %v13827_v55 = vld [vmem:[#allocation84_spill] sm:$0xff] }
 0x56d   :  { %v4862_v29 = vsel %vm570_vm6, %v4846_v19, %v11153_v12  ;;  %v13814_v12 = vld [vmem:[#allocation79_spill] sm:$0xff]  ;;  %v4834_v19 = vsel %vm564_vm4, %v4818_v11, %v13826_v50  ;;  %v13831_v62 = vld [vmem:[#allocation97_spill] sm:$0xff]  ;;  %v13839_v11 = vld [vmem:[#allocation104_spill] sm:$0xff] }
 0x56e   :  { %v4803_v30 = vsel %vm558_vm2, %v4787_v6, %v13814_v12  ;;  %v4893_v47 = vrot.slane %v4862_v29, %v13803_v23  ;;  %v13818_v6 = vld [vmem:[#allocation12_spill] sm:$0xff]  ;;  %v13830_v29 = vld [vmem:[#allocation94_spill] sm:$0xff] }
 0x56f   :  { %v4819_v17 = vsel %vm561_vm3, %v4803_v30, %v13823_v10  ;;  %v4945_v25 = vrot.slane %v4938_v21, %v13818_v6  ;;  %v13840_v10 = vld [vmem:[#allocation80_spill] sm:$0xff] }
 0x570   :  { %v11199_v15 = vpop.permute.xlu1 %4680  ;;  %v4727_v9 = vpop.permute.xlu0 %4726 }
 0x571   :  { %v4864_v45 = vsel %vm570_vm6, %v4848_v34, %v4727_v9 }
 0x572   :  { %v4901_v51 = vrot.slane %v4864_v45, %v13803_v23 }
 0x574   :  { %v4717_v26 = vpop.permute.xlu1 %4716  ;;  %v11249_v27 = vpop.permute.xlu0 %4730 }
 0x575   :  { %v4859_v5 = vsel %vm570_vm6, %v4843_v53, %v4717_v26  ;;  %v13810_v26 = vld [vmem:[#allocation85_spill] sm:$0xff] }
 0x576   :  { %v4881_v16 = vrot.slane %v4859_v5, %v13803_v23  ;;  %v4831_v9 = vsel %vm564_vm4, %v4815_v43, %v13810_v26  ;;  %v4954_v5 = vcombine.low %v4893_v47, %v4901_v51  ;;  %v13836_v47 = vld [vmem:[#allocation87_spill] sm:$0xff] }
 0x577   :  { %v4847_v1 = vsel %vm567_vm5, %v4831_v9, %v11125_v8  ;;  %v4849_v8 = vsel %vm567_vm5, %v4833_v60, %v11129_v57  ;;  %v13835_v60 = vld [vmem:[#allocation19_spill] sm:$0xff] }
 0x578   :  { %v4721_v48 = vpop.permute.xlu1 %4720  ;;  %v4735_v42 = vpop.permute.xlu0 %4734  ;;  %v4961_v36 = vrot.slane %v4954_v5, %v13818_v6 }
 0x579   :  { %v4861_v52 = vsel %vm570_vm6, %v4845_v14, %v4721_v48  ;;  %v13815_v14 = vld [vmem:[#allocation99_spill] sm:$0xff]  ;;  %v13816_v48 = vld [vmem:[#allocation68_spill] sm:$0xff] }
 0x57a   :  { %v4889_v28 = vrot.slane %v4861_v52, %v13803_v23  ;;  %v4805_v2 = vsel %vm558_vm2, %v4789_v7, %v13815_v14  ;;  %v4807_v20 = vsel %vm558_vm2, %v4791_v31, %v13816_v48  ;;  %v13820_v7 = vld [vmem:[#allocation71_spill] sm:$0xff]  ;;  %v13821_v31 = vld [vmem:[#allocation72_spill] sm:$0xff] }
 0x57b   :  { %v4820_v3 = vsel %vm561_vm3, %v4804_v39, %v13820_v7  ;;  %v4822_v34 = vsel %vm561_vm3, %v4806_v46, %v13821_v31  ;;  %v4821_v33 = vsel %vm561_vm3, %v4805_v2, %v13824_v35  ;;  %v4823_v43 = vsel %vm561_vm3, %v4807_v20, %v13825_v58  ;;  %v13829_v39 = vld [vmem:[#allocation92_spill] sm:$0xff]  ;;  %v13833_v46 = vld [vmem:[#allocation98_spill] sm:$0xff] }
 0x57c   :  { %v4725_v61 = vpop.permute.xlu1 %4724  ;;  %v4946_v40 = vcombine.low %v4881_v16, %v4889_v28  ;;  %v4739_v63 = vpop.permute.xlu0 %4738  ;;  %v4824_v28 = vsel %vm561_vm3, %v4808_v32, %v13822_v22  ;;  %v4836_v16 = vsel %vm564_vm4, %v4820_v3, %v13827_v55  ;;  %v4837_v51 = vsel %vm564_vm4, %v4821_v33, %v13831_v62  ;;  %v13834_v32 = vld [vmem:[#allocation100_spill] sm:$0xff] }
 0x57d   :  { %v4863_v44 = vsel %vm570_vm6, %v4847_v1, %v4725_v61  ;;  %v13828_v61 = vld [vmem:[#allocation89_spill] sm:$0xff]  ;;  %v4840_v49 = vsel %vm564_vm4, %v4824_v28, %v13829_v39  ;;  %v4835_v1 = vsel %vm564_vm4, %v4819_v17, %v13830_v29  ;;  %v4852_v4 = vsel %vm567_vm5, %v4836_v16, %v13833_v46  ;;  %v13842_v46 = vld [vmem:[#allocation44_spill] sm:$0xff] }
 0x57e   :  { %v4953_v52 = vrot.slane %v4946_v40, %v13818_v6  ;;  %v4897_v57 = vrot.slane %v4863_v44, %v13803_v23  ;;  %v4838_v54 = vsel %vm564_vm4, %v4822_v34, %v13828_v61  ;;  %v13832_v40 = vld [vmem:[#allocation106_spill] sm:$0xff]  ;;  %v4851_v37 = vsel %vm567_vm5, %v4835_v1, %v13834_v32 }
 0x57f   :  { %v4850_v24 = vsel %vm567_vm5, %v4834_v19, %v13832_v40  ;;  %v4853_v44 = vsel %vm567_vm5, %v4837_v51, %v13835_v60  ;;  %v4868_v14 = vsel %vm570_vm6, %v4852_v4, %v4735_v42  ;;  %v4854_v7 = vsel %vm567_vm5, %v4838_v54, %v13839_v11  ;;  %v13855_v11 = vld [vmem:[#allocation57_spill] sm:$0xff] }
 0x580   :  { %v4729_v53 = vpop.permute.xlu1 %4728  ;;  %v4970_v26 = vcombine.low %v4945_v25, %v4953_v52  ;;  %v4971_v20 = vcombine.high %v4945_v25, %v4953_v52  ;;  %v4866_v42 = vsel %vm570_vm6, %v4850_v24, %v11249_v27  ;;  %v4917_v52 = vrot.slane %v4868_v14, %v13803_v23  ;;  %v13846_v14 = vld [vmem:[#allocation49_spill] sm:$0xff] }
 0x581   :  { %v4865_v13 = vsel %vm570_vm6, %v4849_v8, %v4729_v53  ;;  %v4743_v8 = vpop.permute.xlu0 %4742  ;;  %v4856_v53 = vsel %vm567_vm5, %v4840_v49, %v13836_v47  ;;  %v4825_v17 = vsel %vm561_vm3, %v4809_v0, %v13840_v10  ;;  %v4870_v27 = vsel %vm570_vm6, %v4854_v7, %v4739_v63  ;;  %v13856_v7 = vld [vmem:[#allocation58_spill] sm:$0xff]  ;;  %v13858_v10 = vld [vmem:[#allocation60_spill] sm:$0xff] }
 0x582   :  { %v4905_v38 = vrot.slane %v4865_v13, %v13803_v23  ;;  %v13837_v13 = vld [vmem:[#allocation13_spill] sm:$0xff]  ;;  %v4872_v3 = vsel %vm570_vm6, %v4856_v53, %v4743_v8  ;;  %v4909_v25 = vrot.slane %v4866_v42, %v13803_v23  ;;  %v4925_v19 = vrot.slane %v4870_v27, %v13803_v23  ;;  %v13845_v53 = vld [vmem:[#allocation47_spill] sm:$0xff] }
 0x583   :  { %v11370_v5 = vrot.slane %v4970_v26, %v13837_v13  ;;  %v4985_v58 = vrot.slane %v4971_v20, %v13837_v13  ;;  %v13849_v20 = vld [vmem:[#allocation50_spill] sm:$0xff]  ;;  %v13857_v42 = vld [vmem:[#allocation59_spill] sm:$0xff] }
 0x584   :  { %v4962_v45 = vcombine.low %v4897_v57, %v4905_v38  ;;  %v4733_v56 = vpop.permute.xlu1 %4732  ;;  %v13838_v38 = vld [vmem:[#allocation102_spill] sm:$0xff]  ;;  %v5006_v63 = vcombine.low %v4909_v25, %v4917_v52 }
 0x585   :  { %v4867_v2 = vsel %vm570_vm6, %v4851_v37, %v4733_v56  ;;  %v4839_v41 = vsel %vm564_vm4, %v4823_v43, %v13838_v38  ;;  %v13841_v43 = vld [vmem:[#allocation107_spill] sm:$0xff]  ;;  %v13853_v38 = vld [vmem:[#allocation54_spill] sm:$0xff] }
 0x586   :  { %v4969_v9 = vrot.slane %v4962_v45, %v13818_v6  ;;  %v4913_v31 = vrot.slane %v4867_v2, %v13803_v23  ;;  %v4855_v35 = vsel %vm567_vm5, %v4839_v41, %v11151_v18  ;;  %v4933_v45 = vrot.slane %v4872_v3, %v13803_v23  ;;  %v13847_v2 = vld [vmem:[#allocation48_spill] sm:$0xff] }
 0x587   :  { %v4841_v0 = vsel %vm564_vm4, %v4825_v17, %v13841_v43  ;;  %v5013_v26 = vrot.slane %v5006_v63, %v13818_v6  ;;  %v13854_v41 = vld [vmem:[#allocation56_spill] sm:$0xff] }
 0x588   :  { %v4986_v12 = vcombine.low %v4961_v36, %v4969_v9  ;;  %v4987_v30 = vcombine.high %v4961_v36, %v4969_v9  ;;  %v4737_v21 = vpop.permute.xlu1 %4736  ;;  %v4857_v18 = vsel %vm567_vm5, %v4841_v0, %v11199_v15  ;;  %v5022_v54 = vcombine.low %v4925_v19, %v4933_v45 }
 0x589   :  { %v4869_v48 = vsel %vm570_vm6, %v4853_v44, %v4737_v21  ;;  %v13844_v21 = vld [vmem:[#allocation46_spill] sm:$0xff] }
 0x58a   :  { %v4921_v59 = vrot.slane %v4869_v48, %v13803_v23  ;;  %v11373_v57 = vrot.slane %v4986_v12, %v13837_v13  ;;  %v5001_v28 = vrot.slane %v4987_v30, %v13837_v13  ;;  %v5029_v29 = vrot.slane %v5022_v54, %v13818_v6  ;;  %v13843_v12 = vld [vmem:[#allocation45_spill] sm:$0xff]  ;;  %v13848_v48 = vld [vmem:[#allocation51_spill] sm:$0xff] }
 0x58c   :  { %v4741_v34 = vpop.permute.xlu1 %4740  ;;  %v5003_v22 = vcombine.high %v11370_v5, %v11373_v57  ;;  %v5002_v33 = vcombine.low %v11370_v5, %v11373_v57  ;;  %v5014_v56 = vcombine.low %v4913_v31, %v4921_v59  ;;  %v5004_v16 = vcombine.low %v4985_v58, %v5001_v28  ;;  %v13850_v59 = vld [vmem:[#allocation53_spill] sm:$0xff]  ;;  %v13851_v5 = vld [vmem:[#allocation52_spill] sm:$0xff]  ;;  %v13852_v57 = vld [vmem:[#allocation55_spill] sm:$0xff] }
 0x58d   :  { %v4871_v50 = vsel %vm570_vm6, %v4855_v35, %v4741_v34  ;;  %v5005_v15 = vcombine.high %v4985_v58, %v5001_v28  ;;  %v13859_v58 = vmov 0.0  }
 0x58e   :  { %5076 = vrot.lane.b32.xlu0 %v5003_v22, %s8517_s28  ;;  %v5021_v39 = vrot.slane %v5014_v56, %v13818_v6  ;;  %v4929_v49 = vrot.slane %v4871_v50, %v13803_v23 }
 0x590   :  { %v4745_v55 = vpop.permute.xlu1 %4744  ;;  %v5038_v1 = vcombine.low %v5013_v26, %v5021_v39  ;;  %v5039_v24 = vcombine.high %v5013_v26, %v5021_v39  ;;  %v13860_v26 = vld [vmem:[#allocation36_spill] sm:$0xff] }
 0x591   :  { %v4873_v61 = vsel %vm570_vm6, %v4857_v18, %v4745_v55 }
 0x592   :  { %v4937_v36 = vrot.slane %v4873_v61, %v13803_v23  ;;  %5084 = vrot.lane.b32.xlu0 %v5004_v16, %s8518_s29  ;;  %v5046_v4 = vrot.slane %v5038_v1, %v13837_v13  ;;  %v5053_v30 = vrot.slane %v5039_v24, %v13837_v13 }
 0x594   :  { %v5030_v9 = vcombine.low %v4929_v49, %v4937_v36 }
 0x596   :  { %v5037_v62 = vrot.slane %v5030_v9, %v13818_v6  ;;  %5092 = vrot.lane.b32.xlu0 %v5005_v15, %s8519_s30 }
 0x598   :  { %v5054_v51 = vcombine.low %v5029_v29, %v5037_v62  ;;  %v5055_v40 = vcombine.high %v5029_v29, %v5037_v62 }
 0x59a   :  { %5110 = vbcast.lane.b32.xlu0 %v13842_v46, 272  ;;  %v5062_v32 = vrot.slane %v5054_v51, %v13837_v13  ;;  %v5069_v60 = vrot.slane %v5055_v40, %v13837_v13 }
 0x59c   :  { %v5071_v37 = vcombine.high %v5046_v4, %v5062_v32  ;;  %v5070_v44 = vcombine.low %v5046_v4, %v5062_v32  ;;  %v5072_v8 = vcombine.low %v5053_v30, %v5069_v60  ;;  %v5073_v47 = vcombine.high %v5053_v30, %v5069_v60 }
 0x59e   :  { %5118 = vbcast.lane.b32.xlu0 %v13843_v12, 272  ;;  %5078 = vrot.lane.b32.xlu1 %v5071_v37, %s8517_s28 }
 0x5a2   :  { %5126 = vbcast.lane.b32.xlu0 %v13844_v21, 272  ;;  %5086 = vrot.lane.b32.xlu1 %v5072_v8, %s8518_s29 }
 0x5a6   :  { %5134 = vbcast.lane.b32.xlu0 %v13845_v53, 272  ;;  %5094 = vrot.lane.b32.xlu1 %v5073_v47, %s8519_s30 }
 0x5aa   :  { %5142 = vbcast.lane.b32.xlu0 %v13846_v14, 272  ;;  %5114 = vbcast.lane.b32.xlu1 %v13847_v2, 272 }
 0x5ae   :  { %5150 = vbcast.lane.b32.xlu0 %v13848_v48, 272  ;;  %5122 = vbcast.lane.b32.xlu1 %v13849_v20, 272 }
 0x5b2   :  { %5158 = vbcast.lane.b32.xlu0 %v13850_v59, 272  ;;  %5130 = vbcast.lane.b32.xlu1 %v13851_v5, 272 }
 0x5b6   :  { %5166 = vbcast.lane.b32.xlu0 %v13852_v57, 272  ;;  %5138 = vbcast.lane.b32.xlu1 %v13853_v38, 272 }
 0x5ba   :  { %5146 = vbcast.lane.b32.xlu1 %v13854_v41, 272 }
 0x5be   :  { %5154 = vbcast.lane.b32.xlu1 %v13855_v11, 272 }
 0x5c2   :  { %5162 = vbcast.lane.b32.xlu1 %v13856_v7, 272 }
 0x5c6   :  { %5170 = vbcast.lane.b32.xlu1 %v13857_v42, 272 }
 0x600   :  { %v5077_v3 = vpop.permute.xlu0 %5076 }
 0x601   :  { %v5098_v31 = vsel %vm1767_vm7, %v5002_v33, %v5077_v3 }
 0x604   :  { %v5085_v52 = vpop.permute.xlu0 %5084 }
 0x605   :  { %v5100_v34 = vsel %vm1770_vm8, %v5098_v31, %v5085_v52 }
 0x608   :  { %v5093_v22 = vpop.permute.xlu0 %5092 }
 0x609   :  { %v5102_v28 = vsel %vm1773_vm9, %v5100_v34, %v5093_v22 }
 0x60a   :  { %v5104_v17 = vmul.f32 %v5102_v28, %v13858_v10 }
 0x60c   :  { %5106 = vst [vmem:[#allocation7 + $0x8] sm:$0xff] %v5104_v17  ;;  %v11440_v35 = vpop.permute.xlu0 %5110 }
 0x60d   :  { %v11444_v27 = vrot.slane %v11440_v35, %v13818_v6 }
 0x60f   :  { %v11448_v25 = vrot.slane %v11444_v27, %v13837_v13 }
 0x610   :  { %v5079_v45 = vpop.permute.xlu1 %5078  ;;  %v11450_v33 = vpop.permute.xlu0 %5118 }
 0x611   :  { %v11454_v56 = vrot.slane %v11450_v33, %v13818_v6  ;;  %v5217_v43 = vcombine.high %v11448_v25, %v13859_v58  ;;  %v5099_v55 = vsel %vm1767_vm7, %v5070_v44, %v5079_v45 }
 0x613   :  { %v11460_v0 = vrot.slane %v11454_v56, %v13837_v13  ;;  %5972 = vrot.lane.b32.xlu0 %v5217_v43, %s8508_s1 }
 0x614   :  { %v5087_v50 = vpop.permute.xlu1 %5086  ;;  %v11463_v18 = vpop.permute.xlu0 %5126 }
 0x615   :  { %v11467_v63 = vrot.slane %v11463_v18, %v13818_v6  ;;  %v5315_v19 = vcombine.high %v11460_v0, %v13859_v58  ;;  %v5101_v61 = vsel %vm1770_vm8, %v5099_v55, %v5087_v50 }
 0x617   :  { %v11474_v16 = vrot.slane %v11467_v63, %v13837_v13  ;;  %5976 = vrot.lane.b32.xlu0 %v5315_v19, %s8508_s1 }
 0x618   :  { %v5095_v54 = vpop.permute.xlu1 %5094  ;;  %v11478_v39 = vpop.permute.xlu0 %5134 }
 0x619   :  { %v5103_v49 = vsel %vm1773_vm9, %v5101_v61, %v5095_v54  ;;  %v11483_v36 = vrot.slane %v11478_v39, %v13818_v6  ;;  %v5413_v15 = vcombine.high %v11474_v16, %v13859_v58 }
 0x61a   :  { %v5105_v9 = vmul.f32 %v5103_v49, %v13860_v26 }
 0x61b   :  { %v11490_v29 = vrot.slane %v11483_v36, %v13837_v13  ;;  %5980 = vrot.lane.b32.xlu0 %v5413_v15, %s8508_s1 }
 0x61c   :  { %5107 = vst [vmem:[#allocation7 + $0x28] sm:$0xff] %v5105_v9  ;;  %v11493_v1 = vpop.permute.xlu1 %5114  ;;  %v11495_v62 = vpop.permute.xlu0 %5142 }
 0x61d   :  { %v11499_v51 = vrot.slane %v11493_v1, %v13818_v6  ;;  %v11503_v40 = vrot.slane %v11495_v62, %v13818_v6  ;;  %v5511_v24 = vcombine.high %v11490_v29, %v13859_v58 }
 0x61f   :  { %v11509_v4 = vrot.slane %v11499_v51, %v13837_v13  ;;  %v11513_v32 = vrot.slane %v11503_v40, %v13837_v13  ;;  %5984 = vrot.lane.b32.xlu0 %v5511_v24, %s8508_s1  ;;  %v5236_v20 = vcombine.high %v11499_v51, %v13859_v58  ;;  %v5579_v48 = vcombine.high %v11503_v40, %v13859_v58 }
 0x620   :  { %v11516_v37 = vpop.permute.xlu1 %5122  ;;  %v11518_v60 = vpop.permute.xlu0 %5150 }
 0x621   :  { %v11522_v44 = vrot.slane %v11516_v37, %v13818_v6  ;;  %v11526_v30 = vrot.slane %v11518_v60, %v13818_v6  ;;  %v5266_v8 = vcombine.high %v11509_v4, %v13859_v58  ;;  %v5609_v47 = vcombine.high %v11513_v32, %v13859_v58 }
 0x622   :  { %v5250_v2 = vrot.slane %v5236_v20, %v13837_v13  ;;  %v5593_v14 = vrot.slane %v5579_v48, %v13837_v13 }
 0x623   :  { %v11534_v3 = vrot.slane %v11522_v44, %v13837_v13  ;;  %v11538_v52 = vrot.slane %v11526_v30, %v13837_v13  ;;  %5974 = vrot.lane.b32.xlu1 %v5266_v8, %s8508_s1  ;;  %5988 = vrot.lane.b32.xlu0 %v5609_v47, %s8508_s1 }
 0x624   :  { %v11542_v31 = vpop.permute.xlu1 %5130  ;;  %v11544_v34 = vpop.permute.xlu0 %5158 }
 0x625   :  { %v5424_v22 = vrot.slane %v11542_v31, %v13818_v6  ;;  %v5767_v28 = vrot.slane %v11544_v34, %v13818_v6  ;;  %v5364_v17 = vcombine.high %v11534_v3, %v13859_v58  ;;  %v5707_v45 = vcombine.high %v11538_v52, %v13859_v58 }
 0x627   :  { %v11555_v43 = vrot.slane %v5424_v22, %v13837_v13  ;;  %v11558_v50 = vrot.slane %v5767_v28, %v13837_v13  ;;  %5978 = vrot.lane.b32.xlu1 %v5364_v17, %s8508_s1  ;;  %5992 = vrot.lane.b32.xlu0 %v5707_v45, %s8508_s1  ;;  %v5187_v45 = vcombine.high %v11444_v27, %v13859_v58 }
 0x628   :  { %v11562_v19 = vpop.permute.xlu1 %5138  ;;  %v11564_v55 = vpop.permute.xlu0 %5166  ;;  %v5285_v27 = vcombine.high %v11454_v56, %v13859_v58  ;;  %v5383_v56 = vcombine.high %v11467_v63, %v13859_v58  ;;  %v5481_v63 = vcombine.high %v11483_v36, %v13859_v58  ;;  %v5432_v51 = vcombine.high %v5424_v22, %v13859_v58 }
 0x629   :  { %v5522_v61 = vrot.slane %v11562_v19, %v13818_v6  ;;  %v5865_v54 = vrot.slane %v11564_v55, %v13818_v6  ;;  %v5462_v49 = vcombine.high %v11555_v43, %v13859_v58  ;;  %v5805_v9 = vcombine.high %v11558_v50, %v13859_v58 }
 0x62a   :  { %v5201_v7 = vrot.slane %v5187_v45, %v13837_v13  ;;  %v5299_v45 = vrot.slane %v5285_v27, %v13837_v13  ;;  %v5397_v27 = vrot.slane %v5383_v56, %v13837_v13  ;;  %v5495_v36 = vrot.slane %v5481_v63, %v13837_v13 }
 0x62b   :  { %v11575_v15 = vrot.slane %v5522_v61, %v13837_v13  ;;  %v11578_v24 = vrot.slane %v5865_v54, %v13837_v13  ;;  %5982 = vrot.lane.b32.xlu1 %v5462_v49, %s8508_s1  ;;  %5996 = vrot.lane.b32.xlu0 %v5805_v9, %s8508_s1  ;;  %v5677_v56 = vcombine.high %v11526_v30, %v13859_v58 }
 0x62c   :  { %v11582_v8 = vpop.permute.xlu1 %5146  ;;  %v5775_v40 = vcombine.high %v5767_v28, %v13859_v58  ;;  %v5530_v20 = vcombine.high %v5522_v61, %v13859_v58  ;;  %v5873_v48 = vcombine.high %v5865_v54, %v13859_v58  ;;  %v5218_v54 = vcombine.high %v5201_v7, %v13859_v58 }
 0x62d   :  { %v5620_v47 = vrot.slane %v11582_v8, %v13818_v6  ;;  %v5560_v17 = vcombine.high %v11575_v15, %v13859_v58  ;;  %v5903_v26 = vcombine.high %v11578_v24, %v13859_v58 }
 0x62e   :  { %v5789_v30 = vrot.slane %v5775_v40, %v13837_v13  ;;  %v5544_v28 = vrot.slane %v5530_v20, %v13837_v13 }
 0x62f   :  { %v11593_v10 = vrot.slane %v5620_v47, %v13837_v13  ;;  %5986 = vrot.lane.b32.xlu1 %v5560_v17, %s8508_s1  ;;  %6000 = vrot.lane.b32.xlu0 %v5903_v26, %s8508_s1  ;;  %v5628_v22 = vcombine.high %v5620_v47, %v13859_v58 }
 0x630   :  { %v11597_v49 = vpop.permute.xlu1 %5154 }
 0x631   :  { %v5718_v9 = vrot.slane %v11597_v49, %v13818_v6  ;;  %v5658_v42 = vcombine.high %v11593_v10, %v13859_v58 }
 0x633   :  { %v11607_v11 = vrot.slane %v5718_v9, %v13837_v13  ;;  %5990 = vrot.lane.b32.xlu1 %v5658_v42, %s8508_s1  ;;  %6036 = vrot.lane.b32.xlu0 %v5201_v7, %s8502_s13  ;;  %v5726_v61 = vcombine.high %v5718_v9, %v13859_v58  ;;  %v5414_v7 = vcombine.high %v5397_v27, %v13859_v58 }
 0x634   :  { %v11611_v26 = vpop.permute.xlu1 %5162 }
 0x635   :  { %v5816_v17 = vrot.slane %v11611_v26, %v13818_v6  ;;  %v5756_v41 = vcombine.high %v11607_v11, %v13859_v58  ;;  %v5740_v40 = vrot.slane %v5726_v61, %v13837_v13 }
 0x637   :  { %v11621_v38 = vrot.slane %v5816_v17, %v13837_v13  ;;  %5994 = vrot.lane.b32.xlu1 %v5756_v41, %s8508_s1  ;;  %6040 = vrot.lane.b32.xlu0 %v5299_v45, %s8502_s13  ;;  %v5824_v47 = vcombine.high %v5816_v17, %v13859_v58  ;;  %v5512_v17 = vcombine.high %v5495_v36, %v13859_v58 }
 0x638   :  { %v11625_v42 = vpop.permute.xlu1 %5170 }
 0x639   :  { %v5914_v57 = vrot.slane %v11625_v42, %v13818_v6  ;;  %v5854_v5 = vcombine.high %v11621_v38, %v13859_v58  ;;  %v5838_v20 = vrot.slane %v5824_v47, %v13837_v13 }
 0x63b   :  { %v11635_v59 = vrot.slane %v5914_v57, %v13837_v13  ;;  %5998 = vrot.lane.b32.xlu1 %v5854_v5, %s8508_s1  ;;  %6044 = vrot.lane.b32.xlu0 %v5397_v27, %s8502_s13  ;;  %v5334_v5 = vcombine.high %v11522_v44, %v13859_v58  ;;  %v5446_v44 = vrot.slane %v5432_v51, %v13837_v13 }
 0x63c   :  { %v5316_v51 = vcombine.high %v5299_v45, %v13859_v58  ;;  %v5922_v9 = vcombine.high %v5914_v57, %v13859_v58  ;;  %v5610_v57 = vcombine.high %v5593_v14, %v13859_v58 }
 0x63d   :  { %13861 = vst [vmem:[#allocation14_spill] sm:$0xff] %v11635_v59  ;;  %v5952_v41 = vcombine.high %v11635_v59, %v13859_v58  ;;  %v5348_v63 = vrot.slane %v5334_v5, %v13837_v13  ;;  %v5887_v5 = vrot.slane %v5873_v48, %v13837_v13  ;;  %v5267_v48 = vcombine.high %v5250_v2, %v13859_v58 }
 0x63e   :  { %v5936_v45 = vrot.slane %v5922_v9, %v13837_v13  ;;  %v5463_v61 = vcombine.high %v5446_v44, %v13859_v58  ;;  %v5855_v9 = vcombine.high %v5838_v20, %v13859_v58 }
 0x63f   :  { %6002 = vrot.lane.b32.xlu1 %v5952_v41, %s8508_s1  ;;  %6048 = vrot.lane.b32.xlu0 %v5495_v36, %s8502_s13  ;;  %v5691_v41 = vrot.slane %v5677_v56, %v13837_v13  ;;  %v5642_v56 = vrot.slane %v5628_v22, %v13837_v13  ;;  %v5365_v27 = vcombine.high %v5348_v63, %v13859_v58 }
 0x640   :  { %v5172_v36 = vcombine.high %v11440_v35, %v13859_v58 }
 0x641   :  { %v5708_v22 = vcombine.high %v5691_v41, %v13859_v58 }
 0x643   :  { %6038 = vrot.lane.b32.xlu1 %v5250_v2, %s8502_s13  ;;  %6052 = vrot.lane.b32.xlu0 %v5593_v14, %s8502_s13  ;;  %v5806_v2 = vcombine.high %v5789_v30, %v13859_v58  ;;  %v11707_v14 = vrot.slane %v5172_v36, %v13818_v6 }
 0x645   :  { %v5209_v47 = vrot.slane %v11707_v14, %v13837_v13 }
 0x647   :  { %6042 = vrot.lane.b32.xlu1 %v5348_v63, %s8502_s13  ;;  %6056 = vrot.lane.b32.xlu0 %v5691_v41, %s8502_s13  ;;  %v5270_v63 = vcombine.high %v11450_v33, %v13859_v58  ;;  %v5561_v41 = vcombine.high %v5544_v28, %v13859_v58  ;;  %v5466_v33 = vcombine.high %v11478_v39, %v13859_v58 }
 0x648   :  { %v5564_v39 = vcombine.high %v11495_v62, %v13859_v58 }
 0x649   :  { %v11716_v35 = vrot.slane %v5270_v63, %v13818_v6 }
 0x64a   :  { %v11757_v62 = vrot.slane %v5564_v39, %v13818_v6 }
 0x64b   :  { %6046 = vrot.lane.b32.xlu1 %v5446_v44, %s8502_s13  ;;  %6060 = vrot.lane.b32.xlu0 %v5789_v30, %s8502_s13  ;;  %v5368_v44 = vcombine.high %v11463_v18, %v13859_v58  ;;  %v5659_v30 = vcombine.high %v5642_v56, %v13859_v58  ;;  %v5307_v18 = vrot.slane %v11716_v35, %v13837_v13 }
 0x64f   :  { %6050 = vrot.lane.b32.xlu1 %v5544_v28, %s8502_s13  ;;  %6064 = vrot.lane.b32.xlu0 %v5887_v5, %s8502_s13  ;;  %v11728_v28 = vrot.slane %v5368_v44, %v13818_v6 }
 0x653   :  { %6054 = vrot.lane.b32.xlu1 %v5642_v56, %s8502_s13  ;;  %6100 = vrot.lane.b32.xlu0 %v5218_v54, %s8509_s21  ;;  %v5904_v54 = vcombine.high %v5887_v5, %v13859_v58  ;;  %v5757_v5 = vcombine.high %v5740_v40, %v13859_v58  ;;  %v11736_v56 = vrot.slane %v5466_v33, %v13818_v6 }
 0x657   :  { %6058 = vrot.lane.b32.xlu1 %v5740_v40, %s8502_s13  ;;  %6104 = vrot.lane.b32.xlu0 %v5316_v51, %s8509_s21  ;;  %v5221_v51 = vcombine.high %v11493_v1, %v13859_v58  ;;  %v5405_v40 = vrot.slane %v11728_v28, %v13837_v13 }
 0x659   :  { %v11754_v1 = vrot.slane %v5221_v51, %v13818_v6  ;;  %v5711_v51 = vcombine.high %v11597_v49, %v13859_v58  ;;  %v5415_v53 = vcombine.high %v5405_v40, %v13859_v58 }
 0x65b   :  { %6062 = vrot.lane.b32.xlu1 %v5838_v20, %s8502_s13  ;;  %6108 = vrot.lane.b32.xlu0 %v5414_v7, %s8509_s21  ;;  %v5319_v7 = vcombine.high %v11516_v37, %v13859_v58  ;;  %v5662_v20 = vcombine.high %v11518_v60, %v13859_v58  ;;  %v5258_v60 = vrot.slane %v11754_v1, %v13837_v13 }
 0x65d   :  { %v11766_v37 = vrot.slane %v5319_v7, %v13818_v6  ;;  %v11829_v7 = vrot.slane %v5711_v51, %v13818_v6  ;;  %v5317_v51 = vcombine.high %v5307_v18, %v13859_v58 }
 0x65f   :  { %6066 = vrot.lane.b32.xlu1 %v5936_v45, %s8502_s13  ;;  %6112 = vrot.lane.b32.xlu0 %v5512_v17, %s8509_s21  ;;  %v11751_v17 = vrot.slane %v11736_v56, %v13837_v13  ;;  %v5356_v63 = vrot.slane %v11766_v37, %v13837_v13 }
 0x663   :  { %6102 = vrot.lane.b32.xlu1 %v5267_v48, %s8509_s21  ;;  %6116 = vrot.lane.b32.xlu0 %v5610_v57, %s8509_s21  ;;  %v5953_v48 = vcombine.high %v5936_v45, %v13859_v58  ;;  %v5417_v57 = vcombine.high %v11542_v31, %v13859_v58  ;;  %v5601_v45 = vrot.slane %v11757_v62, %v13837_v13 }
 0x664   :  { %v5515_v31 = vcombine.high %v11562_v19, %v13859_v58 }
 0x665   :  { %v11782_v36 = vrot.slane %v5417_v57, %v13818_v6  ;;  %v5219_v57 = vcombine.high %v5209_v47, %v13859_v58  ;;  %v5611_v46 = vcombine.high %v5601_v45, %v13859_v58 }
 0x666   :  { %v11800_v19 = vrot.slane %v5515_v31, %v13818_v6  ;;  %v5907_v31 = vcombine.high %v11625_v42, %v13859_v58 }
 0x667   :  { %6106 = vrot.lane.b32.xlu1 %v5365_v27, %s8509_s21  ;;  %6120 = vrot.lane.b32.xlu0 %v5708_v22, %s8509_s21  ;;  %v11771_v27 = vrot.slane %v5662_v20, %v13818_v6  ;;  %v5760_v22 = vcombine.high %v11544_v34, %v13859_v58  ;;  %v5858_v34 = vcombine.high %v11564_v55, %v13859_v58 }
 0x668   :  { %v5613_v55 = vcombine.high %v11582_v8, %v13859_v58  ;;  %v5552_v8 = vrot.slane %v11800_v19, %v13837_v13  ;;  %v5809_v20 = vcombine.high %v11611_v26, %v13859_v58 }
 0x66b   :  { %6110 = vrot.lane.b32.xlu1 %v5463_v61, %s8509_s21  ;;  %6124 = vrot.lane.b32.xlu0 %v5806_v2, %s8509_s21  ;;  %v11787_v61 = vrot.slane %v5760_v22, %v13818_v6  ;;  %v11841_v22 = vrot.slane %v5809_v20, %v13818_v6 }
 0x66d   :  { %v5797_v33 = vrot.slane %v11787_v61, %v13837_v13  ;;  %v5846_v42 = vrot.slane %v11841_v22, %v13837_v13 }
 0x66f   :  { %6114 = vrot.lane.b32.xlu1 %v5561_v41, %s8509_s21  ;;  %6128 = vrot.lane.b32.xlu0 %v5904_v54, %s8509_s21  ;;  %v5699_v41 = vrot.slane %v11771_v27, %v13837_v13  ;;  %v11803_v54 = vrot.slane %v5858_v34, %v13818_v6 }
 0x673   :  { %6118 = vrot.lane.b32.xlu1 %v5659_v30, %s8509_s21  ;;  %6164 = vrot.lane.b32.xlu0 %v5209_v47, %s8510_s22  ;;  %v5454_v30 = vrot.slane %v11782_v36, %v13837_v13  ;;  %v11855_v47 = vrot.slane %v5907_v31, %v13818_v6 }
 0x675   :  { %v5944_v31 = vrot.slane %v11855_v47, %v13837_v13 }
 0x677   :  { %6122 = vrot.lane.b32.xlu1 %v5757_v5, %s8509_s21  ;;  %6168 = vrot.lane.b32.xlu0 %v5307_v18, %s8510_s22  ;;  %v11816_v5 = vrot.slane %v5613_v55, %v13818_v6  ;;  %v5748_v55 = vrot.slane %v11829_v7, %v13837_v13 }
 0x679   :  { %v5650_v49 = vrot.slane %v11816_v5, %v13837_v13 }
 0x67b   :  { %6126 = vrot.lane.b32.xlu1 %v5855_v9, %s8509_s21  ;;  %6172 = vrot.lane.b32.xlu0 %v5405_v40, %s8510_s22  ;;  %v5895_v9 = vrot.slane %v11803_v54, %v13837_v13 }
 0x67f   :  { %6130 = vrot.lane.b32.xlu1 %v5953_v48, %s8509_s21  ;;  %6176 = vrot.lane.b32.xlu0 %v11751_v17, %s8510_s22 }
 0x683   :  { %6166 = vrot.lane.b32.xlu1 %v5258_v60, %s8510_s22  ;;  %6180 = vrot.lane.b32.xlu0 %v5601_v45, %s8510_s22  ;;  %v5464_v45 = vcombine.high %v5454_v30, %v13859_v58 }
 0x685   :  { %v11791_v2 = vpop.permute.xlu0 %5972 }
 0x687   :  { %6170 = vrot.lane.b32.xlu1 %v5356_v63, %s8510_s22  ;;  %6184 = vrot.lane.b32.xlu0 %v5699_v41, %s8510_s22 }
 0x689   :  { %v11807_v44 = vpop.permute.xlu0 %5976 }
 0x68b   :  { %6174 = vrot.lane.b32.xlu1 %v5454_v30, %s8510_s22  ;;  %6188 = vrot.lane.b32.xlu0 %v5797_v33, %s8510_s22  ;;  %v5300_v30 = vcombine.high %v11716_v35, %v13859_v58  ;;  %v5758_v35 = vcombine.high %v5748_v55, %v13859_v58 }
 0x68d   :  { %v11820_v39 = vpop.permute.xlu0 %5980 }
 0x68f   :  { %6178 = vrot.lane.b32.xlu1 %v5552_v8, %s8510_s22  ;;  %6192 = vrot.lane.b32.xlu0 %v5895_v9, %s8510_s22 }
 0x691   :  { %v11833_v48 = vpop.permute.xlu0 %5984 }
 0x693   :  { %6182 = vrot.lane.b32.xlu1 %v5650_v49, %s8510_s22  ;;  %6228 = vrot.lane.b32.xlu0 %v5219_v57, %s8511_s23 }
 0x695   :  { %v11845_v34 = vpop.permute.xlu1 %5974  ;;  %v11847_v26 = vpop.permute.xlu0 %5988 }
 0x697   :  { %6186 = vrot.lane.b32.xlu1 %v5748_v55, %s8510_s22  ;;  %6232 = vrot.lane.b32.xlu0 %v5317_v51, %s8511_s23  ;;  %v5513_v51 = vcombine.high %v11751_v17, %v13859_v58  ;;  %v5366_v17 = vcombine.high %v5356_v63, %v13859_v58  ;;  %v5202_v63 = vcombine.high %v11707_v14, %v13859_v58 }
 0x698   :  { %v5660_v14 = vcombine.high %v5650_v49, %v13859_v58  ;;  %v5496_v49 = vcombine.high %v11736_v56, %v13859_v58  ;;  %v5251_v55 = vcombine.high %v11754_v1, %v13859_v58  ;;  %v5692_v1 = vcombine.high %v11771_v27, %v13859_v58 }
 0x699   :  { %v11857_v20 = vpop.permute.xlu1 %5978  ;;  %v11859_v57 = vpop.permute.xlu0 %5992 }
 0x69b   :  { %6190 = vrot.lane.b32.xlu1 %v5846_v42, %s8510_s22  ;;  %6236 = vrot.lane.b32.xlu0 %v5415_v53, %s8511_s23  ;;  %v5268_v53 = vcombine.high %v5258_v60, %v13859_v58 }
 0x69d   :  { %v11866_v18 = vpop.permute.xlu1 %5982  ;;  %v11868_v21 = vpop.permute.xlu0 %5996 }
 0x69f   :  { %6194 = vrot.lane.b32.xlu1 %v5944_v31, %s8510_s22  ;;  %6240 = vrot.lane.b32.xlu0 %v5513_v51, %s8511_s23  ;;  %v5709_v51 = vcombine.high %v5699_v41, %v13859_v58 }
 0x6a1   :  { %v11876_v12 = vpop.permute.xlu1 %5986  ;;  %v11878_v40 = vpop.permute.xlu0 %6000 }
 0x6a3   :  { %6230 = vrot.lane.b32.xlu1 %v5268_v53, %s8511_s23  ;;  %6244 = vrot.lane.b32.xlu0 %v5611_v46, %s8511_s23  ;;  %v5807_v46 = vcombine.high %v5797_v33, %v13859_v58 }
 0x6a5   :  { %v11884_v6 = vpop.permute.xlu1 %5990  ;;  %v11886_v23 = vpop.permute.xlu0 %6036 }
 0x6a7   :  { %6234 = vrot.lane.b32.xlu1 %v5366_v17, %s8511_s23  ;;  %6248 = vrot.lane.b32.xlu0 %v5709_v51, %s8511_s23  ;;  %v5562_v17 = vcombine.high %v5552_v8, %v13859_v58  ;;  %v5905_v51 = vcombine.high %v5895_v9, %v13859_v58  ;;  %v5398_v8 = vcombine.high %v11728_v28, %v13859_v58 }
 0x6a8   :  { %v5856_v28 = vcombine.high %v5846_v42, %v13859_v58  ;;  %v5510_v42 = vrot.slane %v5496_v49, %v13837_v13  ;;  %v5447_v49 = vcombine.high %v11782_v36, %v13859_v58  ;;  %v5888_v36 = vcombine.high %v11803_v54, %v13859_v58 }
 0x6a9   :  { %v11892_v59 = vpop.permute.xlu1 %5994  ;;  %v11894_v60 = vpop.permute.xlu0 %6040 }
 0x6ab   :  { %6238 = vrot.lane.b32.xlu1 %v5464_v45, %s8511_s23  ;;  %6252 = vrot.lane.b32.xlu0 %v5807_v46, %s8511_s23  ;;  %v5216_v46 = vrot.slane %v5202_v63, %v13837_v13 }
 0x6ad   :  { %v11902_v41 = vpop.permute.xlu1 %5998  ;;  %v11904_v53 = vpop.permute.xlu0 %6044 }
 0x6af   :  { %6242 = vrot.lane.b32.xlu1 %v5562_v17, %s8511_s23  ;;  %6256 = vrot.lane.b32.xlu0 %v5905_v51, %s8511_s23  ;;  %v5314_v51 = vrot.slane %v5300_v30, %v13837_v13  ;;  %v5594_v30 = vcombine.high %v11757_v62, %v13859_v58 }
 0x6b1   :  { %v11912_v33 = vpop.permute.xlu1 %6002  ;;  %v11914_v45 = vpop.permute.xlu0 %6048 }
 0x6b3   :  { %6246 = vrot.lane.b32.xlu1 %v5660_v14, %s8511_s23  ;;  %6292 = vrot.lane.b32.xlu0 %v5216_v46, %s8512_s24 }
 0x6b5   :  { %v11922_v9 = vpop.permute.xlu1 %6038  ;;  %v11924_v17 = vpop.permute.xlu0 %6052 }
 0x6b6   :  { %13862 = vst [vmem:[#allocation15_spill] sm:$0xff] %v11922_v9  ;;  %v5412_v9 = vrot.slane %v5398_v8, %v13837_v13  ;;  %v5349_v8 = vcombine.high %v11766_v37, %v13859_v58  ;;  %v5790_v37 = vcombine.high %v11787_v61, %v13859_v58 }
 0x6b7   :  { %6250 = vrot.lane.b32.xlu1 %v5758_v35, %s8511_s23  ;;  %6296 = vrot.lane.b32.xlu0 %v5314_v51, %s8512_s24 }
 0x6b9   :  { %v11932_v63 = vpop.permute.xlu1 %6042  ;;  %v11934_v14 = vpop.permute.xlu0 %6056 }
 0x6ba   :  { %13863 = vst [vmem:[#allocation18_spill] sm:$0xff] %v11934_v14  ;;  %v5954_v14 = vcombine.high %v5944_v31, %v13859_v58  ;;  %v5608_v31 = vrot.slane %v5594_v30, %v13837_v13  ;;  %v5545_v30 = vcombine.high %v11800_v19, %v13859_v58 }
 0x6bb   :  { %6254 = vrot.lane.b32.xlu1 %v5856_v28, %s8511_s23  ;;  %6300 = vrot.lane.b32.xlu0 %v5412_v9, %s8512_s24 }
 0x6bc   :  { %v5559_v54 = vrot.slane %v5545_v30, %v13837_v13  ;;  %v5839_v30 = vcombine.high %v11841_v22, %v13859_v58 }
 0x6bd   :  { %v11944_v35 = vpop.permute.xlu1 %6046  ;;  %v11946_v56 = vpop.permute.xlu0 %6060 }
 0x6be   :  { %13864 = vst [vmem:[#allocation23_spill] sm:$0xff] %v11946_v56  ;;  %v5265_v56 = vrot.slane %v5251_v55, %v13837_v13  ;;  %v5706_v55 = vrot.slane %v5692_v1, %v13837_v13  ;;  %v5643_v1 = vcombine.high %v11816_v5, %v13859_v58  ;;  %v5853_v22 = vrot.slane %v5839_v30, %v13837_v13 }
 0x6bf   :  { %6258 = vrot.lane.b32.xlu1 %v5954_v14, %s8511_s23  ;;  %6304 = vrot.lane.b32.xlu0 %v5510_v42, %s8512_s24 }
 0x6c0   :  { %v5657_v5 = vrot.slane %v5643_v1, %v13837_v13 }
 0x6c1   :  { %v11956_v28 = vpop.permute.xlu1 %6050  ;;  %v11958_v62 = vpop.permute.xlu0 %6064 }
 0x6c2   :  { %13865 = vst [vmem:[#allocation25_spill] sm:$0xff] %v11956_v28  ;;  %13866 = vst [vmem:[#allocation27_spill] sm:$0xff] %v11958_v62  ;;  %v5363_v62 = vrot.slane %v5349_v8, %v13837_v13  ;;  %v5804_v8 = vrot.slane %v5790_v37, %v13837_v13 }
 0x6c3   :  { %6294 = vrot.lane.b32.xlu1 %v5265_v56, %s8512_s24  ;;  %6308 = vrot.lane.b32.xlu0 %v5608_v31, %s8512_s24 }
 0x6c5   :  { %v11968_v14 = vpop.permute.xlu1 %6054  ;;  %v11970_v27 = vpop.permute.xlu0 %6100 }
 0x6c6   :  { %13867 = vst [vmem:[#allocation29_spill] sm:$0xff] %v11968_v14  ;;  %13868 = vst [vmem:[#allocation31_spill] sm:$0xff] %v11970_v27  ;;  %v5461_v27 = vrot.slane %v5447_v49, %v13837_v13  ;;  %v5741_v49 = vcombine.high %v11829_v7, %v13859_v58 }
 0x6c7   :  { %6298 = vrot.lane.b32.xlu1 %v5363_v62, %s8512_s24  ;;  %6312 = vrot.lane.b32.xlu0 %v5706_v55, %s8512_s24 }
 0x6c8   :  { %v5755_v7 = vrot.slane %v5741_v49, %v13837_v13 }
 0x6c9   :  { %v11980_v28 = vpop.permute.xlu1 %6058  ;;  %v11982_v61 = vpop.permute.xlu0 %6104 }
 0x6ca   :  { %13869 = vst [vmem:[#allocation34_spill] sm:$0xff] %v11980_v28  ;;  %13870 = vst [vmem:[#allocation37_spill] sm:$0xff] %v11982_v61  ;;  %v5902_v28 = vrot.slane %v5888_v36, %v13837_v13 }
 0x6cb   :  { %6302 = vrot.lane.b32.xlu1 %v5461_v27, %s8512_s24  ;;  %6316 = vrot.lane.b32.xlu0 %v5804_v8, %s8512_s24 }
 0x6cd   :  { %v11990_v14 = vpop.permute.xlu1 %6062  ;;  %v11992_v19 = vpop.permute.xlu0 %6108 }
 0x6ce   :  { %13871 = vst [vmem:[#allocation32_spill] sm:$0xff] %v11990_v14  ;;  %13872 = vst [vmem:[#allocation21_spill] sm:$0xff] %v11992_v19  ;;  %v5220_v14 = vcombine.high %v5216_v46, %v13859_v58  ;;  %v5937_v46 = vcombine.high %v11855_v47, %v13859_v58  ;;  %v5514_v47 = vcombine.high %v5510_v42, %v13859_v58 }
 0x6cf   :  { %6306 = vrot.lane.b32.xlu1 %v5559_v54, %s8512_s24  ;;  %6320 = vrot.lane.b32.xlu0 %v5902_v28, %s8512_s24  ;;  %v5367_v42 = vcombine.high %v5363_v62, %v13859_v58 }
 0x6d1   :  { %v12000_v37 = vpop.permute.xlu1 %6066  ;;  %v12002_v61 = vpop.permute.xlu0 %6112 }
 0x6d2   :  { %13873 = vst [vmem:[#allocation16_spill] sm:$0xff] %v12000_v37  ;;  %v5318_v37 = vcombine.high %v5314_v51, %v13859_v58 }
 0x6d3   :  { %6310 = vrot.lane.b32.xlu1 %v5657_v5, %s8512_s24  ;;  %6356 = vrot.lane.b32.xlu0 %v5220_v14, %s8513_s25 }
 0x6d5   :  { %v12010_v36 = vpop.permute.xlu1 %6102  ;;  %v12012_v19 = vpop.permute.xlu0 %6116 }
 0x6d6   :  { %13874 = vst [vmem:[#allocation17_spill] sm:$0xff] %v12010_v36  ;;  %v5416_v36 = vcombine.high %v5412_v9, %v13859_v58  ;;  %v5269_v9 = vcombine.high %v5265_v56, %v13859_v58 }
 0x6d7   :  { %6314 = vrot.lane.b32.xlu1 %v5755_v7, %s8512_s24  ;;  %6360 = vrot.lane.b32.xlu0 %v5318_v37, %s8513_s25  ;;  %v5951_v37 = vrot.slane %v5937_v46, %v13837_v13 }
 0x6d9   :  { %v12020_v1 = vpop.permute.xlu1 %6106  ;;  %v12022_v14 = vpop.permute.xlu0 %6120 }
 0x6da   :  { %13875 = vst [vmem:[#allocation20_spill] sm:$0xff] %v12022_v14 }
 0x6db   :  { %6318 = vrot.lane.b32.xlu1 %v5853_v22, %s8512_s24  ;;  %6364 = vrot.lane.b32.xlu0 %v5416_v36, %s8513_s25  ;;  %v5612_v36 = vcombine.high %v5608_v31, %v13859_v58  ;;  %v5465_v31 = vcombine.high %v5461_v27, %v13859_v58 }
 0x6dd   :  { %v12028_v51 = vpop.permute.xlu1 %6110  ;;  %v12030_v49 = vpop.permute.xlu0 %6124 }
 0x6de   :  { %13876 = vst [vmem:[#allocation22_spill] sm:$0xff] %v12030_v49 }
 0x6df   :  { %6322 = vrot.lane.b32.xlu1 %v5951_v37, %s8512_s24  ;;  %6368 = vrot.lane.b32.xlu0 %v5514_v47, %s8513_s25  ;;  %v5710_v47 = vcombine.high %v5706_v55, %v13859_v58  ;;  %v5563_v55 = vcombine.high %v5559_v54, %v13859_v58  ;;  %v5759_v54 = vcombine.high %v5755_v7, %v13859_v58 }
 0x6e1   :  { %v12036_v14 = vpop.permute.xlu1 %6114  ;;  %v12038_v30 = vpop.permute.xlu0 %6128 }
 0x6e2   :  { %13877 = vst [vmem:[#allocation24_spill] sm:$0xff] %v12036_v14  ;;  %13878 = vst [vmem:[#allocation26_spill] sm:$0xff] %v12038_v30 }
 0x6e3   :  { %6358 = vrot.lane.b32.xlu1 %v5269_v9, %s8513_s25  ;;  %6372 = vrot.lane.b32.xlu0 %v5612_v36, %s8513_s25  ;;  %v5808_v9 = vcombine.high %v5804_v8, %v13859_v58  ;;  %v5661_v8 = vcombine.high %v5657_v5, %v13859_v58 }
 0x6e5   :  { %v12044_v49 = vpop.permute.xlu1 %6118  ;;  %v12046_v46 = vpop.permute.xlu0 %6164 }
 0x6e6   :  { %13879 = vst [vmem:[#allocation28_spill] sm:$0xff] %v12044_v49 }
 0x6e7   :  { %6362 = vrot.lane.b32.xlu1 %v5367_v42, %s8513_s25  ;;  %6376 = vrot.lane.b32.xlu0 %v5710_v47, %s8513_s25  ;;  %v5906_v42 = vcombine.high %v5902_v28, %v13859_v58 }
 0x6e9   :  { %v12052_v13 = vpop.permute.xlu1 %6122  ;;  %v12054_v56 = vpop.permute.xlu0 %6168 }
 0x6ea   :  { %13880 = vst [vmem:[#allocation30_spill] sm:$0xff] %v12052_v13 }
 0x6eb   :  { %6366 = vrot.lane.b32.xlu1 %v5465_v31, %s8513_s25  ;;  %6380 = vrot.lane.b32.xlu0 %v5808_v9, %s8513_s25 }
 0x6ed   :  { %v12060_v36 = vpop.permute.xlu1 %6126  ;;  %v12062_v62 = vpop.permute.xlu0 %6172 }
 0x6ee   :  { %13881 = vst [vmem:[#allocation33_spill] sm:$0xff] %v12060_v36  ;;  %13882 = vst [vmem:[#allocation35_spill] sm:$0xff] %v12062_v62 }
 0x6ef   :  { %6370 = vrot.lane.b32.xlu1 %v5563_v55, %s8513_s25  ;;  %6384 = vrot.lane.b32.xlu0 %v5906_v42, %s8513_s25  ;;  %v5857_v42 = vcombine.high %v5853_v22, %v13859_v58 }
 0x6f1   :  { %v12068_v47 = vpop.permute.xlu1 %6130  ;;  %v12070_v27 = vpop.permute.xlu0 %6176 }
 0x6f2   :  { %13883 = vst [vmem:[#allocation38_spill] sm:$0xff] %v12068_v47 }
 0x6f3   :  { %6374 = vrot.lane.b32.xlu1 %v5661_v8, %s8513_s25  ;;  %v5955_v8 = vcombine.high %v5951_v37, %v13859_v58 }
 0x6f5   :  { %v12074_v31 = vpop.permute.xlu1 %6166  ;;  %v12076_v9 = vpop.permute.xlu0 %6180 }
 0x6f6   :  { %13884 = vst [vmem:[#allocation39_spill] sm:$0xff] %v12076_v9 }
 0x6f7   :  { %6378 = vrot.lane.b32.xlu1 %v5759_v54, %s8513_s25 }
 0x6f9   :  { %v12080_v28 = vpop.permute.xlu1 %6170  ;;  %v12082_v55 = vpop.permute.xlu0 %6184 }
 0x6fa   :  { %13885 = vst [vmem:[#allocation40_spill] sm:$0xff] %v12082_v55 }
 0x6fb   :  { %6382 = vrot.lane.b32.xlu1 %v5857_v42, %s8513_s25 }
 0x6fd   :  { %v12086_v47 = vpop.permute.xlu1 %6174  ;;  %v12088_v5 = vpop.permute.xlu0 %6188 }
 0x6fe   :  { %13886 = vst [vmem:[#allocation41_spill] sm:$0xff] %v12086_v47  ;;  %13887 = vst [vmem:[#allocation42_spill] sm:$0xff] %v12088_v5 }
 0x6ff   :  { %6386 = vrot.lane.b32.xlu1 %v5955_v8, %s8513_s25 }
 0x701   :  { %v12092_v9 = vpop.permute.xlu1 %6178  ;;  %v12094_v7 = vpop.permute.xlu0 %6192 }
 0x702   :  { %13888 = vst [vmem:[#allocation43_spill] sm:$0xff] %v12092_v9  ;;  %13889 = vst [vmem:[#allocation61_spill] sm:$0xff] %v12094_v7 }
 0x705   :  { %v12096_v54 = vpop.permute.xlu1 %6182  ;;  %v12098_v36 = vpop.permute.xlu0 %6228 }
 0x706   :  { %13890 = vst [vmem:[#allocation62_spill] sm:$0xff] %v12096_v54 }
 0x709   :  { %v12100_v55 = vpop.permute.xlu1 %6186  ;;  %v12102_v22 = vpop.permute.xlu0 %6232 }
 0x70a   :  { %13891 = vst [vmem:[#allocation63_spill] sm:$0xff] %v12100_v55 }
 0x70d   :  { %v12104_v42 = vpop.permute.xlu1 %6190  ;;  %v12106_v13 = vpop.permute.xlu0 %6236 }
 0x70e   :  { %13892 = vst [vmem:[#allocation64_spill] sm:$0xff] %v12104_v42  ;;  %13893 = vst [vmem:[#allocation65_spill] sm:$0xff] %v12106_v13 }
 0x711   :  { %v12108_v5 = vpop.permute.xlu1 %6194  ;;  %v12110_v37 = vpop.permute.xlu0 %6240 }
 0x712   :  { %13894 = vst [vmem:[#allocation66_spill] sm:$0xff] %v12108_v5  ;;  %13895 = vst [vmem:[#allocation67_spill] sm:$0xff] %v12110_v37 }
 0x715   :  { %v12112_v8 = vpop.permute.xlu1 %6230  ;;  %v12114_v58 = vpop.permute.xlu0 %6244 }
 0x716   :  { %13896 = vst [vmem:[#allocation88_spill] sm:$0xff] %v12114_v58 }
 0x719   :  { %v12116_v7 = vpop.permute.xlu1 %6234  ;;  %v12118_v54 = vpop.permute.xlu0 %6248 }
 0x71a   :  { %13897 = vst [vmem:[#allocation75_spill] sm:$0xff] %v12118_v54 }
 0x71d   :  { %v12120_v49 = vpop.permute.xlu1 %6238  ;;  %v12122_v55 = vpop.permute.xlu0 %6252 }
 0x71e   :  { %13898 = vst [vmem:[#allocation82_spill] sm:$0xff] %v12120_v49  ;;  %13899 = vst [vmem:[#allocation81_spill] sm:$0xff] %v12122_v55 }
 0x721   :  { %v12124_v30 = vpop.permute.xlu1 %6242  ;;  %v12126_v42 = vpop.permute.xlu0 %6256 }
 0x722   :  { %13900 = vst [vmem:[#allocation95_spill] sm:$0xff] %v12124_v30  ;;  %13901 = vst [vmem:[#allocation108_spill] sm:$0xff] %v12126_v42 }
 0x725   :  { %v12128_v9 = vpop.permute.xlu1 %6246  ;;  %v12130_v5 = vpop.permute.xlu0 %6292 }
 0x726   :  { %13902 = vst [vmem:[#allocation70_spill] sm:$0xff] %v12128_v9  ;;  %13903 = vst [vmem:[#allocation78_spill] sm:$0xff] %v12130_v5 }
 0x729   :  { %v12132_v47 = vpop.permute.xlu1 %6250  ;;  %v12134_v13 = vpop.permute.xlu0 %6296 }
 0x72a   :  { %13904 = vst [vmem:[#allocation93_spill] sm:$0xff] %v12132_v47 }
 0x72d   :  { %v12136_v58 = vpop.permute.xlu1 %6254  ;;  %v12138_v14 = vpop.permute.xlu0 %6300 }
 0x72e   :  { %13905 = vst [vmem:[#allocation103_spill] sm:$0xff] %v12136_v58  ;;  %13906 = vst [vmem:[#allocation96_spill] sm:$0xff] %v12138_v14 }
 0x731   :  { %v12140_v54 = vpop.permute.xlu1 %6258  ;;  %v12142_v49 = vpop.permute.xlu0 %6304 }
 0x732   :  { %13907 = vst [vmem:[#allocation105_spill] sm:$0xff] %v12140_v54  ;;  %13908 = vst [vmem:[#allocation85_spill] sm:$0xff] %v12142_v49 }
 0x735   :  { %v12144_v55 = vpop.permute.xlu1 %6294  ;;  %v12146_v30 = vpop.permute.xlu0 %6308 }
 0x736   :  { %13909 = vst [vmem:[#allocation101_spill] sm:$0xff] %v12146_v30  ;;  %v6404_v30 = vsel %vm552_vm0, %v11448_v25, %v11791_v2  ;;  %v6405_v25 = vsel %vm552_vm0, %v11509_v4, %v11845_v34  ;;  %v6409_v2 = vsel %vm552_vm0, %v11555_v43, %v11866_v18  ;;  %v6416_v4 = vsel %vm552_vm0, %v11558_v50, %v11868_v21 }
 0x737   :  { %v6415_v43 = vsel %vm552_vm0, %v11607_v11, %v11892_v59  ;;  %v13916_v11 = vld [vmem:[#allocation15_spill] sm:$0xff] }
 0x739   :  { %v12148_v42 = vpop.permute.xlu1 %6298  ;;  %v12150_v9 = vpop.permute.xlu0 %6312 }
 0x73a   :  { %13910 = vst [vmem:[#allocation86_spill] sm:$0xff] %v12150_v9  ;;  %v6406_v9 = vsel %vm552_vm0, %v11460_v0, %v11807_v44  ;;  %v6412_v0 = vsel %vm552_vm0, %v11513_v32, %v11847_v26  ;;  %v6411_v32 = vsel %vm552_vm0, %v11575_v15, %v11876_v12  ;;  %v6420_v44 = vsel %vm555_vm1, %v6404_v30, %v11886_v23  ;;  %v13915_v15 = vld [vmem:[#allocation14_spill] sm:$0xff]  ;;  %v13924_v30 = vld [vmem:[#allocation37_spill] sm:$0xff] }
 0x73b   :  { %v6422_v21 = vsel %vm555_vm1, %v6406_v9, %v11894_v60  ;;  %v6417_v12 = vsel %vm552_vm0, %v11621_v38, %v11902_v41  ;;  %v6425_v26 = vsel %vm555_vm1, %v6409_v2, %v11944_v35  ;;  %v13921_v41 = vld [vmem:[#allocation29_spill] sm:$0xff] }
 0x73c   :  { %v6438_v35 = vsel %vm558_vm2, %v6422_v21, %v13924_v30 }
 0x73d   :  { %v12152_v5 = vpop.permute.xlu1 %6302  ;;  %v12154_v47 = vpop.permute.xlu0 %6316 }
 0x73e   :  { %13911 = vst [vmem:[#allocation90_spill] sm:$0xff] %v12154_v47  ;;  %v6408_v47 = vsel %vm552_vm0, %v11474_v16, %v11820_v39  ;;  %v6407_v16 = vsel %vm552_vm0, %v11534_v3, %v11857_v20  ;;  %v6418_v3 = vsel %vm552_vm0, %v11578_v24, %v11878_v40  ;;  %v6421_v24 = vsel %vm555_vm1, %v6405_v25, %v13916_v11  ;;  %v13918_v20 = vld [vmem:[#allocation23_spill] sm:$0xff]  ;;  %v13926_v25 = vld [vmem:[#allocation21_spill] sm:$0xff] }
 0x73f   :  { %v6424_v50 = vsel %vm555_vm1, %v6408_v47, %v11904_v53  ;;  %v6428_v39 = vsel %vm555_vm1, %v6412_v0, %v11924_v17  ;;  %v6423_v38 = vsel %vm555_vm1, %v6407_v16, %v11932_v63  ;;  %v13920_v40 = vld [vmem:[#allocation27_spill] sm:$0xff]  ;;  %v13923_v17 = vld [vmem:[#allocation34_spill] sm:$0xff]  ;;  %v13925_v47 = vld [vmem:[#allocation32_spill] sm:$0xff] }
 0x740   :  { %v6434_v60 = vsel %vm555_vm1, %v6418_v3, %v13920_v40  ;;  %v6431_v63 = vsel %vm555_vm1, %v6415_v43, %v13923_v17  ;;  %v6433_v9 = vsel %vm555_vm1, %v6417_v12, %v13925_v47  ;;  %v6440_v0 = vsel %vm558_vm2, %v6424_v50, %v13926_v25  ;;  %v13927_v16 = vld [vmem:[#allocation16_spill] sm:$0xff] }
 0x741   :  { %v12156_v62 = vpop.permute.xlu1 %6306  ;;  %v12158_v58 = vpop.permute.xlu0 %6320  ;;  %v6441_v43 = vsel %vm558_vm2, %v6425_v26, %v12028_v51  ;;  %v6454_v12 = vsel %vm561_vm3, %v6438_v35, %v12054_v56  ;;  %v13934_v26 = vld [vmem:[#allocation24_spill] sm:$0xff] }
 0x742   :  { %13912 = vst [vmem:[#allocation79_spill] sm:$0xff] %v12158_v58  ;;  %v6410_v58 = vsel %vm552_vm0, %v11490_v29, %v11833_v48  ;;  %v6414_v29 = vsel %vm552_vm0, %v11538_v52, %v11859_v57  ;;  %v6413_v52 = vsel %vm552_vm0, %v11593_v10, %v11884_v6  ;;  %v6419_v6 = vsel %vm552_vm0, %v13915_v15, %v11912_v33  ;;  %v13917_v48 = vld [vmem:[#allocation18_spill] sm:$0xff]  ;;  %v13919_v57 = vld [vmem:[#allocation25_spill] sm:$0xff]  ;;  %v13922_v33 = vld [vmem:[#allocation31_spill] sm:$0xff] }
 0x743   :  { %v6426_v23 = vsel %vm555_vm1, %v6410_v58, %v11914_v45  ;;  %v6430_v34 = vsel %vm555_vm1, %v6414_v29, %v13917_v48  ;;  %v6432_v58 = vsel %vm555_vm1, %v6416_v4, %v13918_v20  ;;  %v6427_v18 = vsel %vm555_vm1, %v6411_v32, %v13919_v57  ;;  %v13928_v32 = vld [vmem:[#allocation17_spill] sm:$0xff]  ;;  %v13937_v17 = vld [vmem:[#allocation96_spill] sm:$0xff] }
 0x744   :  { %v6429_v53 = vsel %vm555_vm1, %v6413_v52, %v13921_v41  ;;  %v6436_v45 = vsel %vm558_vm2, %v6420_v44, %v13922_v33  ;;  %v6435_v29 = vsel %vm555_vm1, %v6419_v6, %v13927_v16  ;;  %v6442_v2 = vsel %vm558_vm2, %v6426_v23, %v12002_v61  ;;  %v13935_v57 = vld [vmem:[#allocation65_spill] sm:$0xff] }
 0x745   :  { %v12160_v14 = vpop.permute.xlu1 %6310  ;;  %v12162_v54 = vpop.permute.xlu0 %6356  ;;  %v6437_v3 = vsel %vm558_vm2, %v6421_v24, %v13928_v32  ;;  %v6444_v52 = vsel %vm558_vm2, %v6428_v39, %v12012_v19  ;;  %v6439_v44 = vsel %vm558_vm2, %v6423_v38, %v12020_v1  ;;  %v6452_v21 = vsel %vm561_vm3, %v6436_v45, %v12046_v46  ;;  %v13936_v33 = vld [vmem:[#allocation41_spill] sm:$0xff] }
 0x746   :  { %13913 = vst [vmem:[#allocation99_spill] sm:$0xff] %v12160_v14  ;;  %v6453_v61 = vsel %vm561_vm3, %v6437_v3, %v12074_v31  ;;  %v6455_v50 = vsel %vm561_vm3, %v6439_v44, %v12080_v28  ;;  %v6458_v19 = vsel %vm561_vm3, %v6442_v2, %v12070_v27  ;;  %v6470_v1 = vsel %vm564_vm4, %v6454_v12, %v12102_v22  ;;  %v13929_v22 = vld [vmem:[#allocation67_spill] sm:$0xff]  ;;  %v13941_v12 = vld [vmem:[#allocation22_spill] sm:$0xff] }
 0x747   :  { %v6469_v51 = vsel %vm564_vm4, %v6453_v61, %v12112_v8  ;;  %v6471_v46 = vsel %vm564_vm4, %v6455_v50, %v12116_v7  ;;  %v6468_v56 = vsel %vm564_vm4, %v6452_v21, %v12098_v36  ;;  %v6486_v31 = vsel %vm567_vm5, %v6470_v1, %v12134_v13  ;;  %v13930_v36 = vld [vmem:[#allocation35_spill] sm:$0xff]  ;;  %v13931_v13 = vld [vmem:[#allocation78_spill] sm:$0xff] }
 0x748   :  { %v6485_v28 = vsel %vm567_vm5, %v6469_v51, %v12144_v55  ;;  %v6487_v27 = vsel %vm567_vm5, %v6471_v46, %v12148_v42  ;;  %v6474_v23 = vsel %vm564_vm4, %v6458_v19, %v13929_v22  ;;  %v6456_v24 = vsel %vm561_vm3, %v6440_v0, %v13930_v36  ;;  %v13932_v55 = vld [vmem:[#allocation85_spill] sm:$0xff]  ;;  %v13933_v42 = vld [vmem:[#allocation11_spill] sm:$0xff]  ;;  %v13938_v0 = vld [vmem:[#allocation20_spill] sm:$0xff] }
 0x749   :  { %v12164_v49 = vpop.permute.xlu1 %6314  ;;  %v6361_v37 = vpop.permute.xlu0 %6360  ;;  %v6484_v39 = vsel %vm567_vm5, %v6468_v56, %v13931_v13  ;;  %v6490_v38 = vsel %vm567_vm5, %v6474_v23, %v13932_v55  ;;  %v6443_v20 = vsel %vm558_vm2, %v6427_v18, %v13934_v26  ;;  %v6457_v45 = vsel %vm561_vm3, %v6441_v43, %v13936_v33  ;;  %v13939_v2 = vld [vmem:[#allocation43_spill] sm:$0xff]  ;;  %v13942_v61 = vld [vmem:[#allocation26_spill] sm:$0xff] }
 0x74a   :  { %13914 = vst [vmem:[#allocation68_spill] sm:$0xff] %v12164_v49  ;;  %v6502_v8 = vsel %vm570_vm6, %v6486_v31, %v6361_v37  ;;  %v6472_v37 = vsel %vm564_vm4, %v6456_v24, %v13935_v57  ;;  %v6500_v40 = vsel %vm570_vm6, %v6484_v39, %v12162_v54  ;;  %v6446_v16 = vsel %vm558_vm2, %v6430_v34, %v13938_v0  ;;  %v13943_v19 = vld [vmem:[#allocation95_spill] sm:$0xff]  ;;  %v13947_v22 = vld [vmem:[#allocation38_spill] sm:$0xff] }
 0x74b   :  { %v6488_v30 = vsel %vm567_vm5, %v6472_v37, %v13937_v17  ;;  %v6527_v35 = vrot.slane %v6502_v8, %v13933_v42  ;;  %v6459_v54 = vsel %vm561_vm3, %v6443_v20, %v13939_v2  ;;  %v6519_v44 = vrot.slane %v6500_v40, %v13933_v42  ;;  %v13949_v13 = vld [vmem:[#allocation39_spill] sm:$0xff]  ;;  %v13953_v26 = vld [vmem:[#allocation62_spill] sm:$0xff]  ;;  %v13956_v17 = vld [vmem:[#allocation88_spill] sm:$0xff] }
 0x74c   :  { %v6448_v34 = vsel %vm558_vm2, %v6432_v58, %v13941_v12  ;;  %v6450_v50 = vsel %vm558_vm2, %v6434_v60, %v13942_v61  ;;  %v6475_v1 = vsel %vm564_vm4, %v6459_v54, %v13943_v19  ;;  %v6451_v23 = vsel %vm558_vm2, %v6435_v29, %v13947_v22  ;;  %v13952_v29 = vld [vmem:[#allocation61_spill] sm:$0xff]  ;;  %v13954_v57 = vld [vmem:[#allocation63_spill] sm:$0xff] }
 0x74d   :  { %v12178_v14 = vpop.permute.xlu1 %6318  ;;  %v12180_v49 = vpop.permute.xlu0 %6364  ;;  %v6580_v56 = vcombine.low %v6519_v44, %v6527_v35  ;;  %v6460_v39 = vsel %vm561_vm3, %v6444_v52, %v13949_v13  ;;  %v13955_v52 = vld [vmem:[#allocation64_spill] sm:$0xff]  ;;  %v13957_v35 = vld [vmem:[#allocation75_spill] sm:$0xff]  ;;  %v13961_v44 = vld [vmem:[#allocation93_spill] sm:$0xff] }
 0x74e   :  { %v6504_v32 = vsel %vm570_vm6, %v6488_v30, %v12180_v49  ;;  %v13944_v49 = vld [vmem:[#allocation28_spill] sm:$0xff]  ;;  %v6476_v30 = vsel %vm564_vm4, %v6460_v39, %v13956_v17  ;;  %v13969_v39 = vld [vmem:[#allocation90_spill] sm:$0xff] }
 0x74f   :  { %v6445_v46 = vsel %vm558_vm2, %v6429_v53, %v13944_v49  ;;  %v6535_v31 = vrot.slane %v6504_v32, %v13933_v42  ;;  %v13948_v53 = vld [vmem:[#allocation12_spill] sm:$0xff]  ;;  %v13960_v32 = vld [vmem:[#allocation70_spill] sm:$0xff] }
 0x750   :  { %v6461_v20 = vsel %vm561_vm3, %v6445_v46, %v13953_v26  ;;  %v6587_v40 = vrot.slane %v6580_v56, %v13948_v53  ;;  %v13970_v26 = vld [vmem:[#allocation66_spill] sm:$0xff] }
 0x751   :  { %v12226_v10 = vpop.permute.xlu1 %6322  ;;  %v6369_v59 = vpop.permute.xlu0 %6368 }
 0x752   :  { %v6506_v41 = vsel %vm570_vm6, %v6490_v38, %v6369_v59 }
 0x753   :  { %v6543_v43 = vrot.slane %v6506_v41, %v13933_v42 }
 0x755   :  { %v6359_v4 = vpop.permute.xlu1 %6358  ;;  %v12276_v15 = vpop.permute.xlu0 %6372 }
 0x756   :  { %v6501_v7 = vsel %vm570_vm6, %v6485_v28, %v6359_v4  ;;  %v13940_v4 = vld [vmem:[#allocation82_spill] sm:$0xff] }
 0x757   :  { %v6523_v47 = vrot.slane %v6501_v7, %v13933_v42  ;;  %v6473_v59 = vsel %vm564_vm4, %v6457_v45, %v13940_v4  ;;  %v6596_v7 = vcombine.low %v6535_v31, %v6543_v43  ;;  %v13966_v31 = vld [vmem:[#allocation79_spill] sm:$0xff] }
 0x758   :  { %v6489_v3 = vsel %vm567_vm5, %v6473_v59, %v12152_v5  ;;  %v6491_v5 = vsel %vm567_vm5, %v6475_v1, %v12156_v62  ;;  %v13965_v1 = vld [vmem:[#allocation68_spill] sm:$0xff] }
 0x759   :  { %v6363_v6 = vpop.permute.xlu1 %6362  ;;  %v6377_v25 = vpop.permute.xlu0 %6376  ;;  %v6603_v54 = vrot.slane %v6596_v7, %v13948_v53 }
 0x75a   :  { %v6503_v11 = vsel %vm570_vm6, %v6487_v27, %v6363_v6  ;;  %v13945_v27 = vld [vmem:[#allocation30_spill] sm:$0xff]  ;;  %v13946_v6 = vld [vmem:[#allocation33_spill] sm:$0xff] }
 0x75b   :  { %v6531_v48 = vrot.slane %v6503_v11, %v13933_v42  ;;  %v6447_v58 = vsel %vm558_vm2, %v6431_v63, %v13945_v27  ;;  %v6449_v60 = vsel %vm558_vm2, %v6433_v9, %v13946_v6  ;;  %v13950_v63 = vld [vmem:[#allocation40_spill] sm:$0xff]  ;;  %v13951_v9 = vld [vmem:[#allocation42_spill] sm:$0xff] }
 0x75c   :  { %v6462_v55 = vsel %vm561_vm3, %v6446_v16, %v13950_v63  ;;  %v6464_v38 = vsel %vm561_vm3, %v6448_v34, %v13951_v9  ;;  %v6463_v37 = vsel %vm561_vm3, %v6447_v58, %v13954_v57  ;;  %v6465_v45 = vsel %vm561_vm3, %v6449_v60, %v13955_v52  ;;  %v13959_v16 = vld [vmem:[#allocation108_spill] sm:$0xff]  ;;  %v13963_v34 = vld [vmem:[#allocation86_spill] sm:$0xff] }
 0x75d   :  { %v6367_v18 = vpop.permute.xlu1 %6366  ;;  %v6588_v21 = vcombine.low %v6523_v47, %v6531_v48  ;;  %v6381_v36 = vpop.permute.xlu0 %6380  ;;  %v6466_v48 = vsel %vm561_vm3, %v6450_v50, %v13952_v29  ;;  %v6478_v47 = vsel %vm564_vm4, %v6462_v55, %v13957_v35  ;;  %v6479_v43 = vsel %vm564_vm4, %v6463_v37, %v13961_v44  ;;  %v13964_v50 = vld [vmem:[#allocation99_spill] sm:$0xff] }
 0x75e   :  { %v6505_v51 = vsel %vm570_vm6, %v6489_v3, %v6367_v18  ;;  %v13958_v18 = vld [vmem:[#allocation81_spill] sm:$0xff]  ;;  %v6482_v2 = vsel %vm564_vm4, %v6466_v48, %v13959_v16  ;;  %v6477_v3 = vsel %vm564_vm4, %v6461_v20, %v13960_v32  ;;  %v6494_v61 = vsel %vm567_vm5, %v6478_v47, %v13963_v34  ;;  %v13972_v34 = vld [vmem:[#allocation44_spill] sm:$0xff] }
 0x75f   :  { %v6595_v11 = vrot.slane %v6588_v21, %v13948_v53  ;;  %v6539_v62 = vrot.slane %v6505_v51, %v13933_v42  ;;  %v6480_v0 = vsel %vm564_vm4, %v6464_v38, %v13958_v18  ;;  %v13962_v21 = vld [vmem:[#allocation101_spill] sm:$0xff]  ;;  %v6493_v19 = vsel %vm567_vm5, %v6477_v3, %v13964_v50 }
 0x760   :  { %v6492_v12 = vsel %vm567_vm5, %v6476_v30, %v13962_v21  ;;  %v6495_v51 = vsel %vm567_vm5, %v6479_v43, %v13965_v1  ;;  %v6510_v27 = vsel %vm570_vm6, %v6494_v61, %v6377_v25  ;;  %v6496_v63 = vsel %vm567_vm5, %v6480_v0, %v13969_v39  ;;  %v13985_v39 = vld [vmem:[#allocation57_spill] sm:$0xff] }
 0x761   :  { %v6371_v28 = vpop.permute.xlu1 %6370  ;;  %v6612_v4 = vcombine.low %v6587_v40, %v6595_v11  ;;  %v6613_v60 = vcombine.high %v6587_v40, %v6595_v11  ;;  %v6508_v25 = vsel %vm570_vm6, %v6492_v12, %v12276_v15  ;;  %v6559_v11 = vrot.slane %v6510_v27, %v13933_v42  ;;  %v13976_v27 = vld [vmem:[#allocation49_spill] sm:$0xff] }
 0x762   :  { %v6507_v8 = vsel %vm570_vm6, %v6491_v5, %v6371_v28  ;;  %v6385_v5 = vpop.permute.xlu0 %6384  ;;  %v6498_v28 = vsel %vm567_vm5, %v6482_v2, %v13966_v31  ;;  %v6467_v20 = vsel %vm561_vm3, %v6451_v23, %v13970_v26  ;;  %v6512_v15 = vsel %vm570_vm6, %v6496_v63, %v6381_v36  ;;  %v13986_v63 = vld [vmem:[#allocation58_spill] sm:$0xff]  ;;  %v13988_v26 = vld [vmem:[#allocation60_spill] sm:$0xff] }
 0x763   :  { %v6547_v24 = vrot.slane %v6507_v8, %v13933_v42  ;;  %v13967_v8 = vld [vmem:[#allocation13_spill] sm:$0xff]  ;;  %v6514_v55 = vsel %vm570_vm6, %v6498_v28, %v6385_v5  ;;  %v6551_v40 = vrot.slane %v6508_v25, %v13933_v42  ;;  %v6567_v30 = vrot.slane %v6512_v15, %v13933_v42  ;;  %v13975_v28 = vld [vmem:[#allocation47_spill] sm:$0xff] }
 0x764   :  { %v12397_v7 = vrot.slane %v6612_v4, %v13967_v8  ;;  %v6627_v52 = vrot.slane %v6613_v60, %v13967_v8  ;;  %v13979_v60 = vld [vmem:[#allocation50_spill] sm:$0xff]  ;;  %v13987_v25 = vld [vmem:[#allocation59_spill] sm:$0xff] }
 0x765   :  { %v6604_v41 = vcombine.low %v6539_v62, %v6547_v24  ;;  %v6375_v33 = vpop.permute.xlu1 %6374  ;;  %v13968_v24 = vld [vmem:[#allocation103_spill] sm:$0xff]  ;;  %v6648_v36 = vcombine.low %v6551_v40, %v6559_v11 }
 0x766   :  { %v6509_v58 = vsel %vm570_vm6, %v6493_v19, %v6375_v33  ;;  %v6481_v13 = vsel %vm564_vm4, %v6465_v45, %v13968_v24  ;;  %v13971_v45 = vld [vmem:[#allocation105_spill] sm:$0xff]  ;;  %v13983_v24 = vld [vmem:[#allocation54_spill] sm:$0xff] }
 0x767   :  { %v6611_v59 = vrot.slane %v6604_v41, %v13948_v53  ;;  %v6555_v9 = vrot.slane %v6509_v58, %v13933_v42  ;;  %v6497_v57 = vsel %vm567_vm5, %v6481_v13, %v12178_v14  ;;  %v6575_v41 = vrot.slane %v6514_v55, %v13933_v42  ;;  %v13977_v58 = vld [vmem:[#allocation48_spill] sm:$0xff] }
 0x768   :  { %v6483_v23 = vsel %vm564_vm4, %v6467_v20, %v13971_v45  ;;  %v6655_v4 = vrot.slane %v6648_v36, %v13948_v53  ;;  %v13984_v13 = vld [vmem:[#allocation56_spill] sm:$0xff] }
 0x769   :  { %v6628_v49 = vcombine.low %v6603_v54, %v6611_v59  ;;  %v6629_v46 = vcombine.high %v6603_v54, %v6611_v59  ;;  %v6379_v56 = vpop.permute.xlu1 %6378  ;;  %v6499_v14 = vsel %vm567_vm5, %v6483_v23, %v12226_v10  ;;  %v6664_v0 = vcombine.low %v6567_v30, %v6575_v41 }
 0x76a   :  { %v6511_v6 = vsel %vm570_vm6, %v6495_v51, %v6379_v56  ;;  %v13974_v56 = vld [vmem:[#allocation46_spill] sm:$0xff] }
 0x76b   :  { %v6563_v22 = vrot.slane %v6511_v6, %v13933_v42  ;;  %v12400_v62 = vrot.slane %v6628_v49, %v13967_v8  ;;  %v6643_v48 = vrot.slane %v6629_v46, %v13967_v8  ;;  %v6671_v32 = vrot.slane %v6664_v0, %v13948_v53  ;;  %v13973_v49 = vld [vmem:[#allocation45_spill] sm:$0xff]  ;;  %v13978_v6 = vld [vmem:[#allocation51_spill] sm:$0xff] }
 0x76d   :  { %v6383_v38 = vpop.permute.xlu1 %6382  ;;  %v6645_v29 = vcombine.high %v12397_v7, %v12400_v62  ;;  %v6644_v37 = vcombine.low %v12397_v7, %v12400_v62  ;;  %v6656_v33 = vcombine.low %v6555_v9, %v6563_v22  ;;  %v6646_v47 = vcombine.low %v6627_v52, %v6643_v48  ;;  %v13980_v22 = vld [vmem:[#allocation53_spill] sm:$0xff]  ;;  %v13981_v7 = vld [vmem:[#allocation52_spill] sm:$0xff]  ;;  %v13982_v62 = vld [vmem:[#allocation55_spill] sm:$0xff] }
 0x76e   :  { %v6513_v17 = vsel %vm570_vm6, %v6497_v57, %v6383_v38  ;;  %v6647_v10 = vcombine.high %v6627_v52, %v6643_v48  ;;  %v13989_v52 = vmov 0.0  }
 0x76f   :  { %6718 = vrot.lane.b32.xlu0 %v6645_v29, %s8517_s28  ;;  %v6663_v16 = vrot.slane %v6656_v33, %v13948_v53  ;;  %v6571_v2 = vrot.slane %v6513_v17, %v13933_v42 }
 0x771   :  { %v6387_v35 = vpop.permute.xlu1 %6386  ;;  %v6680_v3 = vcombine.low %v6655_v4, %v6663_v16  ;;  %v6681_v12 = vcombine.high %v6655_v4, %v6663_v16  ;;  %v13990_v4 = vld [vmem:[#allocation36_spill] sm:$0xff] }
 0x772   :  { %v6515_v18 = vsel %vm570_vm6, %v6499_v14, %v6387_v35 }
 0x773   :  { %v6579_v54 = vrot.slane %v6515_v18, %v13933_v42  ;;  %6726 = vrot.lane.b32.xlu0 %v6646_v47, %s8518_s29  ;;  %v6688_v61 = vrot.slane %v6680_v3, %v13967_v8  ;;  %v6695_v46 = vrot.slane %v6681_v12, %v13967_v8 }
 0x775   :  { %v6672_v59 = vcombine.low %v6571_v2, %v6579_v54 }
 0x777   :  { %v6679_v44 = vrot.slane %v6672_v59, %v13948_v53  ;;  %6734 = vrot.lane.b32.xlu0 %v6647_v10, %s8519_s30 }
 0x779   :  { %v6696_v43 = vcombine.low %v6671_v32, %v6679_v44  ;;  %v6697_v21 = vcombine.high %v6671_v32, %v6679_v44 }
 0x77b   :  { %6752 = vbcast.lane.b32.xlu0 %v13972_v34, 280  ;;  %v6704_v50 = vrot.slane %v6696_v43, %v13967_v8  ;;  %v6711_v1 = vrot.slane %v6697_v21, %v13967_v8 }
 0x77d   :  { %v6713_v19 = vcombine.high %v6688_v61, %v6704_v50  ;;  %v6712_v51 = vcombine.low %v6688_v61, %v6704_v50  ;;  %v6714_v5 = vcombine.low %v6695_v46, %v6711_v1  ;;  %v6715_v31 = vcombine.high %v6695_v46, %v6711_v1 }
 0x77f   :  { %6760 = vbcast.lane.b32.xlu0 %v13973_v49, 280  ;;  %6720 = vrot.lane.b32.xlu1 %v6713_v19, %s8517_s28 }
 0x783   :  { %6768 = vbcast.lane.b32.xlu0 %v13974_v56, 280  ;;  %6728 = vrot.lane.b32.xlu1 %v6714_v5, %s8518_s29 }
 0x787   :  { %6776 = vbcast.lane.b32.xlu0 %v13975_v28, 280  ;;  %6736 = vrot.lane.b32.xlu1 %v6715_v31, %s8519_s30 }
 0x78b   :  { %6784 = vbcast.lane.b32.xlu0 %v13976_v27, 280  ;;  %6756 = vbcast.lane.b32.xlu1 %v13977_v58, 280 }
 0x78f   :  { %6792 = vbcast.lane.b32.xlu0 %v13978_v6, 280  ;;  %6764 = vbcast.lane.b32.xlu1 %v13979_v60, 280 }
 0x793   :  { %6800 = vbcast.lane.b32.xlu0 %v13980_v22, 280  ;;  %6772 = vbcast.lane.b32.xlu1 %v13981_v7, 280 }
 0x797   :  { %6808 = vbcast.lane.b32.xlu0 %v13982_v62, 280  ;;  %6780 = vbcast.lane.b32.xlu1 %v13983_v24, 280 }
 0x79b   :  { %6788 = vbcast.lane.b32.xlu1 %v13984_v13, 280 }
 0x79f   :  { %6796 = vbcast.lane.b32.xlu1 %v13985_v39, 280 }
 0x7a3   :  { %6804 = vbcast.lane.b32.xlu1 %v13986_v63, 280 }
 0x7a7   :  { %6812 = vbcast.lane.b32.xlu1 %v13987_v25, 280 }
 0x7e1   :  { %v6719_v55 = vpop.permute.xlu0 %6718 }
 0x7e2   :  { %v6740_v9 = vsel %vm1767_vm7, %v6644_v37, %v6719_v55 }
 0x7e5   :  { %v6727_v11 = vpop.permute.xlu0 %6726 }
 0x7e6   :  { %v6742_v38 = vsel %vm1770_vm8, %v6740_v9, %v6727_v11 }
 0x7e9   :  { %v6735_v29 = vpop.permute.xlu0 %6734 }
 0x7ea   :  { %v6744_v48 = vsel %vm1773_vm9, %v6742_v38, %v6735_v29 }
 0x7eb   :  { %v6746_v20 = vmul.f32 %v6744_v48, %v13988_v26 }
 0x7ed   :  { %6748 = vst [vmem:[#allocation7 + $0x10] sm:$0xff] %v6746_v20  ;;  %v12467_v57 = vpop.permute.xlu0 %6752 }
 0x7ee   :  { %v12471_v15 = vrot.slane %v12467_v57, %v13948_v53 }
 0x7f0   :  { %v12475_v40 = vrot.slane %v12471_v15, %v13967_v8  ;;  %v6829_v48 = vcombine.high %v12471_v15, %v13989_v52 }
 0x7f1   :  { %v6721_v41 = vpop.permute.xlu1 %6720  ;;  %v12477_v37 = vpop.permute.xlu0 %6760 }
 0x7f2   :  { %v12481_v33 = vrot.slane %v12477_v37, %v13948_v53  ;;  %v6859_v45 = vcombine.high %v12475_v40, %v13989_v52  ;;  %v6741_v35 = vsel %vm1767_vm7, %v6712_v51, %v6721_v41 }
 0x7f4   :  { %v12487_v23 = vrot.slane %v12481_v33, %v13967_v8  ;;  %7614 = vrot.lane.b32.xlu0 %v6859_v45, %s8508_s1  ;;  %v6927_v15 = vcombine.high %v12481_v33, %v13989_v52 }
 0x7f5   :  { %v6729_v17 = vpop.permute.xlu1 %6728  ;;  %v12490_v14 = vpop.permute.xlu0 %6768 }
 0x7f6   :  { %v12494_v36 = vrot.slane %v12490_v14, %v13948_v53  ;;  %v6957_v30 = vcombine.high %v12487_v23, %v13989_v52  ;;  %v6743_v18 = vsel %vm1770_vm8, %v6741_v35, %v6729_v17  ;;  %v6843_v35 = vrot.slane %v6829_v48, %v13967_v8 }
 0x7f8   :  { %v12501_v47 = vrot.slane %v12494_v36, %v13967_v8  ;;  %7618 = vrot.lane.b32.xlu0 %v6957_v30, %s8508_s1  ;;  %v7025_v33 = vcombine.high %v12494_v36, %v13989_v52 }
 0x7f9   :  { %v6737_v0 = vpop.permute.xlu1 %6736  ;;  %v12505_v16 = vpop.permute.xlu0 %6776 }
 0x7fa   :  { %v6745_v2 = vsel %vm1773_vm9, %v6743_v18, %v6737_v0  ;;  %v12510_v54 = vrot.slane %v12505_v16, %v13948_v53  ;;  %v7055_v10 = vcombine.high %v12501_v47, %v13989_v52 }
 0x7fb   :  { %v6747_v59 = vmul.f32 %v6745_v2, %v13990_v4 }
 0x7fc   :  { %v12517_v32 = vrot.slane %v12510_v54, %v13967_v8  ;;  %7622 = vrot.lane.b32.xlu0 %v7055_v10, %s8508_s1  ;;  %v6941_v10 = vrot.slane %v6927_v15, %v13967_v8  ;;  %v7123_v36 = vcombine.high %v12510_v54, %v13989_v52 }
 0x7fd   :  { %6749 = vst [vmem:[#allocation7 + $0x30] sm:$0xff] %v6747_v59  ;;  %v12520_v3 = vpop.permute.xlu1 %6756  ;;  %v12522_v44 = vpop.permute.xlu0 %6784 }
 0x7fe   :  { %v12526_v43 = vrot.slane %v12520_v3, %v13948_v53  ;;  %v12530_v21 = vrot.slane %v12522_v44, %v13948_v53  ;;  %v7153_v12 = vcombine.high %v12517_v32, %v13989_v52  ;;  %v7137_v54 = vrot.slane %v7123_v36, %v13967_v8 }
 0x800   :  { %v12536_v34 = vrot.slane %v12526_v43, %v13967_v8  ;;  %v12540_v61 = vrot.slane %v12530_v21, %v13967_v8  ;;  %7626 = vrot.lane.b32.xlu0 %v7153_v12, %s8508_s1  ;;  %v7221_v48 = vcombine.high %v12530_v21, %v13989_v52 }
 0x801   :  { %v12543_v50 = vpop.permute.xlu1 %6764  ;;  %v12545_v19 = vpop.permute.xlu0 %6792 }
 0x802   :  { %13991 = vst [vmem:[#allocation91_spill] sm:$0xff] %v12536_v34  ;;  %v12549_v1 = vrot.slane %v12543_v50, %v13948_v53  ;;  %v12553_v51 = vrot.slane %v12545_v19, %v13948_v53  ;;  %v6908_v49 = vcombine.high %v12536_v34, %v13989_v52  ;;  %v7251_v46 = vcombine.high %v12540_v61, %v13989_v52 }
 0x804   :  { %v12561_v5 = vrot.slane %v12549_v1, %v13967_v8  ;;  %v12565_v56 = vrot.slane %v12553_v51, %v13967_v8  ;;  %7616 = vrot.lane.b32.xlu1 %v6908_v49, %s8508_s1  ;;  %7630 = vrot.lane.b32.xlu0 %v7251_v46, %s8508_s1 }
 0x805   :  { %v12569_v31 = vpop.permute.xlu1 %6772  ;;  %v12571_v28 = vpop.permute.xlu0 %6800 }
 0x806   :  { %13992 = vst [vmem:[#allocation69_spill] sm:$0xff] %v12561_v5  ;;  %v7066_v27 = vrot.slane %v12569_v31, %v13948_v53  ;;  %v7409_v58 = vrot.slane %v12571_v28, %v13948_v53  ;;  %v7006_v6 = vcombine.high %v12561_v5, %v13989_v52  ;;  %v7349_v60 = vcombine.high %v12565_v56, %v13989_v52 }
 0x808   :  { %v12582_v22 = vrot.slane %v7066_v27, %v13967_v8  ;;  %v12585_v7 = vrot.slane %v7409_v58, %v13967_v8  ;;  %7620 = vrot.lane.b32.xlu1 %v7006_v6, %s8508_s1  ;;  %7634 = vrot.lane.b32.xlu0 %v7349_v60, %s8508_s1  ;;  %v7039_v60 = vrot.slane %v7025_v33, %v13967_v8 }
 0x809   :  { %v12589_v62 = vpop.permute.xlu1 %6780  ;;  %v12591_v24 = vpop.permute.xlu0 %6808  ;;  %v7417_v21 = vcombine.high %v7409_v58, %v13989_v52 }
 0x80a   :  { %v7164_v13 = vrot.slane %v12589_v62, %v13948_v53  ;;  %v7507_v39 = vrot.slane %v12591_v24, %v13948_v53  ;;  %v7104_v63 = vcombine.high %v12582_v22, %v13989_v52  ;;  %v7447_v25 = vcombine.high %v12585_v7, %v13989_v52 }
 0x80c   :  { %v12602_v55 = vrot.slane %v7164_v13, %v13967_v8  ;;  %v12605_v11 = vrot.slane %v7507_v39, %v13967_v8  ;;  %7624 = vrot.lane.b32.xlu1 %v7104_v63, %s8508_s1  ;;  %7638 = vrot.lane.b32.xlu0 %v7447_v25, %s8508_s1 }
 0x80d   :  { %v12609_v9 = vpop.permute.xlu1 %6788 }
 0x80e   :  { %v7262_v38 = vrot.slane %v12609_v9, %v13948_v53  ;;  %v7202_v29 = vcombine.high %v12602_v55, %v13989_v52  ;;  %v7545_v20 = vcombine.high %v12605_v11, %v13989_v52 }
 0x810   :  { %v12620_v41 = vrot.slane %v7262_v38, %v13967_v8  ;;  %7628 = vrot.lane.b32.xlu1 %v7202_v29, %s8508_s1  ;;  %7642 = vrot.lane.b32.xlu0 %v7545_v20, %s8508_s1  ;;  %v6878_v29 = vcombine.high %v12526_v43, %v13989_v52  ;;  %v6976_v20 = vcombine.high %v12549_v1, %v13989_v52 }
 0x811   :  { %v12624_v45 = vpop.permute.xlu1 %6796  ;;  %v7074_v43 = vcombine.high %v7066_v27, %v13989_v52  ;;  %v7172_v1 = vcombine.high %v7164_v13, %v13989_v52  ;;  %v7270_v27 = vcombine.high %v7262_v38, %v13989_v52 }
 0x812   :  { %v7360_v17 = vrot.slane %v12624_v45, %v13948_v53  ;;  %v7300_v30 = vcombine.high %v12620_v41, %v13989_v52  ;;  %v6892_v15 = vrot.slane %v6878_v29, %v13967_v8  ;;  %v6990_v33 = vrot.slane %v6976_v20, %v13967_v8 }
 0x813   :  { %v7088_v36 = vrot.slane %v7074_v43, %v13967_v8  ;;  %v7186_v58 = vrot.slane %v7172_v1, %v13967_v8  ;;  %v6958_v20 = vcombine.high %v6941_v10, %v13989_v52 }
 0x814   :  { %v12634_v18 = vrot.slane %v7360_v17, %v13967_v8  ;;  %7632 = vrot.lane.b32.xlu1 %v7300_v30, %s8508_s1  ;;  %7678 = vrot.lane.b32.xlu0 %v6843_v35, %s8502_s13  ;;  %v7319_v30 = vcombine.high %v12553_v51, %v13989_v52  ;;  %v7515_v51 = vcombine.high %v7507_v39, %v13989_v52 }
 0x815   :  { %v12638_v0 = vpop.permute.xlu1 %6804  ;;  %v7368_v13 = vcombine.high %v7360_v17, %v13989_v52  ;;  %v6860_v39 = vcombine.high %v6843_v35, %v13989_v52  ;;  %v7056_v35 = vcombine.high %v7039_v60, %v13989_v52 }
 0x816   :  { %v7458_v2 = vrot.slane %v12638_v0, %v13948_v53  ;;  %v7398_v59 = vcombine.high %v12634_v18, %v13989_v52  ;;  %v7529_v29 = vrot.slane %v7515_v51, %v13967_v8  ;;  %v7105_v51 = vcombine.high %v7088_v36, %v13989_v52 }
 0x818   :  { %v12648_v12 = vrot.slane %v7458_v2, %v13967_v8  ;;  %7636 = vrot.lane.b32.xlu1 %v7398_v59, %s8508_s1  ;;  %7682 = vrot.lane.b32.xlu0 %v6941_v10, %s8502_s13  ;;  %v7235_v59 = vrot.slane %v7221_v48, %v13967_v8  ;;  %v7284_v48 = vrot.slane %v7270_v27, %v13967_v8 }
 0x819   :  { %v12652_v49 = vpop.permute.xlu1 %6812  ;;  %v7466_v38 = vcombine.high %v7458_v2, %v13989_v52  ;;  %v7154_v2 = vcombine.high %v7137_v54, %v13989_v52  ;;  %v7546_v27 = vcombine.high %v7529_v29, %v13989_v52 }
 0x81a   :  { %13993 = vst [vmem:[#allocation71_spill] sm:$0xff] %v12648_v12  ;;  %v7556_v46 = vrot.slane %v12652_v49, %v13948_v53  ;;  %v7496_v6 = vcombine.high %v12648_v12, %v13989_v52 }
 0x81b   :  { %v7480_v43 = vrot.slane %v7466_v38, %v13967_v8 }
 0x81c   :  { %v12662_v63 = vrot.slane %v7556_v46, %v13967_v8  ;;  %7640 = vrot.lane.b32.xlu1 %v7496_v6, %s8508_s1  ;;  %7686 = vrot.lane.b32.xlu0 %v7039_v60, %s8502_s13  ;;  %v7333_v6 = vrot.slane %v7319_v30, %v13967_v8  ;;  %v7382_v30 = vrot.slane %v7368_v13, %v13967_v8 }
 0x81d   :  { %v7564_v17 = vcombine.high %v7556_v46, %v13989_v52  ;;  %v7252_v46 = vcombine.high %v7235_v59, %v13989_v52  ;;  %v7007_v60 = vcombine.high %v6990_v33, %v13989_v52  ;;  %v7497_v38 = vcombine.high %v7480_v43, %v13989_v52 }
 0x81e   :  { %13994 = vst [vmem:[#allocation72_spill] sm:$0xff] %v12662_v63  ;;  %v7594_v25 = vcombine.high %v12662_v63, %v13989_v52  ;;  %v7350_v1 = vcombine.high %v7333_v6, %v13989_v52 }
 0x81f   :  { %v7578_v10 = vrot.slane %v7564_v17, %v13967_v8 }
 0x820   :  { %7644 = vrot.lane.b32.xlu1 %v7594_v25, %s8508_s1  ;;  %7690 = vrot.lane.b32.xlu0 %v7137_v54, %s8502_s13  ;;  %v7431_v25 = vrot.slane %v7417_v21, %v13967_v8  ;;  %v6909_v21 = vcombine.high %v6892_v15, %v13989_v52  ;;  %v6814_v54 = vcombine.high %v12467_v57, %v13989_v52 }
 0x824   :  { %7680 = vrot.lane.b32.xlu1 %v6892_v15, %s8502_s13  ;;  %7694 = vrot.lane.b32.xlu0 %v7235_v59, %s8502_s13  ;;  %v7448_v15 = vcombine.high %v7431_v25, %v13989_v52  ;;  %v12734_v59 = vrot.slane %v6814_v54, %v13948_v53 }
 0x826   :  { %v6851_v13 = vrot.slane %v12734_v59, %v13967_v8 }
 0x828   :  { %7684 = vrot.lane.b32.xlu1 %v6990_v33, %s8502_s13  ;;  %7698 = vrot.lane.b32.xlu0 %v7333_v6, %s8502_s13  ;;  %v6912_v33 = vcombine.high %v12477_v37, %v13989_v52  ;;  %v7203_v6 = vcombine.high %v7186_v58, %v13989_v52  ;;  %v7108_v37 = vcombine.high %v12505_v16, %v13989_v52 }
 0x829   :  { %v7206_v16 = vcombine.high %v12522_v44, %v13989_v52 }
 0x82a   :  { %v12743_v57 = vrot.slane %v6912_v33, %v13948_v53 }
 0x82b   :  { %v12784_v44 = vrot.slane %v7206_v16, %v13948_v53 }
 0x82c   :  { %7688 = vrot.lane.b32.xlu1 %v7088_v36, %s8502_s13  ;;  %7702 = vrot.lane.b32.xlu0 %v7431_v25, %s8502_s13  ;;  %v7010_v36 = vcombine.high %v12490_v14, %v13989_v52  ;;  %v7301_v25 = vcombine.high %v7284_v48, %v13989_v52  ;;  %v6949_v14 = vrot.slane %v12743_v57, %v13967_v8 }
 0x830   :  { %7692 = vrot.lane.b32.xlu1 %v7186_v58, %s8502_s13  ;;  %7706 = vrot.lane.b32.xlu0 %v7529_v29, %s8502_s13  ;;  %v12755_v58 = vrot.slane %v7010_v36, %v13948_v53  ;;  %v7399_v29 = vcombine.high %v7382_v30, %v13989_v52 }
 0x834   :  { %7696 = vrot.lane.b32.xlu1 %v7284_v48, %s8502_s13  ;;  %7742 = vrot.lane.b32.xlu0 %v6860_v39, %s8509_s21  ;;  %v12763_v39 = vrot.slane %v7108_v37, %v13948_v53  ;;  %v6863_v48 = vcombine.high %v12520_v3, %v13989_v52  ;;  %v7353_v37 = vcombine.high %v12624_v45, %v13989_v52 }
 0x836   :  { %v12778_v17 = vrot.slane %v12763_v39, %v13967_v8  ;;  %v12781_v3 = vrot.slane %v6863_v48, %v13948_v53  ;;  %v12856_v16 = vrot.slane %v7353_v37, %v13948_v53 }
 0x838   :  { %7700 = vrot.lane.b32.xlu1 %v7382_v30, %s8502_s13  ;;  %7746 = vrot.lane.b32.xlu0 %v6958_v20, %s8509_s21  ;;  %v7047_v20 = vrot.slane %v12755_v58, %v13967_v8  ;;  %v6961_v30 = vcombine.high %v12543_v50, %v13989_v52 }
 0x83a   :  { %v12793_v50 = vrot.slane %v6961_v30, %v13948_v53 }
 0x83c   :  { %7704 = vrot.lane.b32.xlu1 %v7480_v43, %s8502_s13  ;;  %7750 = vrot.lane.b32.xlu0 %v7056_v35, %s8509_s21  ;;  %v7304_v35 = vcombine.high %v12545_v19, %v13989_v52  ;;  %v7595_v43 = vcombine.high %v7578_v10, %v13989_v52  ;;  %v6900_v19 = vrot.slane %v12781_v3, %v13967_v8 }
 0x840   :  { %7708 = vrot.lane.b32.xlu1 %v7578_v10, %s8502_s13  ;;  %7754 = vrot.lane.b32.xlu0 %v7154_v2, %s8509_s21  ;;  %v7059_v2 = vcombine.high %v12569_v31, %v13989_v52  ;;  %v7243_v10 = vrot.slane %v12784_v44, %v13967_v8  ;;  %v7157_v31 = vcombine.high %v12589_v62, %v13989_v52 }
 0x842   :  { %v12827_v62 = vrot.slane %v7157_v31, %v13948_v53  ;;  %v7390_v31 = vrot.slane %v12856_v16, %v13967_v8  ;;  %v7253_v26 = vcombine.high %v7243_v10, %v13989_v52 }
 0x844   :  { %7744 = vrot.lane.b32.xlu1 %v6909_v21, %s8509_s21  ;;  %7758 = vrot.lane.b32.xlu0 %v7252_v46, %s8509_s21  ;;  %v12798_v21 = vrot.slane %v7304_v35, %v13948_v53  ;;  %v7402_v46 = vcombine.high %v12571_v28, %v13989_v52  ;;  %v7500_v28 = vcombine.high %v12591_v24, %v13989_v52 }
 0x845   :  { %v7255_v24 = vcombine.high %v12609_v9, %v13989_v52  ;;  %v7194_v9 = vrot.slane %v12827_v62, %v13967_v8  ;;  %v6861_v35 = vcombine.high %v6851_v13, %v13989_v52 }
 0x846   :  { %v12830_v33 = vrot.slane %v7500_v28, %v13948_v53  ;;  %v6959_v28 = vcombine.high %v6949_v14, %v13989_v52 }
 0x848   :  { %7748 = vrot.lane.b32.xlu1 %v7007_v60, %s8509_s21  ;;  %7762 = vrot.lane.b32.xlu0 %v7350_v1, %s8509_s21  ;;  %v12809_v60 = vrot.slane %v7059_v2, %v13948_v53  ;;  %v12814_v1 = vrot.slane %v7402_v46, %v13948_v53  ;;  %v7537_v48 = vrot.slane %v12830_v33, %v13967_v8 }
 0x849   :  { %v7549_v2 = vcombine.high %v12652_v49, %v13989_v52 }
 0x84a   :  { %v7439_v36 = vrot.slane %v12814_v1, %v13967_v8 }
 0x84c   :  { %7752 = vrot.lane.b32.xlu1 %v7105_v51, %s8509_s21  ;;  %7766 = vrot.lane.b32.xlu0 %v7448_v15, %s8509_s21  ;;  %v6998_v51 = vrot.slane %v12793_v50, %v13967_v8  ;;  %v7341_v15 = vrot.slane %v12798_v21, %v13967_v8 }
 0x850   :  { %7756 = vrot.lane.b32.xlu1 %v7203_v6, %s8509_s21  ;;  %7770 = vrot.lane.b32.xlu0 %v7546_v27, %s8509_s21  ;;  %v7096_v27 = vrot.slane %v12809_v60, %v13967_v8 }
 0x854   :  { %7760 = vrot.lane.b32.xlu1 %v7301_v25, %s8509_s21  ;;  %7806 = vrot.lane.b32.xlu0 %v6851_v13, %s8510_s22  ;;  %v12843_v25 = vrot.slane %v7255_v24, %v13948_v53  ;;  %v12882_v13 = vrot.slane %v7549_v2, %v13948_v53 }
 0x856   :  { %v7292_v45 = vrot.slane %v12843_v25, %v13967_v8  ;;  %v7586_v2 = vrot.slane %v12882_v13, %v13967_v8 }
 0x858   :  { %7764 = vrot.lane.b32.xlu1 %v7399_v29, %s8509_s21  ;;  %7810 = vrot.lane.b32.xlu0 %v6949_v14, %s8510_s22 }
 0x85c   :  { %7768 = vrot.lane.b32.xlu1 %v7497_v38, %s8509_s21  ;;  %7814 = vrot.lane.b32.xlu0 %v7047_v20, %s8510_s22  ;;  %v7451_v38 = vcombine.high %v12638_v0, %v13989_v52 }
 0x860   :  { %7772 = vrot.lane.b32.xlu1 %v7595_v43, %s8509_s21  ;;  %7818 = vrot.lane.b32.xlu0 %v12778_v17, %s8510_s22  ;;  %v12868_v43 = vrot.slane %v7451_v38, %v13948_v53  ;;  %v7057_v38 = vcombine.high %v7047_v20, %v13989_v52 }
 0x862   :  { %v7488_v49 = vrot.slane %v12868_v43, %v13967_v8 }
 0x864   :  { %7808 = vrot.lane.b32.xlu1 %v6900_v19, %s8510_s22  ;;  %7822 = vrot.lane.b32.xlu0 %v7243_v10, %s8510_s22  ;;  %v7106_v10 = vcombine.high %v7096_v27, %v13989_v52 }
 0x866   :  { %v12818_v54 = vpop.permute.xlu0 %7614 }
 0x868   :  { %7812 = vrot.lane.b32.xlu1 %v6998_v51, %s8510_s22  ;;  %7826 = vrot.lane.b32.xlu0 %v7341_v15, %s8510_s22 }
 0x86a   :  { %v12834_v6 = vpop.permute.xlu0 %7618 }
 0x86c   :  { %7816 = vrot.lane.b32.xlu1 %v7096_v27, %s8510_s22  ;;  %7830 = vrot.lane.b32.xlu0 %v7439_v36, %s8510_s22  ;;  %v6942_v27 = vcombine.high %v12743_v57, %v13989_v52 }
 0x86e   :  { %v12847_v29 = vpop.permute.xlu0 %7622 }
 0x870   :  { %7820 = vrot.lane.b32.xlu1 %v7194_v9, %s8510_s22  ;;  %7834 = vrot.lane.b32.xlu0 %v7537_v48, %s8510_s22 }
 0x872   :  { %v12860_v30 = vpop.permute.xlu0 %7626 }
 0x874   :  { %7824 = vrot.lane.b32.xlu1 %v7292_v45, %s8510_s22  ;;  %7870 = vrot.lane.b32.xlu0 %v6861_v35, %s8511_s23 }
 0x876   :  { %v12872_v46 = vpop.permute.xlu1 %7616  ;;  %v12874_v0 = vpop.permute.xlu0 %7630 }
 0x877   :  { %13995 = vst [vmem:[#allocation73_spill] sm:$0xff] %v12872_v46 }
 0x878   :  { %7828 = vrot.lane.b32.xlu1 %v7390_v31, %s8510_s22  ;;  %7874 = vrot.lane.b32.xlu0 %v6959_v28, %s8511_s23  ;;  %v7155_v28 = vcombine.high %v12778_v17, %v13989_v52  ;;  %v7008_v17 = vcombine.high %v6998_v51, %v13989_v52  ;;  %v6844_v51 = vcombine.high %v12734_v59, %v13989_v52 }
 0x879   :  { %v7302_v59 = vcombine.high %v7292_v45, %v13989_v52  ;;  %v7138_v45 = vcombine.high %v12763_v39, %v13989_v52  ;;  %v7236_v39 = vcombine.high %v12784_v44, %v13989_v52  ;;  %v7334_v44 = vcombine.high %v12798_v21, %v13989_v52 }
 0x87a   :  { %v12884_v24 = vpop.permute.xlu1 %7620  ;;  %v12886_v37 = vpop.permute.xlu0 %7634  ;;  %v7432_v21 = vcombine.high %v12814_v1, %v13989_v52  ;;  %v7530_v1 = vcombine.high %v12830_v33, %v13989_v52  ;;  %v7285_v33 = vcombine.high %v12843_v25, %v13989_v52  ;;  %v7383_v25 = vcombine.high %v12856_v16, %v13989_v52 }
 0x87b   :  { %13996 = vst [vmem:[#allocation74_spill] sm:$0xff] %v12884_v24  ;;  %v7481_v16 = vcombine.high %v12868_v43, %v13989_v52  ;;  %v7579_v43 = vcombine.high %v12882_v13, %v13989_v52 }
 0x87c   :  { %7832 = vrot.lane.b32.xlu1 %v7488_v49, %s8510_s22  ;;  %7878 = vrot.lane.b32.xlu0 %v7057_v38, %s8511_s23  ;;  %v6910_v38 = vcombine.high %v6900_v19, %v13989_v52  ;;  %v13055_v12 = vrot.slane %v7530_v1, %v13967_v8 }
 0x87e   :  { %v12893_v14 = vpop.permute.xlu1 %7624  ;;  %v12895_v35 = vpop.permute.xlu0 %7638 }
 0x87f   :  { %v8058_v13 = vsel %vm552_vm0, %v12585_v7, %v12895_v35 }
 0x880   :  { %7836 = vrot.lane.b32.xlu1 %v7586_v2, %s8510_s22  ;;  %7882 = vrot.lane.b32.xlu0 %v7155_v28, %s8511_s23  ;;  %v7351_v28 = vcombine.high %v7341_v15, %v13989_v52 }
 0x882   :  { %v12903_v4 = vpop.permute.xlu1 %7628  ;;  %v12905_v20 = vpop.permute.xlu0 %7642 }
 0x883   :  { %v8053_v7 = vsel %vm552_vm0, %v12602_v55, %v12903_v4  ;;  %v8060_v35 = vsel %vm552_vm0, %v12605_v11, %v12905_v20  ;;  %v8046_v11 = vsel %vm552_vm0, %v12475_v40, %v12818_v54 }
 0x884   :  { %7872 = vrot.lane.b32.xlu1 %v6910_v38, %s8511_s23  ;;  %7886 = vrot.lane.b32.xlu0 %v7253_v26, %s8511_s23  ;;  %v7449_v26 = vcombine.high %v7439_v36, %v13989_v52 }
 0x886   :  { %v12911_v53 = vpop.permute.xlu1 %7632  ;;  %v12913_v42 = vpop.permute.xlu0 %7678 }
 0x887   :  { %v8055_v20 = vsel %vm552_vm0, %v12620_v41, %v12911_v53 }
 0x888   :  { %7876 = vrot.lane.b32.xlu1 %v7008_v17, %s8511_s23  ;;  %7890 = vrot.lane.b32.xlu0 %v7351_v28, %s8511_s23  ;;  %v7204_v17 = vcombine.high %v7194_v9, %v13989_v52  ;;  %v7547_v28 = vcombine.high %v7537_v48, %v13989_v52  ;;  %v7040_v9 = vcombine.high %v12755_v58, %v13989_v52 }
 0x88a   :  { %v12919_v5 = vpop.permute.xlu1 %7636  ;;  %v12921_v19 = vpop.permute.xlu0 %7682  ;;  %v12969_v24 = vrot.slane %v7040_v9, %v13967_v8  ;;  %v12984_v9 = vrot.slane %v7138_v45, %v13967_v8  ;;  %v13001_v45 = vrot.slane %v7236_v39, %v13967_v8  ;;  %v13019_v39 = vrot.slane %v7334_v44, %v13967_v8 }
 0x88b   :  { %v13037_v44 = vrot.slane %v7432_v21, %v13967_v8  ;;  %v8057_v41 = vsel %vm552_vm0, %v12634_v18, %v12919_v5  ;;  %v14002_v18 = vld [vmem:[#allocation71_spill] sm:$0xff] }
 0x88c   :  { %7880 = vrot.lane.b32.xlu1 %v7106_v10, %s8511_s23  ;;  %7894 = vrot.lane.b32.xlu0 %v7449_v26, %s8511_s23  ;;  %v12943_v26 = vrot.slane %v6844_v51, %v13967_v8  ;;  %v7352_v54 = vcombine.high %v13019_v39, %v13989_v52 }
 0x88e   :  { %v12929_v15 = vpop.permute.xlu1 %7640  ;;  %v7687_v38 = vpop.permute.xlu0 %7686 }
 0x88f   :  { %13997 = vst [vmem:[#allocation76_spill] sm:$0xff] %v12929_v15 }
 0x890   :  { %7884 = vrot.lane.b32.xlu1 %v7204_v17, %s8511_s23  ;;  %7898 = vrot.lane.b32.xlu0 %v7547_v28, %s8511_s23  ;;  %v7400_v17 = vcombine.high %v7390_v31, %v13989_v52  ;;  %v12956_v28 = vrot.slane %v6942_v27, %v13967_v8  ;;  %v6893_v31 = vcombine.high %v12781_v3, %v13989_v52 }
 0x891   :  { %v6991_v3 = vcombine.high %v12793_v50, %v13989_v52  ;;  %v7089_v50 = vcombine.high %v12809_v60, %v13989_v52  ;;  %v7187_v60 = vcombine.high %v12827_v62, %v13989_v52  ;;  %v8050_v62 = vsel %vm552_vm0, %v12501_v47, %v12847_v29 }
 0x892   :  { %v12937_v36 = vpop.permute.xlu1 %7644  ;;  %v12939_v10 = vpop.permute.xlu0 %7690  ;;  %v8066_v63 = vsel %vm555_vm1, %v8050_v62, %v7687_v38  ;;  %v8052_v47 = vsel %vm552_vm0, %v12517_v32, %v12860_v30  ;;  %v8054_v32 = vsel %vm552_vm0, %v12540_v61, %v12874_v0  ;;  %v13094_v62 = vrot.slane %v7383_v25, %v13967_v8 }
 0x893   :  { %13998 = vst [vmem:[#allocation77_spill] sm:$0xff] %v12937_v36  ;;  %v13052_v21 = vrot.slane %v7187_v60, %v13967_v8  ;;  %v8068_v29 = vsel %vm555_vm1, %v8052_v47, %v12939_v10  ;;  %v6862_v60 = vcombine.high %v12943_v26, %v13989_v52  ;;  %v8056_v61 = vsel %vm552_vm0, %v12565_v56, %v12886_v37 }
 0x894   :  { %7888 = vrot.lane.b32.xlu1 %v7302_v59, %s8511_s23  ;;  %7934 = vrot.lane.b32.xlu0 %v12943_v26, %s8512_s24  ;;  %v7498_v59 = vcombine.high %v7488_v49, %v13989_v52  ;;  %v7596_v49 = vcombine.high %v7586_v2, %v13989_v52  ;;  %v12998_v2 = vrot.slane %v6893_v31, %v13967_v8 }
 0x895   :  { %v13016_v31 = vrot.slane %v6991_v3, %v13967_v8  ;;  %v13034_v3 = vrot.slane %v7089_v50, %v13967_v8  ;;  %v13114_v25 = vrot.slane %v7481_v16, %v13967_v8  ;;  %v8051_v56 = vsel %vm552_vm0, %v12582_v22, %v12893_v14 }
 0x896   :  { %v12950_v48 = vpop.permute.xlu1 %7680  ;;  %v12952_v57 = vpop.permute.xlu0 %7694  ;;  %v7156_v16 = vcombine.high %v12984_v9, %v13989_v52 }
 0x897   :  { %13999 = vst [vmem:[#allocation83_spill] sm:$0xff] %v12950_v48  ;;  %v8070_v30 = vsel %vm555_vm1, %v8054_v32, %v12952_v57  ;;  %v13135_v32 = vrot.slane %v7579_v43, %v13967_v8  ;;  %v7009_v40 = vcombine.high %v13016_v31, %v13989_v52 }
 0x898   :  { %7892 = vrot.lane.b32.xlu1 %v7400_v17, %s8511_s23  ;;  %7938 = vrot.lane.b32.xlu0 %v12956_v28, %s8512_s24 }
 0x89a   :  { %v12963_v51 = vpop.permute.xlu1 %7684  ;;  %v12965_v58 = vpop.permute.xlu0 %7698 }
 0x89b   :  { %14000 = vst [vmem:[#allocation84_spill] sm:$0xff] %v12963_v51  ;;  %v8072_v0 = vsel %vm555_vm1, %v8056_v61, %v12965_v58 }
 0x89c   :  { %7896 = vrot.lane.b32.xlu1 %v7498_v59, %s8511_s23  ;;  %7942 = vrot.lane.b32.xlu0 %v12969_v24, %s8512_s24 }
 0x89e   :  { %v12978_v27 = vpop.permute.xlu1 %7688  ;;  %v12980_v17 = vpop.permute.xlu0 %7702 }
 0x89f   :  { %v8067_v37 = vsel %vm555_vm1, %v8051_v56, %v12978_v27  ;;  %v7548_v56 = vcombine.high %v13055_v12, %v13989_v52 }
 0x8a0   :  { %7900 = vrot.lane.b32.xlu1 %v7596_v49, %s8511_s23  ;;  %7946 = vrot.lane.b32.xlu0 %v12984_v9, %s8512_s24 }
 0x8a2   :  { %v12993_v59 = vpop.permute.xlu1 %7692  ;;  %v12995_v51 = vpop.permute.xlu0 %7706 }
 0x8a3   :  { %v8069_v27 = vsel %vm555_vm1, %v8053_v7, %v12993_v59 }
 0x8a4   :  { %7936 = vrot.lane.b32.xlu1 %v12998_v2, %s8512_s24  ;;  %7950 = vrot.lane.b32.xlu0 %v13001_v45, %s8512_s24 }
 0x8a6   :  { %v13011_v49 = vpop.permute.xlu1 %7696  ;;  %v13013_v48 = vpop.permute.xlu0 %7742 }
 0x8a7   :  { %v8071_v59 = vsel %vm555_vm1, %v8055_v20, %v13011_v49  ;;  %v14008_v20 = vld [vmem:[#allocation74_spill] sm:$0xff] }
 0x8a8   :  { %7940 = vrot.lane.b32.xlu1 %v13016_v31, %s8512_s24  ;;  %7954 = vrot.lane.b32.xlu0 %v13019_v39, %s8512_s24 }
 0x8aa   :  { %v13029_v34 = vpop.permute.xlu1 %7700  ;;  %v13031_v46 = vpop.permute.xlu0 %7746 }
 0x8ab   :  { %v8073_v49 = vsel %vm555_vm1, %v8057_v41, %v13029_v34  ;;  %v14001_v34 = vld [vmem:[#allocation76_spill] sm:$0xff] }
 0x8ac   :  { %7944 = vrot.lane.b32.xlu1 %v13034_v3, %s8512_s24  ;;  %7958 = vrot.lane.b32.xlu0 %v13037_v44, %s8512_s24 }
 0x8ae   :  { %v13049_v50 = vpop.permute.xlu1 %7704  ;;  %v7751_v36 = vpop.permute.xlu0 %7750 }
 0x8af   :  { %v13058_v15 = vsel %vm558_vm2, %v8066_v63, %v7751_v36  ;;  %v13074_v36 = vrot.slane %v7285_v33, %v13967_v8  ;;  %v6960_v33 = vcombine.high %v12956_v28, %v13989_v52 }
 0x8b0   :  { %7948 = vrot.lane.b32.xlu1 %v13052_v21, %s8512_s24  ;;  %7962 = vrot.lane.b32.xlu0 %v13055_v12, %s8512_s24 }
 0x8b1   :  { %v7303_v12 = vcombine.high %v13074_v36, %v13989_v52 }
 0x8b2   :  { %v13071_v38 = vpop.permute.xlu1 %7708  ;;  %v7755_v63 = vpop.permute.xlu0 %7754 }
 0x8b3   :  { %v13079_v1 = vsel %vm558_vm2, %v8068_v29, %v7755_v63  ;;  %v7058_v29 = vcombine.high %v12969_v24, %v13989_v52  ;;  %v8074_v24 = vsel %vm555_vm1, %v8058_v13, %v12980_v17  ;;  %v8076_v17 = vsel %vm555_vm1, %v8060_v35, %v12995_v51  ;;  %v14005_v35 = vld [vmem:[#allocation73_spill] sm:$0xff] }
 0x8b4   :  { %7952 = vrot.lane.b32.xlu1 %v13074_v36, %s8512_s24  ;;  %7998 = vrot.lane.b32.xlu0 %v6862_v60, %s8513_s25  ;;  %v8062_v51 = vsel %vm555_vm1, %v8046_v11, %v12913_v42  ;;  %v8048_v42 = vsel %vm552_vm0, %v12487_v23, %v12834_v6  ;;  %v7107_v23 = vcombine.high %v13034_v3, %v13989_v52 }
 0x8b5   :  { %v7450_v6 = vcombine.high %v13037_v44, %v13989_v52  ;;  %v7205_v44 = vcombine.high %v13052_v21, %v13989_v52 }
 0x8b6   :  { %v13091_v10 = vpop.permute.xlu1 %7744  ;;  %v7759_v26 = vpop.permute.xlu0 %7758 }
 0x8b7   :  { %v13099_v47 = vsel %vm558_vm2, %v8070_v30, %v7759_v26  ;;  %v6911_v26 = vcombine.high %v12998_v2, %v13989_v52  ;;  %v8078_v2 = vsel %vm558_vm2, %v8062_v51, %v13013_v48  ;;  %v8064_v48 = vsel %vm555_vm1, %v8048_v42, %v12921_v19  ;;  %v14009_v51 = vld [vmem:[#allocation69_spill] sm:$0xff] }
 0x8b8   :  { %7956 = vrot.lane.b32.xlu1 %v13094_v62, %s8512_s24  ;;  %8002 = vrot.lane.b32.xlu0 %v6960_v33, %s8513_s25  ;;  %v7254_v33 = vcombine.high %v13001_v45, %v13989_v52  ;;  %v8080_v31 = vsel %vm558_vm2, %v8064_v48, %v13031_v46  ;;  %v8059_v46 = vsel %vm552_vm0, %v14002_v18, %v14001_v34 }
 0x8b9   :  { %v8075_v19 = vsel %vm555_vm1, %v8059_v46, %v13049_v50  ;;  %v7597_v48 = vcombine.high %v13135_v32, %v13989_v52 }
 0x8ba   :  { %v13111_v57 = vpop.permute.xlu1 %7748  ;;  %v7763_v28 = vpop.permute.xlu0 %7762 }
 0x8bb   :  { %v13119_v63 = vsel %vm558_vm2, %v8072_v0, %v7763_v28 }
 0x8bc   :  { %7960 = vrot.lane.b32.xlu1 %v13114_v25, %s8512_s24  ;;  %8006 = vrot.lane.b32.xlu0 %v7058_v29, %s8513_s25 }
 0x8be   :  { %v7753_v58 = vpop.permute.xlu1 %7752  ;;  %v7767_v60 = vpop.permute.xlu0 %7766 }
 0x8bf   :  { %v13140_v22 = vsel %vm558_vm2, %v8067_v37, %v7753_v58  ;;  %v13143_v14 = vsel %vm558_vm2, %v8074_v24, %v7767_v60  ;;  %v14003_v24 = vld [vmem:[#allocation77_spill] sm:$0xff]  ;;  %v14004_v58 = vld [vmem:[#allocation72_spill] sm:$0xff] }
 0x8c0   :  { %7964 = vrot.lane.b32.xlu1 %v13135_v32, %s8512_s24  ;;  %8010 = vrot.lane.b32.xlu0 %v7156_v16, %s8513_s25  ;;  %v8061_v50 = vsel %vm552_vm0, %v14004_v58, %v14003_v24 }
 0x8c1   :  { %v8077_v60 = vsel %vm555_vm1, %v8061_v50, %v13071_v38 }
 0x8c2   :  { %v7757_v9 = vpop.permute.xlu1 %7756  ;;  %v7771_v30 = vpop.permute.xlu0 %7770 }
 0x8c3   :  { %v13163_v4 = vsel %vm558_vm2, %v8069_v27, %v7757_v9  ;;  %v13166_v55 = vsel %vm558_vm2, %v8076_v17, %v7771_v30  ;;  %v14006_v27 = vld [vmem:[#allocation91_spill] sm:$0xff] }
 0x8c4   :  { %8000 = vrot.lane.b32.xlu1 %v6911_v26, %s8513_s25  ;;  %8014 = vrot.lane.b32.xlu0 %v7254_v33, %s8513_s25  ;;  %v8047_v17 = vsel %vm552_vm0, %v14006_v27, %v14005_v35  ;;  %v14007_v9 = vld [vmem:[#allocation83_spill] sm:$0xff]  ;;  %v7401_v33 = vcombine.high %v13094_v62, %v13989_v52  ;;  %v7499_v62 = vcombine.high %v13114_v25, %v13989_v52 }
 0x8c5   :  { %v8063_v38 = vsel %vm555_vm1, %v8047_v17, %v14007_v9 }
 0x8c6   :  { %v7761_v45 = vpop.permute.xlu1 %7760  ;;  %v7807_v61 = vpop.permute.xlu0 %7806  ;;  %v8079_v30 = vsel %vm558_vm2, %v8063_v38, %v13091_v10 }
 0x8c7   :  { %v13187_v43 = vsel %vm558_vm2, %v8071_v59, %v7761_v45  ;;  %v13190_v53 = vsel %vm561_vm3, %v8078_v2, %v7807_v61  ;;  %v8049_v59 = vsel %vm552_vm0, %v14009_v51, %v14008_v20  ;;  %v14010_v2 = vld [vmem:[#allocation84_spill] sm:$0xff] }
 0x8c8   :  { %8004 = vrot.lane.b32.xlu1 %v7009_v40, %s8513_s25  ;;  %8018 = vrot.lane.b32.xlu0 %v7352_v54, %s8513_s25  ;;  %v8065_v45 = vsel %vm555_vm1, %v8049_v59, %v14010_v2 }
 0x8c9   :  { %v8081_v10 = vsel %vm558_vm2, %v8065_v45, %v13111_v57 }
 0x8ca   :  { %v7765_v39 = vpop.permute.xlu1 %7764  ;;  %v7811_v0 = vpop.permute.xlu0 %7810 }
 0x8cb   :  { %v8089_v28 = vsel %vm558_vm2, %v8073_v49, %v7765_v39  ;;  %v8096_v5 = vsel %vm561_vm3, %v8080_v31, %v7811_v0 }
 0x8cc   :  { %8008 = vrot.lane.b32.xlu1 %v7107_v23, %s8513_s25  ;;  %8022 = vrot.lane.b32.xlu0 %v7450_v6, %s8513_s25 }
 0x8ce   :  { %v7769_v29 = vpop.permute.xlu1 %7768  ;;  %v7815_v3 = vpop.permute.xlu0 %7814 }
 0x8cf   :  { %v8091_v13 = vsel %vm558_vm2, %v8075_v19, %v7769_v29  ;;  %v8098_v37 = vsel %vm561_vm3, %v13058_v15, %v7815_v3 }
 0x8d0   :  { %8012 = vrot.lane.b32.xlu1 %v7205_v44, %s8513_s25  ;;  %8026 = vrot.lane.b32.xlu0 %v7548_v56, %s8513_s25 }
 0x8d2   :  { %v7773_v21 = vpop.permute.xlu1 %7772  ;;  %v7819_v16 = vpop.permute.xlu0 %7818 }
 0x8d3   :  { %v8093_v7 = vsel %vm558_vm2, %v8077_v60, %v7773_v21  ;;  %v13238_v15 = vsel %vm561_vm3, %v13079_v1, %v7819_v16 }
 0x8d4   :  { %8016 = vrot.lane.b32.xlu1 %v7303_v12, %s8513_s25 }
 0x8d6   :  { %v7809_v26 = vpop.permute.xlu1 %7808  ;;  %v7823_v36 = vpop.permute.xlu0 %7822 }
 0x8d7   :  { %v8095_v1 = vsel %vm561_vm3, %v8079_v30, %v7809_v26  ;;  %v8102_v11 = vsel %vm561_vm3, %v13099_v47, %v7823_v36 }
 0x8d8   :  { %8020 = vrot.lane.b32.xlu1 %v7401_v33, %s8513_s25 }
 0x8da   :  { %v7813_v61 = vpop.permute.xlu1 %7812  ;;  %v7827_v40 = vpop.permute.xlu0 %7826 }
 0x8db   :  { %v8097_v54 = vsel %vm561_vm3, %v8081_v10, %v7813_v61  ;;  %v8104_v47 = vsel %vm561_vm3, %v13119_v63, %v7827_v40 }
 0x8dc   :  { %8024 = vrot.lane.b32.xlu1 %v7499_v62, %s8513_s25 }
 0x8de   :  { %v7817_v42 = vpop.permute.xlu1 %7816  ;;  %v7831_v41 = vpop.permute.xlu0 %7830 }
 0x8df   :  { %v8099_v57 = vsel %vm561_vm3, %v13140_v22, %v7817_v42  ;;  %v8106_v49 = vsel %vm561_vm3, %v13143_v14, %v7831_v41 }
 0x8e0   :  { %8028 = vrot.lane.b32.xlu1 %v7597_v48, %s8513_s25 }
 0x8e2   :  { %v7821_v25 = vpop.permute.xlu1 %7820  ;;  %v7835_v31 = vpop.permute.xlu0 %7834 }
 0x8e3   :  { %v13276_v63 = vsel %vm561_vm3, %v13163_v4, %v7821_v25  ;;  %v13280_v39 = vsel %vm561_vm3, %v13166_v55, %v7835_v31 }
 0x8e6   :  { %v7825_v0 = vpop.permute.xlu1 %7824  ;;  %v7871_v52 = vpop.permute.xlu0 %7870 }
 0x8e7   :  { %v8103_v32 = vsel %vm561_vm3, %v13187_v43, %v7825_v0  ;;  %v8110_v22 = vsel %vm564_vm4, %v13190_v53, %v7871_v52 }
 0x8ea   :  { %v7829_v14 = vpop.permute.xlu1 %7828  ;;  %v7875_v23 = vpop.permute.xlu0 %7874 }
 0x8eb   :  { %v8105_v6 = vsel %vm561_vm3, %v8089_v28, %v7829_v14  ;;  %v8112_v34 = vsel %vm564_vm4, %v8096_v5, %v7875_v23 }
 0x8ee   :  { %v7833_v4 = vpop.permute.xlu1 %7832  ;;  %v7879_v18 = vpop.permute.xlu0 %7878 }
 0x8ef   :  { %v8107_v46 = vsel %vm561_vm3, %v8091_v13, %v7833_v4  ;;  %v8114_v55 = vsel %vm564_vm4, %v8098_v37, %v7879_v18 }
 0x8f2   :  { %v7837_v19 = vpop.permute.xlu1 %7836  ;;  %v7883_v29 = vpop.permute.xlu0 %7882 }
 0x8f3   :  { %v13291_v3 = vsel %vm561_vm3, %v8093_v7, %v7837_v19 }
 0x8f6   :  { %v7873_v43 = vpop.permute.xlu1 %7872  ;;  %v7887_v44 = vpop.permute.xlu0 %7886 }
 0x8f7   :  { %v8111_v53 = vsel %vm564_vm4, %v8095_v1, %v7873_v43  ;;  %v8118_v56 = vsel %vm564_vm4, %v8102_v11, %v7887_v44 }
 0x8fa   :  { %v7877_v28 = vpop.permute.xlu1 %7876  ;;  %v7891_v24 = vpop.permute.xlu0 %7890 }
 0x8fb   :  { %v8113_v5 = vsel %vm564_vm4, %v8097_v54, %v7877_v28  ;;  %v8120_v58 = vsel %vm564_vm4, %v8104_v47, %v7891_v24 }
 0x8fe   :  { %v7881_v13 = vpop.permute.xlu1 %7880  ;;  %v7895_v50 = vpop.permute.xlu0 %7894 }
 0x8ff   :  { %v13298_v37 = vsel %vm564_vm4, %v8099_v57, %v7881_v13  ;;  %v13301_v60 = vsel %vm564_vm4, %v8106_v49, %v7895_v50  ;;  %v14011_v57 = vld [vmem:[#allocation11_spill] sm:$0xff] }
 0x902   :  { %v13303_v21 = vpop.permute.xlu1 %7884  ;;  %v13305_v16 = vpop.permute.xlu0 %7898 }
 0x906   :  { %v7889_v12 = vpop.permute.xlu1 %7888  ;;  %v7935_v7 = vpop.permute.xlu0 %7934 }
 0x907   :  { %v13308_v35 = vsel %vm564_vm4, %v8103_v32, %v7889_v12  ;;  %v8126_v62 = vsel %vm567_vm5, %v8110_v22, %v7935_v7  ;;  %v8116_v22 = vsel %vm564_vm4, %v13238_v15, %v7883_v29 }
 0x90a   :  { %v7893_v27 = vpop.permute.xlu1 %7892  ;;  %v7939_v17 = vpop.permute.xlu0 %7938 }
 0x90b   :  { %v13311_v9 = vsel %vm564_vm4, %v8105_v6, %v7893_v27  ;;  %v8128_v47 = vsel %vm567_vm5, %v8112_v34, %v7939_v17 }
 0x90e   :  { %v7897_v38 = vpop.permute.xlu1 %7896  ;;  %v7943_v30 = vpop.permute.xlu0 %7942 }
 0x90f   :  { %v13314_v26 = vsel %vm564_vm4, %v8107_v46, %v7897_v38  ;;  %v8130_v32 = vsel %vm567_vm5, %v8114_v55, %v7943_v30 }
 0x912   :  { %v13316_v36 = vpop.permute.xlu1 %7900  ;;  %v7947_v33 = vpop.permute.xlu0 %7946 }
 0x913   :  { %v8132_v23 = vsel %vm567_vm5, %v8116_v22, %v7947_v33 }
 0x916   :  { %v7937_v1 = vpop.permute.xlu1 %7936  ;;  %v7951_v11 = vpop.permute.xlu0 %7950 }
 0x917   :  { %v8127_v55 = vsel %vm567_vm5, %v8111_v53, %v7937_v1  ;;  %v8134_v15 = vsel %vm567_vm5, %v8118_v56, %v7951_v11 }
 0x91a   :  { %v7941_v20 = vpop.permute.xlu1 %7940  ;;  %v7955_v51 = vpop.permute.xlu0 %7954 }
 0x91b   :  { %v8129_v24 = vsel %vm567_vm5, %v8113_v5, %v7941_v20  ;;  %v8136_v13 = vsel %vm567_vm5, %v8120_v58, %v7955_v51  ;;  %v14012_v20 = vld [vmem:[#allocation12_spill] sm:$0xff] }
 0x91e   :  { %v7945_v59 = vpop.permute.xlu1 %7944  ;;  %v7959_v2 = vpop.permute.xlu0 %7958 }
 0x91f   :  { %v8131_v58 = vsel %vm567_vm5, %v13298_v37, %v7945_v59  ;;  %v8138_v11 = vsel %vm567_vm5, %v13301_v60, %v7959_v2 }
 0x922   :  { %v7949_v45 = vpop.permute.xlu1 %7948  ;;  %v7963_v10 = vpop.permute.xlu0 %7962 }
 0x926   :  { %v13318_v61 = vpop.permute.xlu1 %7952  ;;  %v7999_v40 = vpop.permute.xlu0 %7998 }
 0x927   :  { %v8142_v54 = vsel %vm570_vm6, %v8126_v62, %v7999_v40  ;;  %v8117_v62 = vsel %vm564_vm4, %v13276_v63, %v13303_v21 }
 0x928   :  { %v8161_v49 = vrot.slane %v8142_v54, %v14011_v57  ;;  %v8124_v54 = vsel %vm564_vm4, %v13280_v39, %v13305_v16  ;;  %v8133_v37 = vsel %vm567_vm5, %v8117_v62, %v7949_v45 }
 0x929   :  { %v8140_v60 = vsel %vm567_vm5, %v8124_v54, %v7963_v10  ;;  %v8135_v10 = vsel %vm567_vm5, %v13308_v35, %v13318_v61 }
 0x92a   :  { %v13323_v42 = vpop.permute.xlu1 %7956  ;;  %v8003_v41 = vpop.permute.xlu0 %8002 }
 0x92b   :  { %v8144_v48 = vsel %vm570_vm6, %v8128_v47, %v8003_v41 }
 0x92c   :  { %v8169_v25 = vrot.slane %v8144_v48, %v14011_v57 }
 0x92e   :  { %v8222_v31 = vcombine.low %v8161_v49, %v8169_v25  ;;  %v13328_v0 = vpop.permute.xlu1 %7960  ;;  %v8007_v52 = vpop.permute.xlu0 %8006 }
 0x92f   :  { %v8146_v14 = vsel %vm570_vm6, %v8130_v32, %v8007_v52 }
 0x930   :  { %v8177_v18 = vrot.slane %v8146_v14, %v14011_v57  ;;  %v8229_v51 = vrot.slane %v8222_v31, %v14012_v20 }
 0x932   :  { %v13335_v6 = vpop.permute.xlu1 %7964  ;;  %v8011_v34 = vpop.permute.xlu0 %8010 }
 0x933   :  { %v8148_v4 = vsel %vm570_vm6, %v8132_v23, %v8011_v34  ;;  %v8137_v34 = vsel %vm567_vm5, %v13311_v9, %v13323_v42 }
 0x934   :  { %v8185_v46 = vrot.slane %v8148_v4, %v14011_v57 }
 0x936   :  { %v8238_v19 = vcombine.low %v8177_v18, %v8185_v46  ;;  %v8001_v43 = vpop.permute.xlu1 %8000  ;;  %v8015_v44 = vpop.permute.xlu0 %8014 }
 0x937   :  { %v8143_v29 = vsel %vm570_vm6, %v8127_v55, %v8001_v43  ;;  %v8150_v28 = vsel %vm570_vm6, %v8134_v15, %v8015_v44 }
 0x938   :  { %v8165_v17 = vrot.slane %v8143_v29, %v14011_v57  ;;  %v8193_v53 = vrot.slane %v8150_v28, %v14011_v57  ;;  %v8245_v22 = vrot.slane %v8238_v19, %v14012_v20 }
 0x93a   :  { %v8005_v50 = vpop.permute.xlu1 %8004  ;;  %v8019_v12 = vpop.permute.xlu0 %8018 }
 0x93b   :  { %v8145_v7 = vsel %vm570_vm6, %v8129_v24, %v8005_v50  ;;  %v8152_v27 = vsel %vm570_vm6, %v8136_v13, %v8019_v12  ;;  %v8139_v50 = vsel %vm567_vm5, %v13314_v26, %v13328_v0 }
 0x93c   :  { %v8173_v56 = vrot.slane %v8145_v7, %v14011_v57  ;;  %v8201_v38 = vrot.slane %v8152_v27, %v14011_v57  ;;  %v8125_v27 = vsel %vm564_vm4, %v13291_v3, %v13316_v36 }
 0x93e   :  { %v8230_v30 = vcombine.low %v8165_v17, %v8173_v56  ;;  %v8290_v33 = vcombine.low %v8193_v53, %v8201_v38  ;;  %v8009_v1 = vpop.permute.xlu1 %8008  ;;  %v8023_v5 = vpop.permute.xlu0 %8022  ;;  %v8141_v53 = vsel %vm567_vm5, %v8125_v27, %v13335_v6 }
 0x93f   :  { %v8147_v47 = vsel %vm570_vm6, %v8131_v58, %v8009_v1  ;;  %v8154_v41 = vsel %vm570_vm6, %v8138_v11, %v8023_v5 }
 0x940   :  { %v8237_v40 = vrot.slane %v8230_v30, %v14012_v20  ;;  %v8181_v21 = vrot.slane %v8147_v47, %v14011_v57  ;;  %v8209_v39 = vrot.slane %v8154_v41, %v14011_v57  ;;  %v8297_v12 = vrot.slane %v8290_v33, %v14012_v20 }
 0x942   :  { %v8254_v59 = vcombine.low %v8229_v51, %v8237_v40  ;;  %v8255_v2 = vcombine.high %v8229_v51, %v8237_v40  ;;  %v8013_v48 = vpop.permute.xlu1 %8012  ;;  %v8027_v49 = vpop.permute.xlu0 %8026 }
 0x943   :  { %v8149_v25 = vsel %vm570_vm6, %v8133_v37, %v8013_v48  ;;  %v8156_v63 = vsel %vm570_vm6, %v8140_v60, %v8027_v49 }
 0x944   :  { %v8189_v16 = vrot.slane %v8149_v25, %v14011_v57  ;;  %v8217_v31 = vrot.slane %v8156_v63, %v14011_v57  ;;  %v8262_v44 = vrot.slane %v8254_v59, %v13967_v8  ;;  %v8269_v55 = vrot.slane %v8255_v2, %v13967_v8 }
 0x946   :  { %v8246_v52 = vcombine.low %v8181_v21, %v8189_v16  ;;  %v8306_v45 = vcombine.low %v8209_v39, %v8217_v31  ;;  %v8017_v32 = vpop.permute.xlu1 %8016  ;;  %v14014_v31 = vld [vmem:[#allocation36_spill] sm:$0xff] }
 0x947   :  { %v8151_v23 = vsel %vm570_vm6, %v8135_v10, %v8017_v32 }
 0x948   :  { %v8253_v14 = vrot.slane %v8246_v52, %v14012_v20  ;;  %v8197_v35 = vrot.slane %v8151_v23, %v14011_v57  ;;  %v8313_v5 = vrot.slane %v8306_v45, %v14012_v20 }
 0x94a   :  { %v8270_v4 = vcombine.low %v8245_v22, %v8253_v14  ;;  %v8271_v18 = vcombine.high %v8245_v22, %v8253_v14  ;;  %v8021_v46 = vpop.permute.xlu1 %8020 }
 0x94b   :  { %v8153_v43 = vsel %vm570_vm6, %v8137_v34, %v8021_v46 }
 0x94c   :  { %v8205_v61 = vrot.slane %v8153_v43, %v14011_v57  ;;  %v8278_v19 = vrot.slane %v8270_v4, %v13967_v8  ;;  %v8285_v15 = vrot.slane %v8271_v18, %v13967_v8 }
 0x94e   :  { %v8298_v29 = vcombine.low %v8197_v35, %v8205_v61  ;;  %v8025_v28 = vpop.permute.xlu1 %8024  ;;  %v8287_v9 = vcombine.high %v8262_v44, %v8278_v19  ;;  %v8288_v42 = vcombine.low %v8269_v55, %v8285_v15  ;;  %v8289_v24 = vcombine.high %v8269_v55, %v8285_v15 }
 0x94f   :  { %v8286_v13 = vcombine.low %v8262_v44, %v8278_v19  ;;  %v8155_v17 = vsel %vm570_vm6, %v8139_v50, %v8025_v28 }
 0x950   :  { %v8305_v7 = vrot.slane %v8298_v29, %v14012_v20  ;;  %8360 = vrot.lane.b32.xlu0 %v8287_v9, %s8517_s28  ;;  %v8213_v0 = vrot.slane %v8155_v17, %v14011_v57 }
 0x952   :  { %v8322_v56 = vcombine.low %v8297_v12, %v8305_v7  ;;  %v8323_v38 = vcombine.high %v8297_v12, %v8305_v7  ;;  %v8029_v30 = vpop.permute.xlu1 %8028 }
 0x953   :  { %v8157_v26 = vsel %vm570_vm6, %v8141_v53, %v8029_v30 }
 0x954   :  { %v8221_v33 = vrot.slane %v8157_v26, %v14011_v57  ;;  %8368 = vrot.lane.b32.xlu0 %v8288_v42, %s8518_s29  ;;  %v8330_v58 = vrot.slane %v8322_v56, %v13967_v8  ;;  %v8337_v51 = vrot.slane %v8323_v38, %v13967_v8 }
 0x956   :  { %v8314_v1 = vcombine.low %v8213_v0, %v8221_v33 }
 0x958   :  { %v8321_v3 = vrot.slane %v8314_v1, %v14012_v20  ;;  %8376 = vrot.lane.b32.xlu0 %v8289_v24, %s8519_s30 }
 0x95a   :  { %v8338_v36 = vcombine.low %v8313_v5, %v8321_v3  ;;  %v8339_v6 = vcombine.high %v8313_v5, %v8321_v3 }
 0x95c   :  { %v8346_v11 = vrot.slane %v8338_v36, %v13967_v8  ;;  %v8353_v40 = vrot.slane %v8339_v6, %v13967_v8  ;;  %v14013_v8 = vld [vmem:[#allocation60_spill] sm:$0xff] }
 0x95e   :  { %v8355_v57 = vcombine.high %v8330_v58, %v8346_v11  ;;  %v8356_v62 = vcombine.low %v8337_v51, %v8353_v40  ;;  %v8357_v54 = vcombine.high %v8337_v51, %v8353_v40  ;;  %v8354_v47 = vcombine.low %v8330_v58, %v8346_v11 }
 0x960   :  { %8362 = vrot.lane.b32.xlu1 %v8355_v57, %s8517_s28 }
 0x964   :  { %8370 = vrot.lane.b32.xlu1 %v8356_v62, %s8518_s29 }
 0x968   :  { %8378 = vrot.lane.b32.xlu1 %v8357_v54, %s8519_s30 }
 0x9c2   :  { %v8361_v20 = vpop.permute.xlu0 %8360 }
 0x9c3   :  { %v8382_v37 = vsel %vm1767_vm7, %v8286_v13, %v8361_v20 }
 0x9c6   :  { %v8369_v41 = vpop.permute.xlu0 %8368 }
 0x9c7   :  { %v8384_v60 = vsel %vm1770_vm8, %v8382_v37, %v8369_v41 }
 0x9ca   :  { %v8377_v59 = vpop.permute.xlu0 %8376 }
 0x9cb   :  { %v8386_v2 = vsel %vm1773_vm9, %v8384_v60, %v8377_v59 }
 0x9cc   :  { %v8388_v48 = vmul.f32 %v8386_v2, %v14013_v8 }
 0x9ce   :  { %8390 = vst [vmem:[#allocation7 + $0x18] sm:$0xff] %v8388_v48 }
 0x9d2   :  { %v8363_v49 = vpop.permute.xlu1 %8362 }
 0x9d3   :  { %v8383_v63 = vsel %vm1767_vm7, %v8354_v47, %v8363_v49 }
 0x9d6   :  { %v8371_v25 = vpop.permute.xlu1 %8370 }
 0x9d7   :  { %v8385_v21 = vsel %vm1770_vm8, %v8383_v63, %v8371_v25 }
 0x9da   :  { %v8379_v39 = vpop.permute.xlu1 %8378 }
 0x9db   :  { %v8387_v16 = vsel %vm1773_vm9, %v8385_v21, %v8379_v39 }
 0x9dc   :  { %v8389_v52 = vmul.f32 %v8387_v16, %v14014_v31 }
 0x9de   :  { %8391 = vst [vmem:[#allocation7 + $0x38] sm:$0xff] %v8389_v52 }
 0x9df   :  { %8485 = shalt.err (!%p8482_p0)
}
 0x9e0   :  { %s8521_s6 = smov 512  }
 0x9e1   :  { %8403 = dma.vmem_to_hbm [thread:$0]  %s8398_s4, 1024, %s13430_s2, [#allocation4], %s8521_s6, %s8521_s6, %s8517_s28  }
 0x9e2   :  { %8498 = dma.done.wait [#allocation4], 1024  }
 0x9e3   :  { %8499 = vsyncadd [#allocation4], 4294966272 }
 0x9e4   :  { %8407 = vsyncpa [#allocation3], 1 }
 0x9e5   :  { %8408 = vsyncpa [#allocation6], 1 }
 0x9e6   :  { %8409 = vsyncpa [#allocation4], 1 }

</bundles_post_ra>
